<compile_context>
chip_gen: v7x
topology: tpu7x:2x2x1
jax: 0.10.0
libtpu: 0.0.40
codegen_flags: <defaults>
</compile_context>

<pallas_src>
import functools
import math

import jax
import jax.numpy as jnp
from jax.experimental import pallas as pl
from jax.experimental.pallas import tpu as pltpu

LANE = 128


# ----------------------------------------------------------------------------
# helpers
# ----------------------------------------------------------------------------

def _round_up(x, m):
    return ((x + m - 1) // m) * m


def _pad2(x, rows, cols):
    return jnp.pad(x, ((0, rows - x.shape[0]), (0, cols - x.shape[1])))


def _nbytes(x):
    return int(math.prod(x.shape)) * jnp.dtype(x.dtype).itemsize


def _gelu_new(x):
    c = math.sqrt(2.0 / math.pi)
    return 0.5 * x * (1.0 + jnp.tanh(c * (x + 0.044715 * x * x * x)))


def _layernorm(x, g, b, eps=1e-5):
    mu = jnp.mean(x, axis=-1, keepdims=True)
    d = x - mu
    var = jnp.mean(d * d, axis=-1, keepdims=True)
    return d * jax.lax.rsqrt(var + eps) * g + b


# ----------------------------------------------------------------------------
# THE fused kernel: embed (l==0) -> transformer block l -> ln_f + head (l==L-1)
# ----------------------------------------------------------------------------

def _dt_kernel(
    # embedding inputs (constant index maps -> DMA'd once, resident)
    xstk_ref, ew1_ref, eb1_ref, ew2_ref, eb2_ref, t_ref, wpe_ref,
    # causal additive mask (constant, resident)
    mask_ref,
    # per-layer GPT-2 weights (streamed / double-buffered over the layer axis)
    ln1g_ref, ln1b_ref, wqkv_ref, bqkv_ref, wproj_ref, bproj_ref,
    ln2g_ref, ln2b_ref, wfc_ref, bfc_ref, wmlp_ref, bmlp_ref,
    # final ln_f + 2::3 selection + action head (constant, resident)
    lnfg_ref, lnfb_ref, sel_ref, aw1_ref, ab1_ref, aw2_ref, ab2_ref,
    # output
    o_ref,
    # residual stream scratch (persists across the whole layer axis)
    x_sc,
    *, B, T, S_pad, n_head):
    l = pl.program_id(0)
    E = wpe_ref.shape[-1]
    hd = E // n_head

    # ---------------- l == 0: fused tokenizers + timestep + positional embed
    @pl.when(l == 0)
    def _():
        x_sc[...] = jnp.zeros_like(x_sc)          # also covers padded rows
        for i in range(3):                        # concat order: rtg, state, action
            xi = xstk_ref[i].astype(jnp.bfloat16)                       # (B*T, DIN_PAD)
            h = jnp.dot(xi, ew1_ref[i],
                        preferred_element_type=jnp.float32) + eb1_ref[i]
            h = jnp.maximum(h, 0.0)
            y = jnp.dot(h.astype(jnp.bfloat16), ew2_ref[i],
                        preferred_element_type=jnp.float32) + eb2_ref[i]  # (B*T, E)
            y = y + t_ref[...] + wpe_ref[i]       # raw timestep add + wpe (pre-broadcast)
            for b in range(B):
                x_sc[pl.ds(b * S_pad + i * T, T), :] = y[b * T:(b + 1) * T, :]

    # ---------------- transformer block l (runs every grid step)
    x = x_sc[...]                                                       # (B*S_pad, E) f32
    scale = 1.0 / math.sqrt(hd)

    a = _layernorm(x, ln1g_ref[0], ln1b_ref[0])
    qkv = jnp.dot(a.astype(jnp.bfloat16), wqkv_ref[0],
                  preferred_element_type=jnp.float32) + bqkv_ref[0]     # (B*S_pad, 3E)

    wproj = wproj_ref[0]                                                # (E, E) bf16
    mask = mask_ref[...]                                                # (S_pad, S_pad)
    attn_rows = []
    for b in range(B):
        qkv_b = qkv[b * S_pad:(b + 1) * S_pad, :]
        acc = jnp.zeros((S_pad, E), jnp.float32)
        for h in range(n_head):
            q = qkv_b[:, h * hd:(h + 1) * hd]
            k = qkv_b[:, E + h * hd:E + (h + 1) * hd]
            v = qkv_b[:, 2 * E + h * hd:2 * E + (h + 1) * hd]
            s = jax.lax.dot_general(q.astype(jnp.bfloat16), k.astype(jnp.bfloat16),
                                    (((1,), (1,)), ((), ())),
                                    preferred_element_type=jnp.float32) * scale
            s = s + mask
            m = jnp.max(s, axis=-1, keepdims=True)
            p = jnp.exp(s - m)
            p = p * pl.reciprocal(jnp.sum(p, axis=-1, keepdims=True), approx=True)
            pv = jnp.dot(p.astype(jnp.bfloat16), v.astype(jnp.bfloat16),
                         preferred_element_type=jnp.float32)            # (S_pad, hd)
            # accumulate straight through this head's slice of wproj (no concat)
            acc = acc + jnp.dot(pv.astype(jnp.bfloat16),
                                wproj[h * hd:(h + 1) * hd, :],
                                preferred_element_type=jnp.float32)
        attn_rows.append(acc)
    attn = jnp.concatenate(attn_rows, axis=0) + bproj_ref[0]
    x = x + attn

    m2 = _layernorm(x, ln2g_ref[0], ln2b_ref[0])
    hmid = jnp.dot(m2.astype(jnp.bfloat16), wfc_ref[0],
                   preferred_element_type=jnp.float32) + bfc_ref[0]
    hmid = _gelu_new(hmid)
    mlp = jnp.dot(hmid.astype(jnp.bfloat16), wmlp_ref[0],
                  preferred_element_type=jnp.float32) + bmlp_ref[0]
    x = x + mlp
    x_sc[...] = x

    # ---------------- l == L-1: ln_f + rows 2::3 selection + action head
    @pl.when(l == pl.num_programs(0) - 1)
    def _():
        y = _layernorm(x, lnfg_ref[...], lnfb_ref[...])                 # (B*S_pad, E)
        picked = [jnp.dot(sel_ref[...], y[b * S_pad:(b + 1) * S_pad, :],
                          preferred_element_type=jnp.float32)           # (T, E)
                  for b in range(B)]
        z = jnp.concatenate(picked, axis=0)                             # (B*T, E)
        h1 = jnp.maximum(jnp.dot(z.astype(jnp.bfloat16), aw1_ref[...],
                                 preferred_element_type=jnp.float32) + ab1_ref[...], 0.0)
        o_ref[...] = jnp.dot(h1.astype(jnp.bfloat16), aw2_ref[...],
                             preferred_element_type=jnp.float32) + ab2_ref[...]


# ----------------------------------------------------------------------------
# Forward wrapper: input packing + the single pallas_call
# ----------------------------------------------------------------------------

def decision_transformer_forward(params, states, actions, rtgs, timesteps,
                                 n_head, action_dim):
    B, T, _ = states.shape
    S = 3 * T
    S_pad = _round_up(S, 8)          # keep sequence a multiple of 8 sublanes
    BT = B * T
    g = params["gpt2"]
    E = g["lnfg"].shape[-1]
    L = g["wqkv"].shape[0]
    DIN_PAD = params["enc_w1"].shape[1]
    LAT_PAD = params["enc_w1"].shape[-1]
    A_PAD = params["ah_w2"].shape[-1]
    FF = g["wfc"].shape[-1]
    hd = E // n_head

    # pack the three encoder inputs (rtg / state / action) into one padded slab
    x_stack = jnp.zeros((3, BT, DIN_PAD), jnp.float32)
    x_stack = x_stack.at[0, :, :1].set(rtgs.reshape(BT, 1).astype(jnp.float32))
    x_stack = x_stack.at[1, :, :states.shape[-1]].set(
        states.reshape(BT, -1).astype(jnp.float32))
    x_stack = x_stack.at[2, :, :actions.shape[-1]].set(
        actions.reshape(BT, -1).astype(jnp.float32))

    t = timesteps.reshape(BT, 1).astype(jnp.float32)
    # wpe per stream, pre-broadcast over batch -> (3, B*T, E)
    wpe_bc = jnp.tile(g["wpe"][:S].reshape(3, T, E), (1, B, 1))

    # causal additive mask, built once (resident in VMEM for the whole kernel)
    row = jnp.arange(S_pad)[:, None]
    col = jnp.arange(S_pad)[None, :]
    mask = jnp.where(col <= row, 0.0, -1e30).astype(jnp.float32)

    # one-hot selection of rows 2::3 of the concatenated sequence
    sel = jax.nn.one_hot(2 + 3 * jnp.arange(T), S_pad, dtype=jnp.float32)

    # ---- VMEM budget + cost estimate from the actual working set
    w_keys = ("ln1g", "ln1b", "wqkv", "bqkv", "wproj", "bproj",
              "ln2g", "ln2b", "wfc", "bfc", "wmlp", "bmlp")
    per_layer_bytes = sum(_nbytes(g[k]) // L for k in w_keys)
    const_arrays = (x_stack, params["enc_w1"], params["enc_b1"], params["enc_w2"],
                    params["enc_b2"], t, wpe_bc, mask, g["lnfg"], g["lnfb"], sel,
                    params["ah_w1"], params["ah_b1"], params["ah_w2"], params["ah_b2"])
    const_bytes = sum(_nbytes(a) for a in const_arrays)
    scratch_bytes = B * S_pad * E * 4
    out_bytes = BT * A_PAD * 4
    vmem_limit = int(min(64 * 1024 * 1024,
                         max(16 * 1024 * 1024,
                             1.5 * (2 * per_layer_bytes + 2 * const_bytes
                                    + scratch_bytes + 2 * out_bytes))))

    flops = (2 * 3 * BT * (DIN_PAD * LAT_PAD + LAT_PAD * E)
             + L * (2 * B * S_pad * (E * 3 * E + E * E + 2 * E * FF)
                    + 4 * B * n_head * S_pad * S_pad * hd)
             + 2 * B * (T * S_pad * E + T * E * LAT_PAD + T * LAT_PAD * A_PAD))
    transcendentals = L * B * (n_head * S_pad * S_pad + S_pad * FF)
    bytes_accessed = const_bytes + L * per_layer_bytes + out_bytes   # weights read ONCE

    kernel = functools.partial(_dt_kernel, B=B, T=T, S_pad=S_pad, n_head=n_head)

    const3 = lambda l: (0, 0, 0)
    const2 = lambda l: (0, 0)
    layer3 = lambda l: (l, 0, 0)

    out2d = pl.pallas_call(
        kernel,
        out_shape=jax.ShapeDtypeStruct((BT, A_PAD), jnp.float32),
        grid=(L,),
        in_specs=[
            # embedding inputs (resident)
            pl.BlockSpec((3, BT, DIN_PAD), const3),
            pl.BlockSpec((3, DIN_PAD, LAT_PAD), const3),
            pl.BlockSpec((3, 1, LAT_PAD), const3),
            pl.BlockSpec((3, LAT_PAD, E), const3),
            pl.BlockSpec((3, 1, E), const3),
            pl.BlockSpec((BT, 1), const2),
            pl.BlockSpec((3, BT, E), const3),
            # causal mask (resident)
            pl.BlockSpec((S_pad, S_pad), const2),
            # per-layer weights (streamed over the "arbitrary" layer axis)
            pl.BlockSpec((1, 1, E), layer3),            # ln1 gamma
            pl.BlockSpec((1, 1, E), layer3),            # ln1 beta
            pl.BlockSpec((1, E, 3 * E), layer3),        # qkv weight (dense, de-padded)
            pl.BlockSpec((1, 1, 3 * E), layer3),        # qkv bias
            pl.BlockSpec((1, E, E), layer3),            # proj weight (dense)
            pl.BlockSpec((1, 1, E), layer3),            # proj bias
            pl.BlockSpec((1, 1, E), layer3),            # ln2 gamma
            pl.BlockSpec((1, 1, E), layer3),            # ln2 beta
            pl.BlockSpec((1, E, FF), layer3),           # fc weight
            pl.BlockSpec((1, 1, FF), layer3),           # fc bias
            pl.BlockSpec((1, FF, E), layer3),           # mlp weight
            pl.BlockSpec((1, 1, E), layer3),            # mlp bias
            # final ln_f + selection + action head (resident)
            pl.BlockSpec((1, E), const2),
            pl.BlockSpec((1, E), const2),
            pl.BlockSpec((T, S_pad), const2),
            pl.BlockSpec((E, LAT_PAD), const2),
            pl.BlockSpec((1, LAT_PAD), const2),
            pl.BlockSpec((LAT_PAD, A_PAD), const2),
            pl.BlockSpec((1, A_PAD), const2),
        ],
        out_specs=pl.BlockSpec((BT, A_PAD), const2),
        scratch_shapes=[pltpu.VMEM((B * S_pad, E), jnp.float32)],
        compiler_params=pltpu.CompilerParams(
            dimension_semantics=("arbitrary",),          # residual carried across layers
            vmem_limit_bytes=vmem_limit),
        cost_estimate=pl.CostEstimate(flops=int(flops),
                                      transcendentals=int(transcendentals),
                                      bytes_accessed=int(bytes_accessed)),
    )(x_stack, params["enc_w1"], params["enc_b1"], params["enc_w2"], params["enc_b2"],
      t, wpe_bc, mask,
      g["ln1g"], g["ln1b"], g["wqkv"], g["bqkv"], g["wproj"], g["bproj"],
      g["ln2g"], g["ln2b"], g["wfc"], g["bfc"], g["wmlp"], g["bmlp"],
      g["lnfg"], g["lnfb"], sel,
      params["ah_w1"], params["ah_b1"], params["ah_w2"], params["ah_b2"])

    return out2d.reshape(B, T, A_PAD)[:, :, :action_dim]


# ----------------------------------------------------------------------------
# Parameter init (real shapes) + packing into kernel layouts
# ----------------------------------------------------------------------------

def xavier_uniform(key, fan_in, fan_out):
    limit = math.sqrt(6.0 / (fan_in + fan_out))
    return jax.random.uniform(key, (fan_in, fan_out), jnp.float32, -limit, limit)


def init_linear_encoder(key, din, dout, latent=64):
    k1, k2 = jax.random.split(key)
    return {"w1": xavier_uniform(k1, din, latent),
            "b1": jnp.zeros((latent,), jnp.float32),
            "w2": xavier_uniform(k2, latent, dout),
            "b2": jnp.zeros((dout,), jnp.float32)}


def init_gpt2(key, E, n_layer, n_positions):
    # TODO(synk): GPT.from_pretrained('gpt2') weight loading is replaced by random init.
    keys = jax.random.split(key, 1 + 4 * n_layer)
    wpe = 0.02 * jax.random.normal(keys[0], (n_positions, E), jnp.float32)
    layers = []
    for li in range(n_layer):
        ka, kp, kf, km = keys[1 + 4 * li: 1 + 4 * (li + 1)]
        layers.append({
            "ln1_g": jnp.ones((E,), jnp.float32), "ln1_b": jnp.zeros((E,), jnp.float32),
            "attn_w": 0.02 * jax.random.normal(ka, (E, 3 * E), jnp.float32),
            "attn_b": jnp.zeros((3 * E,), jnp.float32),
            "proj_w": 0.02 * jax.random.normal(kp, (E, E), jnp.float32),
            "proj_b": jnp.zeros((E,), jnp.float32),
            "ln2_g": jnp.ones((E,), jnp.float32), "ln2_b": jnp.zeros((E,), jnp.float32),
            "fc_w": 0.02 * jax.random.normal(kf, (E, 4 * E), jnp.float32),
            "fc_b": jnp.zeros((4 * E,), jnp.float32),
            "mlp_w": 0.02 * jax.random.normal(km, (4 * E, E), jnp.float32),
            "mlp_b": jnp.zeros((E,), jnp.float32),
        })
    return {"wpe": wpe, "layers": layers,
            "lnf_g": jnp.ones((E,), jnp.float32), "lnf_b": jnp.zeros((E,), jnp.float32)}


def prepare_params(raw, n_head):
    gpt2 = raw["gpt2"]
    E = gpt2["lnf_g"].shape[0]
    assert E % LANE == 0, "embedding_dim must be a multiple of 128"
    assert E % n_head == 0

    lat = raw["state_enc"]["w1"].shape[1]
    LAT_PAD = _round_up(lat, LANE)
    din_max = max(raw["state_enc"]["w1"].shape[0], raw["action_enc"]["w1"].shape[0], 1)
    DIN_PAD = _round_up(din_max, LANE)

    encs = [raw["rtg_enc"], raw["state_enc"], raw["action_enc"]]    # concat order
    enc_w1 = jnp.stack([_pad2(p["w1"], DIN_PAD, LAT_PAD) for p in encs]).astype(jnp.bfloat16)
    enc_b1 = jnp.stack([_pad2(p["b1"].reshape(1, -1), 1, LAT_PAD) for p in encs])
    enc_w2 = jnp.stack([_pad2(p["w2"], LAT_PAD, E) for p in encs]).astype(jnp.bfloat16)
    enc_b2 = jnp.stack([_pad2(p["b2"].reshape(1, -1), 1, E) for p in encs])

    ah = raw["action_head"]
    A_PAD = _round_up(ah["w2"].shape[1], LANE)
    ah_w1 = _pad2(ah["w1"], E, LAT_PAD).astype(jnp.bfloat16)
    ah_b1 = _pad2(ah["b1"].reshape(1, -1), 1, LAT_PAD)
    ah_w2 = _pad2(ah["w2"], LAT_PAD, A_PAD).astype(jnp.bfloat16)
    ah_b2 = _pad2(ah["b2"].reshape(1, -1), 1, A_PAD)

    # GPT-2 layers: keep the DENSE (de-padded) layouts, just cast weights to bf16
    def pack_layer(layer):
        return {"ln1g": layer["ln1_g"].reshape(1, E), "ln1b": layer["ln1_b"].reshape(1, E),
                "wqkv": layer["attn_w"].astype(jnp.bfloat16),
                "bqkv": layer["attn_b"].reshape(1, -1),
                "wproj": layer["proj_w"].astype(jnp.bfloat16),
                "bproj": layer["proj_b"].reshape(1, E),
                "ln2g": layer["ln2_g"].reshape(1, E), "ln2b": layer["ln2_b"].reshape(1, E),
                "wfc": layer["fc_w"].astype(jnp.bfloat16),
                "bfc": layer["fc_b"].reshape(1, -1),
                "wmlp": layer["mlp_w"].astype(jnp.bfloat16),
                "bmlp": layer["mlp_b"].reshape(1, -1)}

    per_layer = [pack_layer(l) for l in gpt2["layers"]]
    g = {k: jnp.stack([p[k] for p in per_layer]) for k in per_layer[0]}
    g["lnfg"] = gpt2["lnf_g"].reshape(1, E)
    g["lnfb"] = gpt2["lnf_b"].reshape(1, E)
    g["wpe"] = gpt2["wpe"]

    return {"enc_w1": enc_w1, "enc_b1": enc_b1, "enc_w2": enc_w2, "enc_b2": enc_b2,
            "ah_w1": ah_w1, "ah_b1": ah_b1, "ah_w2": ah_w2, "ah_b2": ah_b2, "gpt2": g}


# ----------------------------------------------------------------------------
# Pure-JAX f32 reference (same math, unpadded) for a correctness check
# ----------------------------------------------------------------------------

def reference_forward(raw, states, actions, rtgs, timesteps, n_head):
    def enc(p, x):
        return jnp.maximum(x @ p["w1"] + p["b1"], 0.0) @ p["w2"] + p["b2"]

    B, T, _ = states.shape
    S = 3 * T
    t = timesteps.astype(jnp.float32)
    x = jnp.concatenate([enc(raw["rtg_enc"], rtgs[..., None]) + t,
                         enc(raw["state_enc"], states) + t,
                         enc(raw["action_enc"], actions) + t], axis=1)
    x = x + raw["gpt2"]["wpe"][:S][None]
    E = raw["gpt2"]["lnf_g"].shape[0]
    hd = E // n_head
    causal = jnp.tril(jnp.ones((S, S), bool))
    for layer in raw["gpt2"]["layers"]:
        a = _layernorm(x, layer["ln1_g"], layer["ln1_b"])
        q, k, v = jnp.split(a @ layer["attn_w"] + layer["attn_b"], 3, axis=-1)
        q = q.reshape(B, S, n_head, hd).transpose(0, 2, 1, 3)
        k = k.reshape(B, S, n_head, hd).transpose(0, 2, 1, 3)
        v = v.reshape(B, S, n_head, hd).transpose(0, 2, 1, 3)
        s = jnp.einsum("bhqd,bhkd->bhqk", q, k) / math.sqrt(hd)
        s = jnp.where(causal, s, -1e30)
        o = jnp.einsum("bhqk,bhkd->bhqd", jax.nn.softmax(s, axis=-1), v)
        o = o.transpose(0, 2, 1, 3).reshape(B, S, E)
        x = x + (o @ layer["proj_w"] + layer["proj_b"])
        m = _layernorm(x, layer["ln2_g"], layer["ln2_b"])
        x = x + (_gelu_new(m @ layer["fc_w"] + layer["fc_b"]) @ layer["mlp_w"] + layer["mlp_b"])
    x = _layernorm(x, raw["gpt2"]["lnf_g"], raw["gpt2"]["lnf_b"])
    return enc(raw["action_head"], x[:, 2::3, :])


# ----------------------------------------------------------------------------
# Main
# ----------------------------------------------------------------------------

if __name__ == "__main__":
    B, T = 2, 8                   # S = 3T = 24 (multiple of 8 -> no sublane padding)
    state_dim, action_dim = 6, 3
    embedding_dim = 128           # multiple of 128 (stand-in for GPT-2's 768)
    n_head, n_layer = 2, 2
    n_positions = 64

    key = jax.random.PRNGKey(0)
    k_se, k_ae, k_re, k_te, k_gpt, k_ah, k_in = jax.random.split(key, 7)

    raw = {
        "state_enc": init_linear_encoder(k_se, state_dim, embedding_dim),
        "action_enc": init_linear_encoder(k_ae, action_dim, embedding_dim),
        "rtg_enc": init_linear_encoder(k_re, 1, embedding_dim),
        # timestep_encoder exists in __init__ but is unused in forward; kept for parity
        "timestep_enc": init_linear_encoder(k_te, 1, embedding_dim),
        "gpt2": init_gpt2(k_gpt, embedding_dim, n_layer, n_positions),
        "action_head": init_linear_encoder(k_ah, embedding_dim, action_dim),
    }
    packed = prepare_params(raw, n_head=n_head)

    ks, ka, kr = jax.random.split(k_in, 3)
    states = jax.random.normal(ks, (B, T, state_dim), jnp.float32)
    actions = jax.random.normal(ka, (B, T, action_dim), jnp.float32)
    rtgs = jax.random.normal(kr, (B, T), jnp.float32)
    timesteps = jnp.arange(T, dtype=jnp.float32).reshape(1, T, 1).repeat(B, axis=0)

    fwd = jax.jit(functools.partial(decision_transformer_forward,
                                    n_head=n_head, action_dim=action_dim))
    out = jax.block_until_ready(fwd(packed, states, actions, rtgs, timesteps))

    assert out.shape == (B, T, action_dim), out.shape
    assert bool(jnp.all(jnp.isfinite(out)))

    # bf16 MXU kernels vs f32 reference: tight relative check (catches wiring bugs).
    ref = reference_forward(raw, states, actions, rtgs, timesteps, n_head)
    err = float(jnp.max(jnp.abs(out - ref)))
    scale = max(1.0, float(jnp.max(jnp.abs(ref))))
    assert err / scale < 3e-2, f"max |pallas - reference| = {err} (scale {scale})"

    print("KERNEL_OK")
</pallas_src>

<mosaic_0001>
module attributes {stable_mosaic.version = 11 : i64} {
  func.func @_dt_kernel(%arg0: i32, %arg1: memref<3x16x128xf32, #tpu.memory_space<vmem>>, %arg2: memref<3x128x128xbf16, #tpu.memory_space<vmem>>, %arg3: memref<3x1x128xf32, #tpu.memory_space<vmem>>, %arg4: memref<3x128x128xbf16, #tpu.memory_space<vmem>>, %arg5: memref<3x1x128xf32, #tpu.memory_space<vmem>>, %arg6: memref<16x1xf32, #tpu.memory_space<vmem>>, %arg7: memref<3x16x128xf32, #tpu.memory_space<vmem>>, %arg8: memref<24x24xf32, #tpu.memory_space<vmem>>, %arg9: memref<1x1x128xf32, #tpu.memory_space<vmem>>, %arg10: memref<1x1x128xf32, #tpu.memory_space<vmem>>, %arg11: memref<1x128x384xbf16, #tpu.memory_space<vmem>>, %arg12: memref<1x1x384xf32, #tpu.memory_space<vmem>>, %arg13: memref<1x128x128xbf16, #tpu.memory_space<vmem>>, %arg14: memref<1x1x128xf32, #tpu.memory_space<vmem>>, %arg15: memref<1x1x128xf32, #tpu.memory_space<vmem>>, %arg16: memref<1x1x128xf32, #tpu.memory_space<vmem>>, %arg17: memref<1x128x512xbf16, #tpu.memory_space<vmem>>, %arg18: memref<1x1x512xf32, #tpu.memory_space<vmem>>, %arg19: memref<1x512x128xbf16, #tpu.memory_space<vmem>>, %arg20: memref<1x1x128xf32, #tpu.memory_space<vmem>>, %arg21: memref<1x128xf32, #tpu.memory_space<vmem>>, %arg22: memref<1x128xf32, #tpu.memory_space<vmem>>, %arg23: memref<8x24xf32, #tpu.memory_space<vmem>>, %arg24: memref<128x128xbf16, #tpu.memory_space<vmem>>, %arg25: memref<1x128xf32, #tpu.memory_space<vmem>>, %arg26: memref<128x128xbf16, #tpu.memory_space<vmem>>, %arg27: memref<1x128xf32, #tpu.memory_space<vmem>>, %arg28: memref<16x128xf32, #tpu.memory_space<vmem>>, %arg29: memref<48x128xf32, #tpu.memory_space<vmem>>) attributes {dimension_semantics = [#tpu.dimension_semantics<arbitrary>], iteration_bounds = array<i64: 2>, scalar_prefetch = 0 : i64, scratch_operands = 1 : i64, tpu.core_type = #tpu.core_type<tc>, window_params = [{pipeline_mode = #tpu.pipeline_mode<synchronous>, transform_indices = @transform_0, window_bounds = array<i64: 3, 16, 128>}, {pipeline_mode = #tpu.pipeline_mode<synchronous>, transform_indices = @transform_1, window_bounds = array<i64: 3, 128, 128>}, {pipeline_mode = #tpu.pipeline_mode<synchronous>, transform_indices = @transform_2, window_bounds = array<i64: 3, 1, 128>}, {pipeline_mode = #tpu.pipeline_mode<synchronous>, transform_indices = @transform_3, window_bounds = array<i64: 3, 128, 128>}, {pipeline_mode = #tpu.pipeline_mode<synchronous>, transform_indices = @transform_4, window_bounds = array<i64: 3, 1, 128>}, {pipeline_mode = #tpu.pipeline_mode<synchronous>, transform_indices = @transform_5, window_bounds = array<i64: 16, 1>}, {pipeline_mode = #tpu.pipeline_mode<synchronous>, transform_indices = @transform_6, window_bounds = array<i64: 3, 16, 128>}, {pipeline_mode = #tpu.pipeline_mode<synchronous>, transform_indices = @transform_7, window_bounds = array<i64: 24, 24>}, {transform_indices = @transform_8, window_bounds = array<i64: 1, 1, 128>}, {transform_indices = @transform_9, window_bounds = array<i64: 1, 1, 128>}, {transform_indices = @transform_10, window_bounds = array<i64: 1, 128, 384>}, {transform_indices = @transform_11, window_bounds = array<i64: 1, 1, 384>}, {transform_indices = @transform_12, window_bounds = array<i64: 1, 128, 128>}, {transform_indices = @transform_13, window_bounds = array<i64: 1, 1, 128>}, {transform_indices = @transform_14, window_bounds = array<i64: 1, 1, 128>}, {transform_indices = @transform_15, window_bounds = array<i64: 1, 1, 128>}, {transform_indices = @transform_16, window_bounds = array<i64: 1, 128, 512>}, {transform_indices = @transform_17, window_bounds = array<i64: 1, 1, 512>}, {transform_indices = @transform_18, window_bounds = array<i64: 1, 512, 128>}, {transform_indices = @transform_19, window_bounds = array<i64: 1, 1, 128>}, {pipeline_mode = #tpu.pipeline_mode<synchronous>, transform_indices = @transform_20, window_bounds = array<i64: 1, 128>}, {pipeline_mode = #tpu.pipeline_mode<synchronous>, transform_indices = @transform_21, window_bounds = array<i64: 1, 128>}, {pipeline_mode = #tpu.pipeline_mode<synchronous>, transform_indices = @transform_22, window_bounds = array<i64: 8, 24>}, {pipeline_mode = #tpu.pipeline_mode<synchronous>, transform_indices = @transform_23, window_bounds = array<i64: 128, 128>}, {pipeline_mode = #tpu.pipeline_mode<synchronous>, transform_indices = @transform_24, window_bounds = array<i64: 1, 128>}, {pipeline_mode = #tpu.pipeline_mode<synchronous>, transform_indices = @transform_25, window_bounds = array<i64: 128, 128>}, {pipeline_mode = #tpu.pipeline_mode<synchronous>, transform_indices = @transform_26, window_bounds = array<i64: 1, 128>}, {pipeline_mode = #tpu.pipeline_mode<synchronous>, transform_indices = @transform_27, window_bounds = array<i64: 16, 128>}]} {
    %c0_i32 = arith.constant 0 : i32
    %0 = arith.cmpi eq, %arg0, %c0_i32 : i32
    %1 = arith.extui %0 : i1 to i32
    %c0_i32_0 = arith.constant 0 : i32
    %2 = arith.cmpi ne, %1, %c0_i32_0 : i32
    scf.if %2 {
      %cst_85 = arith.constant 0.000000e+00 : f32
      %211 = vector.broadcast %cst_85 : f32 to vector<48x128xf32>
      %c0_86 = arith.constant 0 : index
      %c0_87 = arith.constant 0 : index
      %212 = vector.load %arg29[%c0_86, %c0_87] : memref<48x128xf32, #tpu.memory_space<vmem>>, vector<48x128xf32>
      tpu.vector_store %arg29[%c0_86, %c0_87], %211 {strides = array<i32>} : memref<48x128xf32, #tpu.memory_space<vmem>>, vector<48x128xf32>,
      %c0_88 = arith.constant 0 : index
      %c0_89 = arith.constant 0 : index
      %c0_90 = arith.constant 0 : index
      %213 = vector.load %arg1[%c0_88, %c0_89, %c0_90] : memref<3x16x128xf32, #tpu.memory_space<vmem>>, vector<1x16x128xf32>
      %214 = vector.shape_cast %213 : vector<1x16x128xf32> to vector<16x128xf32>
      %215 = arith.truncf %214 : vector<16x128xf32> to vector<16x128xbf16>
      %c0_91 = arith.constant 0 : index
      %c0_92 = arith.constant 0 : index
      %c0_93 = arith.constant 0 : index
      %216 = vector.load %arg2[%c0_91, %c0_92, %c0_93] : memref<3x128x128xbf16, #tpu.memory_space<vmem>>, vector<1x128x128xbf16>
      %217 = vector.shape_cast %216 : vector<1x128x128xbf16> to vector<128x128xbf16>
      %cst_94 = arith.constant dense<0.000000e+00> : vector<16x128xf32>
      %218 = tpu.matmul %215, %217, %cst_94 {dimension_numbers = #tpu.dot_dimension_numbers<[1], [0], [0], [1], [0, 0, 1, 1], [], []>} : vector<16x128xbf16>, vector<128x128xbf16>, vector<16x128xf32> -> vector<16x128xf32>
      %c0_95 = arith.constant 0 : index
      %c0_96 = arith.constant 0 : index
      %c0_97 = arith.constant 0 : index
      %219 = vector.load %arg3[%c0_95, %c0_96, %c0_97] : memref<3x1x128xf32, #tpu.memory_space<vmem>>, vector<1x1x128xf32>
      %220 = vector.shape_cast %219 : vector<1x1x128xf32> to vector<1x128xf32>
      %221 = vector.broadcast %220 : vector<1x128xf32> to vector<16x128xf32>
      %222 = arith.addf %218, %221 : vector<16x128xf32>
      %cst_98 = arith.constant 0.000000e+00 : f32
      %223 = vector.broadcast %cst_98 : f32 to vector<16x128xf32>
      %224 = arith.maximumf %222, %223 : vector<16x128xf32>
      %225 = arith.truncf %224 : vector<16x128xf32> to vector<16x128xbf16>
      %c0_99 = arith.constant 0 : index
      %c0_100 = arith.constant 0 : index
      %c0_101 = arith.constant 0 : index
      %226 = vector.load %arg4[%c0_99, %c0_100, %c0_101] : memref<3x128x128xbf16, #tpu.memory_space<vmem>>, vector<1x128x128xbf16>
      %227 = vector.shape_cast %226 : vector<1x128x128xbf16> to vector<128x128xbf16>
      %cst_102 = arith.constant dense<0.000000e+00> : vector<16x128xf32>
      %228 = tpu.matmul %225, %227, %cst_102 {dimension_numbers = #tpu.dot_dimension_numbers<[1], [0], [0], [1], [0, 0, 1, 1], [], []>} : vector<16x128xbf16>, vector<128x128xbf16>, vector<16x128xf32> -> vector<16x128xf32>
      %c0_103 = arith.constant 0 : index
      %c0_104 = arith.constant 0 : index
      %c0_105 = arith.constant 0 : index
      %229 = vector.load %arg5[%c0_103, %c0_104, %c0_105] : memref<3x1x128xf32, #tpu.memory_space<vmem>>, vector<1x1x128xf32>
      %230 = vector.shape_cast %229 : vector<1x1x128xf32> to vector<1x128xf32>
      %231 = vector.broadcast %230 : vector<1x128xf32> to vector<16x128xf32>
      %232 = arith.addf %228, %231 : vector<16x128xf32>
      %c0_106 = arith.constant 0 : index
      %c0_107 = arith.constant 0 : index
      %233 = vector.load %arg6[%c0_106, %c0_107] : memref<16x1xf32, #tpu.memory_space<vmem>>, vector<16x1xf32>
      %234 = vector.broadcast %233 : vector<16x1xf32> to vector<16x128xf32>
      %235 = arith.addf %232, %234 : vector<16x128xf32>
      %c0_108 = arith.constant 0 : index
      %c0_109 = arith.constant 0 : index
      %c0_110 = arith.constant 0 : index
      %236 = vector.load %arg7[%c0_108, %c0_109, %c0_110] : memref<3x16x128xf32, #tpu.memory_space<vmem>>, vector<1x16x128xf32>
      %237 = vector.shape_cast %236 : vector<1x16x128xf32> to vector<16x128xf32>
      %238 = arith.addf %235, %237 : vector<16x128xf32>
      %239 = vector.extract_strided_slice %238 {offsets = [0, 0], sizes = [8, 128], strides = [1, 1]} : vector<16x128xf32> to vector<8x128xf32>
      %c0_111 = arith.constant 0 : index
      %c0_112 = arith.constant 0 : index
      %240 = vector.load %arg29[%c0_111, %c0_112] : memref<48x128xf32, #tpu.memory_space<vmem>>, vector<8x128xf32>
      tpu.vector_store %arg29[%c0_111, %c0_112], %239 {strides = array<i32>} : memref<48x128xf32, #tpu.memory_space<vmem>>, vector<8x128xf32>,
      %241 = vector.extract_strided_slice %238 {offsets = [8, 0], sizes = [8, 128], strides = [1, 1]} : vector<16x128xf32> to vector<8x128xf32>
      %c24 = arith.constant 24 : index
      %c0_113 = arith.constant 0 : index
      %242 = vector.load %arg29[%c24, %c0_113] : memref<48x128xf32, #tpu.memory_space<vmem>>, vector<8x128xf32>
      tpu.vector_store %arg29[%c24, %c0_113], %241 {strides = array<i32>} : memref<48x128xf32, #tpu.memory_space<vmem>>, vector<8x128xf32>,
      %c1 = arith.constant 1 : index
      %c0_114 = arith.constant 0 : index
      %c0_115 = arith.constant 0 : index
      %243 = vector.load %arg1[%c1, %c0_114, %c0_115] : memref<3x16x128xf32, #tpu.memory_space<vmem>>, vector<1x16x128xf32>
      %244 = vector.shape_cast %243 : vector<1x16x128xf32> to vector<16x128xf32>
      %245 = arith.truncf %244 : vector<16x128xf32> to vector<16x128xbf16>
      %c1_116 = arith.constant 1 : index
      %c0_117 = arith.constant 0 : index
      %c0_118 = arith.constant 0 : index
      %246 = vector.load %arg2[%c1_116, %c0_117, %c0_118] : memref<3x128x128xbf16, #tpu.memory_space<vmem>>, vector<1x128x128xbf16>
      %247 = vector.shape_cast %246 : vector<1x128x128xbf16> to vector<128x128xbf16>
      %cst_119 = arith.constant dense<0.000000e+00> : vector<16x128xf32>
      %248 = tpu.matmul %245, %247, %cst_119 {dimension_numbers = #tpu.dot_dimension_numbers<[1], [0], [0], [1], [0, 0, 1, 1], [], []>} : vector<16x128xbf16>, vector<128x128xbf16>, vector<16x128xf32> -> vector<16x128xf32>
      %c1_120 = arith.constant 1 : index
      %c0_121 = arith.constant 0 : index
      %c0_122 = arith.constant 0 : index
      %249 = vector.load %arg3[%c1_120, %c0_121, %c0_122] : memref<3x1x128xf32, #tpu.memory_space<vmem>>, vector<1x1x128xf32>
      %250 = vector.shape_cast %249 : vector<1x1x128xf32> to vector<1x128xf32>
      %251 = vector.broadcast %250 : vector<1x128xf32> to vector<16x128xf32>
      %252 = arith.addf %248, %251 : vector<16x128xf32>
      %cst_123 = arith.constant 0.000000e+00 : f32
      %253 = vector.broadcast %cst_123 : f32 to vector<16x128xf32>
      %254 = arith.maximumf %252, %253 : vector<16x128xf32>
      %255 = arith.truncf %254 : vector<16x128xf32> to vector<16x128xbf16>
      %c1_124 = arith.constant 1 : index
      %c0_125 = arith.constant 0 : index
      %c0_126 = arith.constant 0 : index
      %256 = vector.load %arg4[%c1_124, %c0_125, %c0_126] : memref<3x128x128xbf16, #tpu.memory_space<vmem>>, vector<1x128x128xbf16>
      %257 = vector.shape_cast %256 : vector<1x128x128xbf16> to vector<128x128xbf16>
      %cst_127 = arith.constant dense<0.000000e+00> : vector<16x128xf32>
      %258 = tpu.matmul %255, %257, %cst_127 {dimension_numbers = #tpu.dot_dimension_numbers<[1], [0], [0], [1], [0, 0, 1, 1], [], []>} : vector<16x128xbf16>, vector<128x128xbf16>, vector<16x128xf32> -> vector<16x128xf32>
      %c1_128 = arith.constant 1 : index
      %c0_129 = arith.constant 0 : index
      %c0_130 = arith.constant 0 : index
      %259 = vector.load %arg5[%c1_128, %c0_129, %c0_130] : memref<3x1x128xf32, #tpu.memory_space<vmem>>, vector<1x1x128xf32>
      %260 = vector.shape_cast %259 : vector<1x1x128xf32> to vector<1x128xf32>
      %261 = vector.broadcast %260 : vector<1x128xf32> to vector<16x128xf32>
      %262 = arith.addf %258, %261 : vector<16x128xf32>
      %c0_131 = arith.constant 0 : index
      %c0_132 = arith.constant 0 : index
      %263 = vector.load %arg6[%c0_131, %c0_132] : memref<16x1xf32, #tpu.memory_space<vmem>>, vector<16x1xf32>
      %264 = vector.broadcast %263 : vector<16x1xf32> to vector<16x128xf32>
      %265 = arith.addf %262, %264 : vector<16x128xf32>
      %c1_133 = arith.constant 1 : index
      %c0_134 = arith.constant 0 : index
      %c0_135 = arith.constant 0 : index
      %266 = vector.load %arg7[%c1_133, %c0_134, %c0_135] : memref<3x16x128xf32, #tpu.memory_space<vmem>>, vector<1x16x128xf32>
      %267 = vector.shape_cast %266 : vector<1x16x128xf32> to vector<16x128xf32>
      %268 = arith.addf %265, %267 : vector<16x128xf32>
      %269 = vector.extract_strided_slice %268 {offsets = [0, 0], sizes = [8, 128], strides = [1, 1]} : vector<16x128xf32> to vector<8x128xf32>
      %c8 = arith.constant 8 : index
      %c0_136 = arith.constant 0 : index
      %270 = vector.load %arg29[%c8, %c0_136] : memref<48x128xf32, #tpu.memory_space<vmem>>, vector<8x128xf32>
      tpu.vector_store %arg29[%c8, %c0_136], %269 {strides = array<i32>} : memref<48x128xf32, #tpu.memory_space<vmem>>, vector<8x128xf32>,
      %271 = vector.extract_strided_slice %268 {offsets = [8, 0], sizes = [8, 128], strides = [1, 1]} : vector<16x128xf32> to vector<8x128xf32>
      %c32 = arith.constant 32 : index
      %c0_137 = arith.constant 0 : index
      %272 = vector.load %arg29[%c32, %c0_137] : memref<48x128xf32, #tpu.memory_space<vmem>>, vector<8x128xf32>
      tpu.vector_store %arg29[%c32, %c0_137], %271 {strides = array<i32>} : memref<48x128xf32, #tpu.memory_space<vmem>>, vector<8x128xf32>,
      %c2 = arith.constant 2 : index
      %c0_138 = arith.constant 0 : index
      %c0_139 = arith.constant 0 : index
      %273 = vector.load %arg1[%c2, %c0_138, %c0_139] : memref<3x16x128xf32, #tpu.memory_space<vmem>>, vector<1x16x128xf32>
      %274 = vector.shape_cast %273 : vector<1x16x128xf32> to vector<16x128xf32>
      %275 = arith.truncf %274 : vector<16x128xf32> to vector<16x128xbf16>
      %c2_140 = arith.constant 2 : index
      %c0_141 = arith.constant 0 : index
      %c0_142 = arith.constant 0 : index
      %276 = vector.load %arg2[%c2_140, %c0_141, %c0_142] : memref<3x128x128xbf16, #tpu.memory_space<vmem>>, vector<1x128x128xbf16>
      %277 = vector.shape_cast %276 : vector<1x128x128xbf16> to vector<128x128xbf16>
      %cst_143 = arith.constant dense<0.000000e+00> : vector<16x128xf32>
      %278 = tpu.matmul %275, %277, %cst_143 {dimension_numbers = #tpu.dot_dimension_numbers<[1], [0], [0], [1], [0, 0, 1, 1], [], []>} : vector<16x128xbf16>, vector<128x128xbf16>, vector<16x128xf32> -> vector<16x128xf32>
      %c2_144 = arith.constant 2 : index
      %c0_145 = arith.constant 0 : index
      %c0_146 = arith.constant 0 : index
      %279 = vector.load %arg3[%c2_144, %c0_145, %c0_146] : memref<3x1x128xf32, #tpu.memory_space<vmem>>, vector<1x1x128xf32>
      %280 = vector.shape_cast %279 : vector<1x1x128xf32> to vector<1x128xf32>
      %281 = vector.broadcast %280 : vector<1x128xf32> to vector<16x128xf32>
      %282 = arith.addf %278, %281 : vector<16x128xf32>
      %cst_147 = arith.constant 0.000000e+00 : f32
      %283 = vector.broadcast %cst_147 : f32 to vector<16x128xf32>
      %284 = arith.maximumf %282, %283 : vector<16x128xf32>
      %285 = arith.truncf %284 : vector<16x128xf32> to vector<16x128xbf16>
      %c2_148 = arith.constant 2 : index
      %c0_149 = arith.constant 0 : index
      %c0_150 = arith.constant 0 : index
      %286 = vector.load %arg4[%c2_148, %c0_149, %c0_150] : memref<3x128x128xbf16, #tpu.memory_space<vmem>>, vector<1x128x128xbf16>
      %287 = vector.shape_cast %286 : vector<1x128x128xbf16> to vector<128x128xbf16>
      %cst_151 = arith.constant dense<0.000000e+00> : vector<16x128xf32>
      %288 = tpu.matmul %285, %287, %cst_151 {dimension_numbers = #tpu.dot_dimension_numbers<[1], [0], [0], [1], [0, 0, 1, 1], [], []>} : vector<16x128xbf16>, vector<128x128xbf16>, vector<16x128xf32> -> vector<16x128xf32>
      %c2_152 = arith.constant 2 : index
      %c0_153 = arith.constant 0 : index
      %c0_154 = arith.constant 0 : index
      %289 = vector.load %arg5[%c2_152, %c0_153, %c0_154] : memref<3x1x128xf32, #tpu.memory_space<vmem>>, vector<1x1x128xf32>
      %290 = vector.shape_cast %289 : vector<1x1x128xf32> to vector<1x128xf32>
      %291 = vector.broadcast %290 : vector<1x128xf32> to vector<16x128xf32>
      %292 = arith.addf %288, %291 : vector<16x128xf32>
      %c0_155 = arith.constant 0 : index
      %c0_156 = arith.constant 0 : index
      %293 = vector.load %arg6[%c0_155, %c0_156] : memref<16x1xf32, #tpu.memory_space<vmem>>, vector<16x1xf32>
      %294 = vector.broadcast %293 : vector<16x1xf32> to vector<16x128xf32>
      %295 = arith.addf %292, %294 : vector<16x128xf32>
      %c2_157 = arith.constant 2 : index
      %c0_158 = arith.constant 0 : index
      %c0_159 = arith.constant 0 : index
      %296 = vector.load %arg7[%c2_157, %c0_158, %c0_159] : memref<3x16x128xf32, #tpu.memory_space<vmem>>, vector<1x16x128xf32>
      %297 = vector.shape_cast %296 : vector<1x16x128xf32> to vector<16x128xf32>
      %298 = arith.addf %295, %297 : vector<16x128xf32>
      %299 = vector.extract_strided_slice %298 {offsets = [0, 0], sizes = [8, 128], strides = [1, 1]} : vector<16x128xf32> to vector<8x128xf32>
      %c16 = arith.constant 16 : index
      %c0_160 = arith.constant 0 : index
      %300 = vector.load %arg29[%c16, %c0_160] : memref<48x128xf32, #tpu.memory_space<vmem>>, vector<8x128xf32>
      tpu.vector_store %arg29[%c16, %c0_160], %299 {strides = array<i32>} : memref<48x128xf32, #tpu.memory_space<vmem>>, vector<8x128xf32>,
      %301 = vector.extract_strided_slice %298 {offsets = [8, 0], sizes = [8, 128], strides = [1, 1]} : vector<16x128xf32> to vector<8x128xf32>
      %c40 = arith.constant 40 : index
      %c0_161 = arith.constant 0 : index
      %302 = vector.load %arg29[%c40, %c0_161] : memref<48x128xf32, #tpu.memory_space<vmem>>, vector<8x128xf32>
      tpu.vector_store %arg29[%c40, %c0_161], %301 {strides = array<i32>} : memref<48x128xf32, #tpu.memory_space<vmem>>, vector<8x128xf32>,
    } else {
    }
    %c0 = arith.constant 0 : index
    %c0_1 = arith.constant 0 : index
    %3 = vector.load %arg29[%c0, %c0_1] : memref<48x128xf32, #tpu.memory_space<vmem>>, vector<48x128xf32>
    %c0_2 = arith.constant 0 : index
    %c0_3 = arith.constant 0 : index
    %c0_4 = arith.constant 0 : index
    %4 = vector.load %arg9[%c0_2, %c0_3, %c0_4] : memref<1x1x128xf32, #tpu.memory_space<vmem>>, vector<1x1x128xf32>
    %5 = vector.shape_cast %4 : vector<1x1x128xf32> to vector<1x128xf32>
    %c0_5 = arith.constant 0 : index
    %c0_6 = arith.constant 0 : index
    %c0_7 = arith.constant 0 : index
    %6 = vector.load %arg10[%c0_5, %c0_6, %c0_7] : memref<1x1x128xf32, #tpu.memory_space<vmem>>, vector<1x1x128xf32>
    %7 = vector.shape_cast %6 : vector<1x1x128xf32> to vector<1x128xf32>
    %cst = arith.constant dense<0.000000e+00> : vector<48xf32>
    %8 = vector.multi_reduction <add>, %3, %cst [1] : vector<48x128xf32> to vector<48xf32>
    %9 = vector.shape_cast %8 : vector<48xf32> to vector<48x1xf32>
    %cst_8 = arith.constant 1.280000e+02 : f32
    %10 = vector.broadcast %cst_8 : f32 to vector<48x1xf32>
    %11 = arith.divf %9, %10 : vector<48x1xf32>
    %12 = vector.broadcast %11 : vector<48x1xf32> to vector<48x128xf32>
    %13 = arith.subf %3, %12 : vector<48x128xf32>
    %14 = arith.mulf %13, %13 : vector<48x128xf32>
    %cst_9 = arith.constant dense<0.000000e+00> : vector<48xf32>
    %15 = vector.multi_reduction <add>, %14, %cst_9 [1] : vector<48x128xf32> to vector<48xf32>
    %16 = vector.shape_cast %15 : vector<48xf32> to vector<48x1xf32>
    %cst_10 = arith.constant 1.280000e+02 : f32
    %17 = vector.broadcast %cst_10 : f32 to vector<48x1xf32>
    %18 = arith.divf %16, %17 : vector<48x1xf32>
    %cst_11 = arith.constant 9.99999974E-6 : f32
    %19 = vector.broadcast %cst_11 : f32 to vector<48x1xf32>
    %20 = arith.addf %18, %19 : vector<48x1xf32>
    %21 = math.rsqrt %20 : vector<48x1xf32>
    %22 = vector.broadcast %21 : vector<48x1xf32> to vector<48x128xf32>
    %23 = arith.mulf %13, %22 : vector<48x128xf32>
    %24 = vector.broadcast %5 : vector<1x128xf32> to vector<48x128xf32>
    %25 = arith.mulf %23, %24 : vector<48x128xf32>
    %26 = vector.broadcast %7 : vector<1x128xf32> to vector<48x128xf32>
    %27 = arith.addf %25, %26 : vector<48x128xf32>
    %28 = arith.truncf %27 : vector<48x128xf32> to vector<48x128xbf16>
    %c0_12 = arith.constant 0 : index
    %c0_13 = arith.constant 0 : index
    %c0_14 = arith.constant 0 : index
    %29 = vector.load %arg11[%c0_12, %c0_13, %c0_14] : memref<1x128x384xbf16, #tpu.memory_space<vmem>>, vector<1x128x384xbf16>
    %30 = vector.shape_cast %29 : vector<1x128x384xbf16> to vector<128x384xbf16>
    %cst_15 = arith.constant dense<0.000000e+00> : vector<48x384xf32>
    %31 = tpu.matmul %28, %30, %cst_15 {dimension_numbers = #tpu.dot_dimension_numbers<[1], [0], [0], [1], [0, 0, 1, 1], [], []>} : vector<48x128xbf16>, vector<128x384xbf16>, vector<48x384xf32> -> vector<48x384xf32>
    %c0_16 = arith.constant 0 : index
    %c0_17 = arith.constant 0 : index
    %c0_18 = arith.constant 0 : index
    %32 = vector.load %arg12[%c0_16, %c0_17, %c0_18] : memref<1x1x384xf32, #tpu.memory_space<vmem>>, vector<1x1x384xf32>
    %33 = vector.shape_cast %32 : vector<1x1x384xf32> to vector<1x384xf32>
    %34 = vector.broadcast %33 : vector<1x384xf32> to vector<48x384xf32>
    %35 = arith.addf %31, %34 : vector<48x384xf32>
    %c0_19 = arith.constant 0 : index
    %c0_20 = arith.constant 0 : index
    %c0_21 = arith.constant 0 : index
    %36 = vector.load %arg13[%c0_19, %c0_20, %c0_21] : memref<1x128x128xbf16, #tpu.memory_space<vmem>>, vector<1x128x128xbf16>
    %37 = vector.shape_cast %36 : vector<1x128x128xbf16> to vector<128x128xbf16>
    %c0_22 = arith.constant 0 : index
    %c0_23 = arith.constant 0 : index
    %38 = vector.load %arg8[%c0_22, %c0_23] : memref<24x24xf32, #tpu.memory_space<vmem>>, vector<24x24xf32>
    %39 = vector.extract_strided_slice %35 {offsets = [0, 0], sizes = [24, 384], strides = [1, 1]} : vector<48x384xf32> to vector<24x384xf32>
    %cst_24 = arith.constant 0.000000e+00 : f32
    %40 = vector.broadcast %cst_24 : f32 to vector<24x128xf32>
    %41 = vector.extract_strided_slice %39 {offsets = [0, 0], sizes = [24, 64], strides = [1, 1]} : vector<24x384xf32> to vector<24x64xf32>
    %42 = vector.extract_strided_slice %39 {offsets = [0, 128], sizes = [24, 64], strides = [1, 1]} : vector<24x384xf32> to vector<24x64xf32>
    %43 = vector.extract_strided_slice %39 {offsets = [0, 256], sizes = [24, 64], strides = [1, 1]} : vector<24x384xf32> to vector<24x64xf32>
    %44 = arith.truncf %41 : vector<24x64xf32> to vector<24x64xbf16>
    %45 = arith.truncf %42 : vector<24x64xf32> to vector<24x64xbf16>
    %cst_25 = arith.constant dense<0.000000e+00> : vector<24x24xf32>
    %46 = tpu.matmul %44, %45, %cst_25 {dimension_numbers = #tpu.dot_dimension_numbers<[1], [1], [0], [0], [0, 0, 1, 0], [], []>} : vector<24x64xbf16>, vector<24x64xbf16>, vector<24x24xf32> -> vector<24x24xf32>
    %cst_26 = arith.constant 1.250000e-01 : f32
    %47 = vector.broadcast %cst_26 : f32 to vector<24x24xf32>
    %48 = arith.mulf %46, %47 : vector<24x24xf32>
    %49 = arith.addf %48, %38 : vector<24x24xf32>
    %cst_27 = arith.constant dense<0xFF800000> : vector<24xf32>
    %50 = vector.multi_reduction <maximumf>, %49, %cst_27 [1] : vector<24x24xf32> to vector<24xf32>
    %51 = vector.shape_cast %50 : vector<24xf32> to vector<24x1xf32>
    %52 = vector.broadcast %51 : vector<24x1xf32> to vector<24x24xf32>
    %53 = arith.subf %49, %52 : vector<24x24xf32>
    %54 = math.exp %53 : vector<24x24xf32>
    %cst_28 = arith.constant dense<0.000000e+00> : vector<24xf32>
    %55 = vector.multi_reduction <add>, %54, %cst_28 [1] : vector<24x24xf32> to vector<24xf32>
    %56 = vector.shape_cast %55 : vector<24xf32> to vector<24x1xf32>
    %57 = tpu.reciprocal %56 {approx = true} : vector<24x1xf32> -> vector<24x1xf32>
    %58 = vector.broadcast %57 : vector<24x1xf32> to vector<24x24xf32>
    %59 = arith.mulf %54, %58 : vector<24x24xf32>
    %60 = arith.truncf %59 : vector<24x24xf32> to vector<24x24xbf16>
    %61 = arith.truncf %43 : vector<24x64xf32> to vector<24x64xbf16>
    %cst_29 = arith.constant dense<0.000000e+00> : vector<24x64xf32>
    %62 = tpu.matmul %60, %61, %cst_29 {dimension_numbers = #tpu.dot_dimension_numbers<[1], [0], [0], [1], [0, 0, 1, 1], [], []>} : vector<24x24xbf16>, vector<24x64xbf16>, vector<24x64xf32> -> vector<24x64xf32>
    %63 = arith.truncf %62 : vector<24x64xf32> to vector<24x64xbf16>
    %64 = vector.extract_strided_slice %37 {offsets = [0, 0], sizes = [64, 128], strides = [1, 1]} : vector<128x128xbf16> to vector<64x128xbf16>
    %cst_30 = arith.constant dense<0.000000e+00> : vector<24x128xf32>
    %65 = tpu.matmul %63, %64, %cst_30 {dimension_numbers = #tpu.dot_dimension_numbers<[1], [0], [0], [1], [0, 0, 1, 1], [], []>} : vector<24x64xbf16>, vector<64x128xbf16>, vector<24x128xf32> -> vector<24x128xf32>
    %66 = arith.addf %40, %65 : vector<24x128xf32>
    %67 = vector.extract_strided_slice %39 {offsets = [0, 64], sizes = [24, 64], strides = [1, 1]} : vector<24x384xf32> to vector<24x64xf32>
    %68 = vector.extract_strided_slice %39 {offsets = [0, 192], sizes = [24, 64], strides = [1, 1]} : vector<24x384xf32> to vector<24x64xf32>
    %69 = vector.extract_strided_slice %39 {offsets = [0, 320], sizes = [24, 64], strides = [1, 1]} : vector<24x384xf32> to vector<24x64xf32>
    %70 = arith.truncf %67 : vector<24x64xf32> to vector<24x64xbf16>
    %71 = arith.truncf %68 : vector<24x64xf32> to vector<24x64xbf16>
    %cst_31 = arith.constant dense<0.000000e+00> : vector<24x24xf32>
    %72 = tpu.matmul %70, %71, %cst_31 {dimension_numbers = #tpu.dot_dimension_numbers<[1], [1], [0], [0], [0, 0, 1, 0], [], []>} : vector<24x64xbf16>, vector<24x64xbf16>, vector<24x24xf32> -> vector<24x24xf32>
    %cst_32 = arith.constant 1.250000e-01 : f32
    %73 = vector.broadcast %cst_32 : f32 to vector<24x24xf32>
    %74 = arith.mulf %72, %73 : vector<24x24xf32>
    %75 = arith.addf %74, %38 : vector<24x24xf32>
    %cst_33 = arith.constant dense<0xFF800000> : vector<24xf32>
    %76 = vector.multi_reduction <maximumf>, %75, %cst_33 [1] : vector<24x24xf32> to vector<24xf32>
    %77 = vector.shape_cast %76 : vector<24xf32> to vector<24x1xf32>
    %78 = vector.broadcast %77 : vector<24x1xf32> to vector<24x24xf32>
    %79 = arith.subf %75, %78 : vector<24x24xf32>
    %80 = math.exp %79 : vector<24x24xf32>
    %cst_34 = arith.constant dense<0.000000e+00> : vector<24xf32>
    %81 = vector.multi_reduction <add>, %80, %cst_34 [1] : vector<24x24xf32> to vector<24xf32>
    %82 = vector.shape_cast %81 : vector<24xf32> to vector<24x1xf32>
    %83 = tpu.reciprocal %82 {approx = true} : vector<24x1xf32> -> vector<24x1xf32>
    %84 = vector.broadcast %83 : vector<24x1xf32> to vector<24x24xf32>
    %85 = arith.mulf %80, %84 : vector<24x24xf32>
    %86 = arith.truncf %85 : vector<24x24xf32> to vector<24x24xbf16>
    %87 = arith.truncf %69 : vector<24x64xf32> to vector<24x64xbf16>
    %cst_35 = arith.constant dense<0.000000e+00> : vector<24x64xf32>
    %88 = tpu.matmul %86, %87, %cst_35 {dimension_numbers = #tpu.dot_dimension_numbers<[1], [0], [0], [1], [0, 0, 1, 1], [], []>} : vector<24x24xbf16>, vector<24x64xbf16>, vector<24x64xf32> -> vector<24x64xf32>
    %89 = arith.truncf %88 : vector<24x64xf32> to vector<24x64xbf16>
    %90 = vector.extract_strided_slice %37 {offsets = [64, 0], sizes = [64, 128], strides = [1, 1]} : vector<128x128xbf16> to vector<64x128xbf16>
    %cst_36 = arith.constant dense<0.000000e+00> : vector<24x128xf32>
    %91 = tpu.matmul %89, %90, %cst_36 {dimension_numbers = #tpu.dot_dimension_numbers<[1], [0], [0], [1], [0, 0, 1, 1], [], []>} : vector<24x64xbf16>, vector<64x128xbf16>, vector<24x128xf32> -> vector<24x128xf32>
    %92 = arith.addf %66, %91 : vector<24x128xf32>
    %93 = vector.extract_strided_slice %35 {offsets = [24, 0], sizes = [24, 384], strides = [1, 1]} : vector<48x384xf32> to vector<24x384xf32>
    %cst_37 = arith.constant 0.000000e+00 : f32
    %94 = vector.broadcast %cst_37 : f32 to vector<24x128xf32>
    %95 = vector.extract_strided_slice %93 {offsets = [0, 0], sizes = [24, 64], strides = [1, 1]} : vector<24x384xf32> to vector<24x64xf32>
    %96 = vector.extract_strided_slice %93 {offsets = [0, 128], sizes = [24, 64], strides = [1, 1]} : vector<24x384xf32> to vector<24x64xf32>
    %97 = vector.extract_strided_slice %93 {offsets = [0, 256], sizes = [24, 64], strides = [1, 1]} : vector<24x384xf32> to vector<24x64xf32>
    %98 = arith.truncf %95 : vector<24x64xf32> to vector<24x64xbf16>
    %99 = arith.truncf %96 : vector<24x64xf32> to vector<24x64xbf16>
    %cst_38 = arith.constant dense<0.000000e+00> : vector<24x24xf32>
    %100 = tpu.matmul %98, %99, %cst_38 {dimension_numbers = #tpu.dot_dimension_numbers<[1], [1], [0], [0], [0, 0, 1, 0], [], []>} : vector<24x64xbf16>, vector<24x64xbf16>, vector<24x24xf32> -> vector<24x24xf32>
    %cst_39 = arith.constant 1.250000e-01 : f32
    %101 = vector.broadcast %cst_39 : f32 to vector<24x24xf32>
    %102 = arith.mulf %100, %101 : vector<24x24xf32>
    %103 = arith.addf %102, %38 : vector<24x24xf32>
    %cst_40 = arith.constant dense<0xFF800000> : vector<24xf32>
    %104 = vector.multi_reduction <maximumf>, %103, %cst_40 [1] : vector<24x24xf32> to vector<24xf32>
    %105 = vector.shape_cast %104 : vector<24xf32> to vector<24x1xf32>
    %106 = vector.broadcast %105 : vector<24x1xf32> to vector<24x24xf32>
    %107 = arith.subf %103, %106 : vector<24x24xf32>
    %108 = math.exp %107 : vector<24x24xf32>
    %cst_41 = arith.constant dense<0.000000e+00> : vector<24xf32>
    %109 = vector.multi_reduction <add>, %108, %cst_41 [1] : vector<24x24xf32> to vector<24xf32>
    %110 = vector.shape_cast %109 : vector<24xf32> to vector<24x1xf32>
    %111 = tpu.reciprocal %110 {approx = true} : vector<24x1xf32> -> vector<24x1xf32>
    %112 = vector.broadcast %111 : vector<24x1xf32> to vector<24x24xf32>
    %113 = arith.mulf %108, %112 : vector<24x24xf32>
    %114 = arith.truncf %113 : vector<24x24xf32> to vector<24x24xbf16>
    %115 = arith.truncf %97 : vector<24x64xf32> to vector<24x64xbf16>
    %cst_42 = arith.constant dense<0.000000e+00> : vector<24x64xf32>
    %116 = tpu.matmul %114, %115, %cst_42 {dimension_numbers = #tpu.dot_dimension_numbers<[1], [0], [0], [1], [0, 0, 1, 1], [], []>} : vector<24x24xbf16>, vector<24x64xbf16>, vector<24x64xf32> -> vector<24x64xf32>
    %117 = arith.truncf %116 : vector<24x64xf32> to vector<24x64xbf16>
    %118 = vector.extract_strided_slice %37 {offsets = [0, 0], sizes = [64, 128], strides = [1, 1]} : vector<128x128xbf16> to vector<64x128xbf16>
    %cst_43 = arith.constant dense<0.000000e+00> : vector<24x128xf32>
    %119 = tpu.matmul %117, %118, %cst_43 {dimension_numbers = #tpu.dot_dimension_numbers<[1], [0], [0], [1], [0, 0, 1, 1], [], []>} : vector<24x64xbf16>, vector<64x128xbf16>, vector<24x128xf32> -> vector<24x128xf32>
    %120 = arith.addf %94, %119 : vector<24x128xf32>
    %121 = vector.extract_strided_slice %93 {offsets = [0, 64], sizes = [24, 64], strides = [1, 1]} : vector<24x384xf32> to vector<24x64xf32>
    %122 = vector.extract_strided_slice %93 {offsets = [0, 192], sizes = [24, 64], strides = [1, 1]} : vector<24x384xf32> to vector<24x64xf32>
    %123 = vector.extract_strided_slice %93 {offsets = [0, 320], sizes = [24, 64], strides = [1, 1]} : vector<24x384xf32> to vector<24x64xf32>
    %124 = arith.truncf %121 : vector<24x64xf32> to vector<24x64xbf16>
    %125 = arith.truncf %122 : vector<24x64xf32> to vector<24x64xbf16>
    %cst_44 = arith.constant dense<0.000000e+00> : vector<24x24xf32>
    %126 = tpu.matmul %124, %125, %cst_44 {dimension_numbers = #tpu.dot_dimension_numbers<[1], [1], [0], [0], [0, 0, 1, 0], [], []>} : vector<24x64xbf16>, vector<24x64xbf16>, vector<24x24xf32> -> vector<24x24xf32>
    %cst_45 = arith.constant 1.250000e-01 : f32
    %127 = vector.broadcast %cst_45 : f32 to vector<24x24xf32>
    %128 = arith.mulf %126, %127 : vector<24x24xf32>
    %129 = arith.addf %128, %38 : vector<24x24xf32>
    %cst_46 = arith.constant dense<0xFF800000> : vector<24xf32>
    %130 = vector.multi_reduction <maximumf>, %129, %cst_46 [1] : vector<24x24xf32> to vector<24xf32>
    %131 = vector.shape_cast %130 : vector<24xf32> to vector<24x1xf32>
    %132 = vector.broadcast %131 : vector<24x1xf32> to vector<24x24xf32>
    %133 = arith.subf %129, %132 : vector<24x24xf32>
    %134 = math.exp %133 : vector<24x24xf32>
    %cst_47 = arith.constant dense<0.000000e+00> : vector<24xf32>
    %135 = vector.multi_reduction <add>, %134, %cst_47 [1] : vector<24x24xf32> to vector<24xf32>
    %136 = vector.shape_cast %135 : vector<24xf32> to vector<24x1xf32>
    %137 = tpu.reciprocal %136 {approx = true} : vector<24x1xf32> -> vector<24x1xf32>
    %138 = vector.broadcast %137 : vector<24x1xf32> to vector<24x24xf32>
    %139 = arith.mulf %134, %138 : vector<24x24xf32>
    %140 = arith.truncf %139 : vector<24x24xf32> to vector<24x24xbf16>
    %141 = arith.truncf %123 : vector<24x64xf32> to vector<24x64xbf16>
    %cst_48 = arith.constant dense<0.000000e+00> : vector<24x64xf32>
    %142 = tpu.matmul %140, %141, %cst_48 {dimension_numbers = #tpu.dot_dimension_numbers<[1], [0], [0], [1], [0, 0, 1, 1], [], []>} : vector<24x24xbf16>, vector<24x64xbf16>, vector<24x64xf32> -> vector<24x64xf32>
    %143 = arith.truncf %142 : vector<24x64xf32> to vector<24x64xbf16>
    %144 = vector.extract_strided_slice %37 {offsets = [64, 0], sizes = [64, 128], strides = [1, 1]} : vector<128x128xbf16> to vector<64x128xbf16>
    %cst_49 = arith.constant dense<0.000000e+00> : vector<24x128xf32>
    %145 = tpu.matmul %143, %144, %cst_49 {dimension_numbers = #tpu.dot_dimension_numbers<[1], [0], [0], [1], [0, 0, 1, 1], [], []>} : vector<24x64xbf16>, vector<64x128xbf16>, vector<24x128xf32> -> vector<24x128xf32>
    %146 = arith.addf %120, %145 : vector<24x128xf32>
    %147 = tpu.concatenate %92, %146 in 0 : vector<24x128xf32>, vector<24x128xf32> -> vector<48x128xf32>
    %c0_50 = arith.constant 0 : index
    %c0_51 = arith.constant 0 : index
    %c0_52 = arith.constant 0 : index
    %148 = vector.load %arg14[%c0_50, %c0_51, %c0_52] : memref<1x1x128xf32, #tpu.memory_space<vmem>>, vector<1x1x128xf32>
    %149 = vector.shape_cast %148 : vector<1x1x128xf32> to vector<1x128xf32>
    %150 = vector.broadcast %149 : vector<1x128xf32> to vector<48x128xf32>
    %151 = arith.addf %147, %150 : vector<48x128xf32>
    %152 = arith.addf %3, %151 : vector<48x128xf32>
    %c0_53 = arith.constant 0 : index
    %c0_54 = arith.constant 0 : index
    %c0_55 = arith.constant 0 : index
    %153 = vector.load %arg15[%c0_53, %c0_54, %c0_55] : memref<1x1x128xf32, #tpu.memory_space<vmem>>, vector<1x1x128xf32>
    %154 = vector.shape_cast %153 : vector<1x1x128xf32> to vector<1x128xf32>
    %c0_56 = arith.constant 0 : index
    %c0_57 = arith.constant 0 : index
    %c0_58 = arith.constant 0 : index
    %155 = vector.load %arg16[%c0_56, %c0_57, %c0_58] : memref<1x1x128xf32, #tpu.memory_space<vmem>>, vector<1x1x128xf32>
    %156 = vector.shape_cast %155 : vector<1x1x128xf32> to vector<1x128xf32>
    %cst_59 = arith.constant dense<0.000000e+00> : vector<48xf32>
    %157 = vector.multi_reduction <add>, %152, %cst_59 [1] : vector<48x128xf32> to vector<48xf32>
    %158 = vector.shape_cast %157 : vector<48xf32> to vector<48x1xf32>
    %cst_60 = arith.constant 1.280000e+02 : f32
    %159 = vector.broadcast %cst_60 : f32 to vector<48x1xf32>
    %160 = arith.divf %158, %159 : vector<48x1xf32>
    %161 = vector.broadcast %160 : vector<48x1xf32> to vector<48x128xf32>
    %162 = arith.subf %152, %161 : vector<48x128xf32>
    %163 = arith.mulf %162, %162 : vector<48x128xf32>
    %cst_61 = arith.constant dense<0.000000e+00> : vector<48xf32>
    %164 = vector.multi_reduction <add>, %163, %cst_61 [1] : vector<48x128xf32> to vector<48xf32>
    %165 = vector.shape_cast %164 : vector<48xf32> to vector<48x1xf32>
    %cst_62 = arith.constant 1.280000e+02 : f32
    %166 = vector.broadcast %cst_62 : f32 to vector<48x1xf32>
    %167 = arith.divf %165, %166 : vector<48x1xf32>
    %cst_63 = arith.constant 9.99999974E-6 : f32
    %168 = vector.broadcast %cst_63 : f32 to vector<48x1xf32>
    %169 = arith.addf %167, %168 : vector<48x1xf32>
    %170 = math.rsqrt %169 : vector<48x1xf32>
    %171 = vector.broadcast %170 : vector<48x1xf32> to vector<48x128xf32>
    %172 = arith.mulf %162, %171 : vector<48x128xf32>
    %173 = vector.broadcast %154 : vector<1x128xf32> to vector<48x128xf32>
    %174 = arith.mulf %172, %173 : vector<48x128xf32>
    %175 = vector.broadcast %156 : vector<1x128xf32> to vector<48x128xf32>
    %176 = arith.addf %174, %175 : vector<48x128xf32>
    %177 = arith.truncf %176 : vector<48x128xf32> to vector<48x128xbf16>
    %c0_64 = arith.constant 0 : index
    %c0_65 = arith.constant 0 : index
    %c0_66 = arith.constant 0 : index
    %178 = vector.load %arg17[%c0_64, %c0_65, %c0_66] : memref<1x128x512xbf16, #tpu.memory_space<vmem>>, vector<1x128x512xbf16>
    %179 = vector.shape_cast %178 : vector<1x128x512xbf16> to vector<128x512xbf16>
    %cst_67 = arith.constant dense<0.000000e+00> : vector<48x512xf32>
    %180 = tpu.matmul %177, %179, %cst_67 {dimension_numbers = #tpu.dot_dimension_numbers<[1], [0], [0], [1], [0, 0, 1, 1], [], []>} : vector<48x128xbf16>, vector<128x512xbf16>, vector<48x512xf32> -> vector<48x512xf32>
    %c0_68 = arith.constant 0 : index
    %c0_69 = arith.constant 0 : index
    %c0_70 = arith.constant 0 : index
    %181 = vector.load %arg18[%c0_68, %c0_69, %c0_70] : memref<1x1x512xf32, #tpu.memory_space<vmem>>, vector<1x1x512xf32>
    %182 = vector.shape_cast %181 : vector<1x1x512xf32> to vector<1x512xf32>
    %183 = vector.broadcast %182 : vector<1x512xf32> to vector<48x512xf32>
    %184 = arith.addf %180, %183 : vector<48x512xf32>
    %cst_71 = arith.constant 5.000000e-01 : f32
    %185 = vector.broadcast %cst_71 : f32 to vector<48x512xf32>
    %186 = arith.mulf %185, %184 : vector<48x512xf32>
    %cst_72 = arith.constant 4.471500e-02 : f32
    %187 = vector.broadcast %cst_72 : f32 to vector<48x512xf32>
    %188 = arith.mulf %187, %184 : vector<48x512xf32>
    %189 = arith.mulf %188, %184 : vector<48x512xf32>
    %190 = arith.mulf %189, %184 : vector<48x512xf32>
    %191 = arith.addf %184, %190 : vector<48x512xf32>
    %cst_73 = arith.constant 0.797884583 : f32
    %192 = vector.broadcast %cst_73 : f32 to vector<48x512xf32>
    %193 = arith.mulf %192, %191 : vector<48x512xf32>
    %194 = math.tanh %193 : vector<48x512xf32>
    %cst_74 = arith.constant 1.000000e+00 : f32
    %195 = vector.broadcast %cst_74 : f32 to vector<48x512xf32>
    %196 = arith.addf %195, %194 : vector<48x512xf32>
    %197 = arith.mulf %186, %196 : vector<48x512xf32>
    %198 = arith.truncf %197 : vector<48x512xf32> to vector<48x512xbf16>
    %c0_75 = arith.constant 0 : index
    %c0_76 = arith.constant 0 : index
    %c0_77 = arith.constant 0 : index
    %199 = vector.load %arg19[%c0_75, %c0_76, %c0_77] : memref<1x512x128xbf16, #tpu.memory_space<vmem>>, vector<1x512x128xbf16>
    %200 = vector.shape_cast %199 : vector<1x512x128xbf16> to vector<512x128xbf16>
    %cst_78 = arith.constant dense<0.000000e+00> : vector<48x128xf32>
    %201 = tpu.matmul %198, %200, %cst_78 {dimension_numbers = #tpu.dot_dimension_numbers<[1], [0], [0], [1], [0, 0, 1, 1], [], []>} : vector<48x512xbf16>, vector<512x128xbf16>, vector<48x128xf32> -> vector<48x128xf32>
    %c0_79 = arith.constant 0 : index
    %c0_80 = arith.constant 0 : index
    %c0_81 = arith.constant 0 : index
    %202 = vector.load %arg20[%c0_79, %c0_80, %c0_81] : memref<1x1x128xf32, #tpu.memory_space<vmem>>, vector<1x1x128xf32>
    %203 = vector.shape_cast %202 : vector<1x1x128xf32> to vector<1x128xf32>
    %204 = vector.broadcast %203 : vector<1x128xf32> to vector<48x128xf32>
    %205 = arith.addf %201, %204 : vector<48x128xf32>
    %206 = arith.addf %152, %205 : vector<48x128xf32>
    %c0_82 = arith.constant 0 : index
    %c0_83 = arith.constant 0 : index
    %207 = vector.load %arg29[%c0_82, %c0_83] : memref<48x128xf32, #tpu.memory_space<vmem>>, vector<48x128xf32>
    tpu.vector_store %arg29[%c0_82, %c0_83], %206 {strides = array<i32>} : memref<48x128xf32, #tpu.memory_space<vmem>>, vector<48x128xf32>,
    %c1_i32 = arith.constant 1 : i32
    %208 = arith.cmpi eq, %arg0, %c1_i32 : i32
    %209 = arith.extui %208 : i1 to i32
    %c0_i32_84 = arith.constant 0 : i32
    %210 = arith.cmpi ne, %209, %c0_i32_84 : i32
    scf.if %210 {
      %c0_85 = arith.constant 0 : index
      %c0_86 = arith.constant 0 : index
      %211 = vector.load %arg21[%c0_85, %c0_86] : memref<1x128xf32, #tpu.memory_space<vmem>>, vector<1x128xf32>
      %c0_87 = arith.constant 0 : index
      %c0_88 = arith.constant 0 : index
      %212 = vector.load %arg22[%c0_87, %c0_88] : memref<1x128xf32, #tpu.memory_space<vmem>>, vector<1x128xf32>
      %cst_89 = arith.constant dense<0.000000e+00> : vector<48xf32>
      %213 = vector.multi_reduction <add>, %206, %cst_89 [1] : vector<48x128xf32> to vector<48xf32>
      %214 = vector.shape_cast %213 : vector<48xf32> to vector<48x1xf32>
      %cst_90 = arith.constant 1.280000e+02 : f32
      %215 = vector.broadcast %cst_90 : f32 to vector<48x1xf32>
      %216 = arith.divf %214, %215 : vector<48x1xf32>
      %217 = vector.broadcast %216 : vector<48x1xf32> to vector<48x128xf32>
      %218 = arith.subf %206, %217 : vector<48x128xf32>
      %219 = arith.mulf %218, %218 : vector<48x128xf32>
      %cst_91 = arith.constant dense<0.000000e+00> : vector<48xf32>
      %220 = vector.multi_reduction <add>, %219, %cst_91 [1] : vector<48x128xf32> to vector<48xf32>
      %221 = vector.shape_cast %220 : vector<48xf32> to vector<48x1xf32>
      %cst_92 = arith.constant 1.280000e+02 : f32
      %222 = vector.broadcast %cst_92 : f32 to vector<48x1xf32>
      %223 = arith.divf %221, %222 : vector<48x1xf32>
      %cst_93 = arith.constant 9.99999974E-6 : f32
      %224 = vector.broadcast %cst_93 : f32 to vector<48x1xf32>
      %225 = arith.addf %223, %224 : vector<48x1xf32>
      %226 = math.rsqrt %225 : vector<48x1xf32>
      %227 = vector.broadcast %226 : vector<48x1xf32> to vector<48x128xf32>
      %228 = arith.mulf %218, %227 : vector<48x128xf32>
      %229 = vector.broadcast %211 : vector<1x128xf32> to vector<48x128xf32>
      %230 = arith.mulf %228, %229 : vector<48x128xf32>
      %231 = vector.broadcast %212 : vector<1x128xf32> to vector<48x128xf32>
      %232 = arith.addf %230, %231 : vector<48x128xf32>
      %c0_94 = arith.constant 0 : index
      %c0_95 = arith.constant 0 : index
      %233 = vector.load %arg23[%c0_94, %c0_95] : memref<8x24xf32, #tpu.memory_space<vmem>>, vector<8x24xf32>
      %234 = vector.extract_strided_slice %232 {offsets = [0, 0], sizes = [24, 128], strides = [1, 1]} : vector<48x128xf32> to vector<24x128xf32>
      %cst_96 = arith.constant dense<0.000000e+00> : vector<8x128xf32>
      %235 = tpu.matmul %233, %234, %cst_96 {dimension_numbers = #tpu.dot_dimension_numbers<[1], [0], [0], [1], [0, 0, 1, 1], [], []>} : vector<8x24xf32>, vector<24x128xf32>, vector<8x128xf32> -> vector<8x128xf32>
      %c0_97 = arith.constant 0 : index
      %c0_98 = arith.constant 0 : index
      %236 = vector.load %arg23[%c0_97, %c0_98] : memref<8x24xf32, #tpu.memory_space<vmem>>, vector<8x24xf32>
      %237 = vector.extract_strided_slice %232 {offsets = [24, 0], sizes = [24, 128], strides = [1, 1]} : vector<48x128xf32> to vector<24x128xf32>
      %cst_99 = arith.constant dense<0.000000e+00> : vector<8x128xf32>
      %238 = tpu.matmul %236, %237, %cst_99 {dimension_numbers = #tpu.dot_dimension_numbers<[1], [0], [0], [1], [0, 0, 1, 1], [], []>} : vector<8x24xf32>, vector<24x128xf32>, vector<8x128xf32> -> vector<8x128xf32>
      %239 = tpu.concatenate %235, %238 in 0 : vector<8x128xf32>, vector<8x128xf32> -> vector<16x128xf32>
      %240 = arith.truncf %239 : vector<16x128xf32> to vector<16x128xbf16>
      %c0_100 = arith.constant 0 : index
      %c0_101 = arith.constant 0 : index
      %241 = vector.load %arg24[%c0_100, %c0_101] : memref<128x128xbf16, #tpu.memory_space<vmem>>, vector<128x128xbf16>
      %cst_102 = arith.constant dense<0.000000e+00> : vector<16x128xf32>
      %242 = tpu.matmul %240, %241, %cst_102 {dimension_numbers = #tpu.dot_dimension_numbers<[1], [0], [0], [1], [0, 0, 1, 1], [], []>} : vector<16x128xbf16>, vector<128x128xbf16>, vector<16x128xf32> -> vector<16x128xf32>
      %c0_103 = arith.constant 0 : index
      %c0_104 = arith.constant 0 : index
      %243 = vector.load %arg25[%c0_103, %c0_104] : memref<1x128xf32, #tpu.memory_space<vmem>>, vector<1x128xf32>
      %244 = vector.broadcast %243 : vector<1x128xf32> to vector<16x128xf32>
      %245 = arith.addf %242, %244 : vector<16x128xf32>
      %cst_105 = arith.constant 0.000000e+00 : f32
      %246 = vector.broadcast %cst_105 : f32 to vector<16x128xf32>
      %247 = arith.maximumf %245, %246 : vector<16x128xf32>
      %248 = arith.truncf %247 : vector<16x128xf32> to vector<16x128xbf16>
      %c0_106 = arith.constant 0 : index
      %c0_107 = arith.constant 0 : index
      %249 = vector.load %arg26[%c0_106, %c0_107] : memref<128x128xbf16, #tpu.memory_space<vmem>>, vector<128x128xbf16>
      %cst_108 = arith.constant dense<0.000000e+00> : vector<16x128xf32>
      %250 = tpu.matmul %248, %249, %cst_108 {dimension_numbers = #tpu.dot_dimension_numbers<[1], [0], [0], [1], [0, 0, 1, 1], [], []>} : vector<16x128xbf16>, vector<128x128xbf16>, vector<16x128xf32> -> vector<16x128xf32>
      %c0_109 = arith.constant 0 : index
      %c0_110 = arith.constant 0 : index
      %251 = vector.load %arg27[%c0_109, %c0_110] : memref<1x128xf32, #tpu.memory_space<vmem>>, vector<1x128xf32>
      %252 = vector.broadcast %251 : vector<1x128xf32> to vector<16x128xf32>
      %253 = arith.addf %250, %252 : vector<16x128xf32>
      %c0_111 = arith.constant 0 : index
      %c0_112 = arith.constant 0 : index
      %254 = vector.load %arg28[%c0_111, %c0_112] : memref<16x128xf32, #tpu.memory_space<vmem>>, vector<16x128xf32>
      tpu.vector_store %arg28[%c0_111, %c0_112], %253 {strides = array<i32>} : memref<16x128xf32, #tpu.memory_space<vmem>>, vector<16x128xf32>,
    } else {
    }
    return
  }
  func.func @transform_0(%arg0: i32) -> (i32, i32, i32) {
    %c0_i32 = arith.constant 0 : i32
    %c0_i32_0 = arith.constant 0 : i32
    %c0_i32_1 = arith.constant 0 : i32
    %c0_i32_2 = arith.constant 0 : i32
    return %c0_i32, %c0_i32_0, %c0_i32_1 : i32, i32, i32
  }
  func.func @transform_1(%arg0: i32) -> (i32, i32, i32) {
    %c0_i32 = arith.constant 0 : i32
    %c0_i32_0 = arith.constant 0 : i32
    %c0_i32_1 = arith.constant 0 : i32
    %c0_i32_2 = arith.constant 0 : i32
    return %c0_i32, %c0_i32_0, %c0_i32_1 : i32, i32, i32
  }
  func.func @transform_2(%arg0: i32) -> (i32, i32, i32) {
    %c0_i32 = arith.constant 0 : i32
    %c0_i32_0 = arith.constant 0 : i32
    %c0_i32_1 = arith.constant 0 : i32
    %c0_i32_2 = arith.constant 0 : i32
    return %c0_i32, %c0_i32_0, %c0_i32_1 : i32, i32, i32
  }
  func.func @transform_3(%arg0: i32) -> (i32, i32, i32) {
    %c0_i32 = arith.constant 0 : i32
    %c0_i32_0 = arith.constant 0 : i32
    %c0_i32_1 = arith.constant 0 : i32
    %c0_i32_2 = arith.constant 0 : i32
    return %c0_i32, %c0_i32_0, %c0_i32_1 : i32, i32, i32
  }
  func.func @transform_4(%arg0: i32) -> (i32, i32, i32) {
    %c0_i32 = arith.constant 0 : i32
    %c0_i32_0 = arith.constant 0 : i32
    %c0_i32_1 = arith.constant 0 : i32
    %c0_i32_2 = arith.constant 0 : i32
    return %c0_i32, %c0_i32_0, %c0_i32_1 : i32, i32, i32
  }
  func.func @transform_5(%arg0: i32) -> (i32, i32) {
    %c0_i32 = arith.constant 0 : i32
    %c0_i32_0 = arith.constant 0 : i32
    %c0_i32_1 = arith.constant 0 : i32
    return %c0_i32, %c0_i32_0 : i32, i32
  }
  func.func @transform_6(%arg0: i32) -> (i32, i32, i32) {
    %c0_i32 = arith.constant 0 : i32
    %c0_i32_0 = arith.constant 0 : i32
    %c0_i32_1 = arith.constant 0 : i32
    %c0_i32_2 = arith.constant 0 : i32
    return %c0_i32, %c0_i32_0, %c0_i32_1 : i32, i32, i32
  }
  func.func @transform_7(%arg0: i32) -> (i32, i32) {
    %c0_i32 = arith.constant 0 : i32
    %c0_i32_0 = arith.constant 0 : i32
    %c0_i32_1 = arith.constant 0 : i32
    return %c0_i32, %c0_i32_0 : i32, i32
  }
  func.func @transform_8(%arg0: i32) -> (i32, i32, i32) {
    %c0_i32 = arith.constant 0 : i32
    %c0_i32_0 = arith.constant 0 : i32
    %c0_i32_1 = arith.constant 0 : i32
    return %arg0, %c0_i32, %c0_i32_0 : i32, i32, i32
  }
  func.func @transform_9(%arg0: i32) -> (i32, i32, i32) {
    %c0_i32 = arith.constant 0 : i32
    %c0_i32_0 = arith.constant 0 : i32
    %c0_i32_1 = arith.constant 0 : i32
    return %arg0, %c0_i32, %c0_i32_0 : i32, i32, i32
  }
  func.func @transform_10(%arg0: i32) -> (i32, i32, i32) {
    %c0_i32 = arith.constant 0 : i32
    %c0_i32_0 = arith.constant 0 : i32
    %c0_i32_1 = arith.constant 0 : i32
    return %arg0, %c0_i32, %c0_i32_0 : i32, i32, i32
  }
  func.func @transform_11(%arg0: i32) -> (i32, i32, i32) {
    %c0_i32 = arith.constant 0 : i32
    %c0_i32_0 = arith.constant 0 : i32
    %c0_i32_1 = arith.constant 0 : i32
    return %arg0, %c0_i32, %c0_i32_0 : i32, i32, i32
  }
  func.func @transform_12(%arg0: i32) -> (i32, i32, i32) {
    %c0_i32 = arith.constant 0 : i32
    %c0_i32_0 = arith.constant 0 : i32
    %c0_i32_1 = arith.constant 0 : i32
    return %arg0, %c0_i32, %c0_i32_0 : i32, i32, i32
  }
  func.func @transform_13(%arg0: i32) -> (i32, i32, i32) {
    %c0_i32 = arith.constant 0 : i32
    %c0_i32_0 = arith.constant 0 : i32
    %c0_i32_1 = arith.constant 0 : i32
    return %arg0, %c0_i32, %c0_i32_0 : i32, i32, i32
  }
  func.func @transform_14(%arg0: i32) -> (i32, i32, i32) {
    %c0_i32 = arith.constant 0 : i32
    %c0_i32_0 = arith.constant 0 : i32
    %c0_i32_1 = arith.constant 0 : i32
    return %arg0, %c0_i32, %c0_i32_0 : i32, i32, i32
  }
  func.func @transform_15(%arg0: i32) -> (i32, i32, i32) {
    %c0_i32 = arith.constant 0 : i32
    %c0_i32_0 = arith.constant 0 : i32
    %c0_i32_1 = arith.constant 0 : i32
    return %arg0, %c0_i32, %c0_i32_0 : i32, i32, i32
  }
  func.func @transform_16(%arg0: i32) -> (i32, i32, i32) {
    %c0_i32 = arith.constant 0 : i32
    %c0_i32_0 = arith.constant 0 : i32
    %c0_i32_1 = arith.constant 0 : i32
    return %arg0, %c0_i32, %c0_i32_0 : i32, i32, i32
  }
  func.func @transform_17(%arg0: i32) -> (i32, i32, i32) {
    %c0_i32 = arith.constant 0 : i32
    %c0_i32_0 = arith.constant 0 : i32
    %c0_i32_1 = arith.constant 0 : i32
    return %arg0, %c0_i32, %c0_i32_0 : i32, i32, i32
  }
  func.func @transform_18(%arg0: i32) -> (i32, i32, i32) {
    %c0_i32 = arith.constant 0 : i32
    %c0_i32_0 = arith.constant 0 : i32
    %c0_i32_1 = arith.constant 0 : i32
    return %arg0, %c0_i32, %c0_i32_0 : i32, i32, i32
  }
  func.func @transform_19(%arg0: i32) -> (i32, i32, i32) {
    %c0_i32 = arith.constant 0 : i32
    %c0_i32_0 = arith.constant 0 : i32
    %c0_i32_1 = arith.constant 0 : i32
    return %arg0, %c0_i32, %c0_i32_0 : i32, i32, i32
  }
  func.func @transform_20(%arg0: i32) -> (i32, i32) {
    %c0_i32 = arith.constant 0 : i32
    %c0_i32_0 = arith.constant 0 : i32
    %c0_i32_1 = arith.constant 0 : i32
    return %c0_i32, %c0_i32_0 : i32, i32
  }
  func.func @transform_21(%arg0: i32) -> (i32, i32) {
    %c0_i32 = arith.constant 0 : i32
    %c0_i32_0 = arith.constant 0 : i32
    %c0_i32_1 = arith.constant 0 : i32
    return %c0_i32, %c0_i32_0 : i32, i32
  }
  func.func @transform_22(%arg0: i32) -> (i32, i32) {
    %c0_i32 = arith.constant 0 : i32
    %c0_i32_0 = arith.constant 0 : i32
    %c0_i32_1 = arith.constant 0 : i32
    return %c0_i32, %c0_i32_0 : i32, i32
  }
  func.func @transform_23(%arg0: i32) -> (i32, i32) {
    %c0_i32 = arith.constant 0 : i32
    %c0_i32_0 = arith.constant 0 : i32
    %c0_i32_1 = arith.constant 0 : i32
    return %c0_i32, %c0_i32_0 : i32, i32
  }
  func.func @transform_24(%arg0: i32) -> (i32, i32) {
    %c0_i32 = arith.constant 0 : i32
    %c0_i32_0 = arith.constant 0 : i32
    %c0_i32_1 = arith.constant 0 : i32
    return %c0_i32, %c0_i32_0 : i32, i32
  }
  func.func @transform_25(%arg0: i32) -> (i32, i32) {
    %c0_i32 = arith.constant 0 : i32
    %c0_i32_0 = arith.constant 0 : i32
    %c0_i32_1 = arith.constant 0 : i32
    return %c0_i32, %c0_i32_0 : i32, i32
  }
  func.func @transform_26(%arg0: i32) -> (i32, i32) {
    %c0_i32 = arith.constant 0 : i32
    %c0_i32_0 = arith.constant 0 : i32
    %c0_i32_1 = arith.constant 0 : i32
    return %c0_i32, %c0_i32_0 : i32, i32
  }
  func.func @transform_27(%arg0: i32) -> (i32, i32) {
    %c0_i32 = arith.constant 0 : i32
    %c0_i32_0 = arith.constant 0 : i32
    %c0_i32_1 = arith.constant 0 : i32
    return %c0_i32, %c0_i32_0 : i32, i32
  }
}

</mosaic_0001>

<bundles_post_ra>
// kernel: decision_transformer_forward.1
= control target key start
LH: loop header
LB: loop body
LE: loop exit
PB: predicated region body
PF: predicated region fallthrough
CT: control target
= control target key end

     0   :  { %s8878_s0 = inlined_call_operand.vmem [shape: f32[3,16,128], index: 0, kind: input, shape index: {}]   ;;  %s8879_s1 = inlined_call_operand.hbm [shape: bf16[3,128,128], index: 1, kind: input, shape index: {}]   ;;  %s8880_s2 = inlined_call_operand.hbm [shape: f32[3,1,128], index: 2, kind: input, shape index: {}]   ;;  %s8881_s3 = inlined_call_operand.hbm [shape: bf16[3,128,128], index: 3, kind: input, shape index: {}]   ;;  %s8882_s4 = inlined_call_operand.hbm [shape: f32[3,1,128], index: 4, kind: input, shape index: {}]   ;;  %s8883_s5 = inlined_call_operand.vmem [shape: f32[16,1], index: 5, kind: input, shape index: {}]   ;;  %s8884_s6 = inlined_call_operand.vmem [shape: f32[3,16,128], index: 6, kind: input, shape index: {}]   ;;  %s8885_s7 = inlined_call_operand.vmem [shape: f32[24,24], index: 7, kind: input, shape index: {}]   ;;  %s8886_s8 = inlined_call_operand.hbm [shape: f32[2,1,128], index: 8, kind: input, shape index: {}]   ;;  %s8887_s9 = inlined_call_operand.hbm [shape: f32[2,1,128], index: 9, kind: input, shape index: {}]   ;;  %s8888_s10 = inlined_call_operand.vmem [shape: bf16[2,128,384], index: 10, kind: input, shape index: {}]   ;;  %s8889_s11 = inlined_call_operand.hbm [shape: f32[2,1,384], index: 11, kind: input, shape index: {}]   ;;  %s8890_s12 = inlined_call_operand.hbm [shape: bf16[2,128,128], index: 12, kind: input, shape index: {}]   ;;  %s8891_s13 = inlined_call_operand.hbm [shape: f32[2,1,128], index: 13, kind: input, shape index: {}]   ;;  %s8892_s14 = inlined_call_operand.hbm [shape: f32[2,1,128], index: 14, kind: input, shape index: {}]   ;;  %s8893_s15 = inlined_call_operand.hbm [shape: f32[2,1,128], index: 15, kind: input, shape index: {}]   ;;  %s8894_s16 = inlined_call_operand.hbm [shape: bf16[2,128,512], index: 16, kind: input, shape index: {}]   ;;  %s8895_s17 = inlined_call_operand.hbm [shape: f32[2,1,512], index: 17, kind: input, shape index: {}]   ;;  %s8896_s18 = inlined_call_operand.hbm [shape: bf16[2,512,128], index: 18, kind: input, shape index: {}]   ;;  %s8897_s19 = inlined_call_operand.hbm [shape: f32[2,1,128], index: 19, kind: input, shape index: {}]   ;;  %s8898_s20 = inlined_call_operand.hbm [shape: f32[1,128], index: 20, kind: input, shape index: {}]   ;;  %s8899_s21 = inlined_call_operand.hbm [shape: f32[1,128], index: 21, kind: input, shape index: {}]   ;;  %s8900_s22 = inlined_call_operand.vmem [shape: f32[8,24], index: 22, kind: input, shape index: {}]   ;;  %s8901_s23 = inlined_call_operand.vmem [shape: bf16[128,128], index: 23, kind: input, shape index: {}]   ;;  %s8902_s24 = inlined_call_operand.vmem [shape: f32[1,128], index: 24, kind: input, shape index: {}]   ;;  %s8903_s25 = inlined_call_operand.hbm [shape: bf16[128,128], index: 25, kind: input, shape index: {}]   ;;  %s8904_s26 = inlined_call_operand.hbm [shape: f32[1,128], index: 26, kind: input, shape index: {}]   ;;  %s8905_s27 = inlined_call_operand.vmem [shape: f32[16,128], index: 27, kind: output, shape index: {}]  }
   0x1   :  { %8961 = sst [smem:[#allocation40_spill]] %s8878_s0 }
   0x2   :  { %8962 = sst [smem:[#allocation41_spill]] %s8879_s1 }
   0x3   :  { %8963 = sst [smem:[#allocation42_spill]] %s8880_s2 }
   0x4   :  { %8964 = sst [smem:[#allocation43_spill]] %s8881_s3 }
   0x5   :  { %8965 = sst [smem:[#allocation44_spill]] %s8882_s4 }
   0x6   :  { %8966 = sst [smem:[#allocation45_spill]] %s8883_s5 }
   0x7   :  { %8967 = sst [smem:[#allocation46_spill]] %s8884_s6 }
   0x8   :  { %8968 = sst [smem:[#allocation47_spill]] %s8885_s7 }
   0x9   :  { %8969 = sst [smem:[#allocation48_spill]] %s8886_s8 }
   0xa   :  { %8970 = sst [smem:[#allocation49_spill]] %s8887_s9 }
   0xb   :  { %8971 = sst [smem:[#allocation50_spill]] %s8888_s10 }
   0xc   :  { %8972 = sst [smem:[#allocation51_spill]] %s8889_s11 }
   0xd   :  { %8973 = sst [smem:[#allocation52_spill]] %s8890_s12 }
   0xe   :  { %8974 = sst [smem:[#allocation53_spill]] %s8891_s13 }
   0xf   :  { %8975 = sst [smem:[#allocation54_spill]] %s8892_s14 }
  0x10   :  { %8976 = sst [smem:[#allocation55_spill]] %s8893_s15 }
  0x11   :  { %8977 = sst [smem:[#allocation56_spill]] %s8894_s16 }
  0x12   :  { %8978 = sst [smem:[#allocation57_spill]] %s8895_s17 }
  0x13   :  { %8979 = sst [smem:[#allocation58_spill]] %s8897_s19 }
  0x14   :  { %8980 = sst [smem:[#allocation59_spill]] %s8898_s20 }
  0x15   :  { %8981 = sst [smem:[#allocation60_spill]] %s8899_s21 }
  0x16   :  { %8982 = sst [smem:[#allocation61_spill]] %s8900_s22 }
  0x17   :  { %8983 = sst [smem:[#allocation62_spill]] %s8901_s23 }
  0x18   :  { %8984 = sst [smem:[#allocation63_spill]] %s8902_s24 }
  0x19   :  { %8985 = sst [smem:[#allocation64_spill]] %s8903_s25 }
  0x1a   :  { %8986 = sst [smem:[#allocation65_spill]] %s8904_s26 }
  0x1b   :  { %8987 = sst [smem:[#allocation66_spill]] %s8905_s27 }
  0x1c   :  { %32 = vsyncpa [#allocation4], 0 }
  0x1d   :  { %33 = vsyncpa [#allocation6], 0 }
  0x1e   :  { %34 = vsyncpa [#allocation9], 0 }
  0x1f   :  { %35 = vsyncpa [#allocation24], 0  ;;  %s7392_s7 = smov 0   ;;  %s7394_s4 = smov 0  }
  0x20   :  { %s7396_s8 = smov 0   ;;  %s7398_s30 = smov 0  }
  0x21 LB: > { %8988 = sst [smem:[#allocation33_spill]] %s7208_s4  ;;  %s7218_s9 = smov [#allocation3]   ;;  %s7216_s30 = sphi %s7398_s30, %s9073_s30   ;;  %s7212_s8 = sphi %s7396_s8, %s9076_s8   ;;  %s7208_s4 = sphi %s7394_s4, %s9075_s4   ;;  %s7204_s7 = sphi %s7392_s7, %s9074_s7  }
  0x22   : > { %8989 = sst [smem:[#allocation34_spill]] %s7212_s8  ;;  %s709_s5 = sshll.u32 %s7218_s9, 4  ;;  %s710_s5 = int_to_ptr.vmem [resolvable:$true] %s709_s5 }
  0x23   : > { %s7413_s28 = sadd.s32 4294967295, %s7216_s30   ;;  %p5279_p0 = scmp.ge.s32.totalorder %s7216_s30, 1 }
  0x24   : > { %8990 = sst [smem:[#allocation35_spill]] %s7413_s28  ;;  %p8919_p1 = scmp.eq.s32.totalorder %s7413_s28, 0 }
  0x25   : > { %p694_p2 = scmp.lt.s32.totalorder %s7216_s30, 3  ;;  %s7432_s29 = sadd.s32 1, %s7216_s30  }
  0x26   : > { %8994 = sst [smem:[#allocation37_spill]] %s7432_s29  ;;  %s8995_s11 = sld [smem:[#allocation41_spill]] }
  0x27   : > { %p7419_p4 = pnand %p5279_p0, %p694_p2 }
  0x29   : > { %s8991_s0 = scalar_select %p7419_p4, 1, 0 }
  0x2a   : > { %p6149_p5 = pneg %p7419_p4 }
  0x2b   : > { %8992 = sst [smem:[#allocation36_spill]] %s8991_s0 }
  0x2c   : > { %p7427_p6 = pnand %p6149_p5, %p8919_p1  ;;  %s6604_s2 = scalar_lea.hbm %s8995_s11, 3072 }
  0x2d   : > { %p6605_p7 = scmp.ne.s32.totalorder %s8995_s11, %s6604_s2  ;;  %p6611_p11 = scmp.lt.u32.totalorder %s6604_s2, %s8995_s11 }
  0x2e   : > { %s8993_s10 = scalar_select %p7427_p6, 1, 0 }
  0x2f   : > { %p7442_p8 = pneg %p7427_p6 }
  0x31   : > { %s8996_s27 = scalar_select %p7442_p8, 1, 0 }
  0x32   : > { %p6607_p9 = pnand %p7442_p8, %p6605_p7 }
  0x34   : > { %p6608_p10 = pneg %p6607_p9 }
  0x36   : > { %p6613_p12 = pnand %p6611_p11, %p6608_p10 }
  0x38   : > { %6616 = shalt.err (!%p6613_p12)
}
  0x39   : > { %s6617_s1 = scalar_lea.vmem %s710_s5, 3072  ;;  %p6625_p5 = scmp.lt.s32.totalorder %s710_s5, %s710_s5 }
  0x3a   : > { %p6618_p13 = scmp.ne.s32.totalorder %s710_s5, %s6617_s1  ;;  %p6626_p3 = scmp.lt.s32.totalorder %s6617_s1, %s6617_s1 }
  0x3c   : > { %p6620_p0 = pnand %p6618_p13, %p7442_p8  ;;  %p6627_p1 = por %p6626_p3, %p6625_p5 }
  0x3e   : > { %p6621_p2 = pneg %p6620_p0 }
  0x40   : > { %p6628_p4 = pnand %p6627_p1, %p6621_p2 }
  0x42   : > { %6631 = shalt.err (!%p6628_p4)
}
  0x43   : > { %s8923_s6 = smov 64   ;;  %s8925_s23 = smov 4  }
  0x44   : > { %6152 = dma.hbm_to_vmem [thread:$0]  (!%p7427_p6), %s8995_s11, 3072, %s710_s5, [#allocation4], %s8923_s6, %s8923_s6, %s8925_s23  }
  0x45   : > { %s213_s3 = ssub.s32 %s7216_s30, %s7432_s29  ;;  %s216_s9 = sadd.s32 1, %s7212_s8 }
  0x46   : > { %p214_p1 = scmp.eq.s32.totalorder %s213_s3, 0  ;;  %p223_p3 = scmp.ne.s32.totalorder %s7212_s8, %s7208_s4 }
  0x47   : > { %p224_p4 = scmp.eq.s32.totalorder %s7216_s30, 0  ;;  %p229_p7 = scmp.ne.s32.totalorder %s7208_s4, %s7204_s7 }
  0x48   : > { %s7470_s1 = scalar_select %p214_p1, %s7212_s8, %s216_s9  }
  0x49   : > { %p225_p9 = por %p224_p4, %p223_p3  ;;  %p8998_p10 = scmp.eq.s32.totalorder %s7413_s28, 0 }
  0x4a   : > { %8997 = sst [smem:[#allocation38_spill]] %s7470_s1  ;;  %p6216_p12 = scmp.lt.s32.totalorder %s7216_s30, 2 }
  0x4b   : > { %p7474_p11 = por %p8998_p10, %p229_p7  ;;  %s826_s0 = sand.u32 1, %s7216_s30  }
  0x4c   : > { %s7481_s19 = sand.u32 1, %s7212_s8   ;;  %s7484_s5 = sshll.u32 %s7216_s30, 4 }
  0x4d   : > { %s8999_s22 = scalar_select %p7474_p11, 1, 0 }
  0x4e   : > { %s9001_s7 = sld [smem:[#allocation48_spill]]  ;;  %s829_s6 = scalar_lea.vmem [#allocation10], %s7481_s19 }
  0x4f   : > { %9000 = sst [smem:[#allocation39_spill]] %s8999_s22  ;;  %s836_s23 = sshll.u32 %s829_s6, 4  ;;  %s7493_s23 = int_to_ptr.vmem [resolvable:$true] %s836_s23 }
  0x50   : > { %p7495_p13 = pnand %p6216_p12, %p225_p9  ;;  %s9004_s29 = sld [smem:[#allocation49_spill]] }
  0x51   : > { %s846_s2 = scalar_lea.vmem [#allocation11], %s7481_s19  ;;  %s7508_s22 = scalar_lea.sflag [#allocation4], %s826_s0 }
  0x52   : > { %s9003_s11 = scalar_select %p7495_p13, 1, 0 }
  0x53   : > { %p7514_p2 = pneg %p7495_p13 }
  0x54   : > { %s9002_s3 = smov %s9001_s7  ;;  %s7490_s9 = scalar_lea.hbm %s9001_s7, %s7484_s5 }
  0x55   : > { %s7506_s7 = sshll.u32 %s846_s2, 4  ;;  %s6632_s4 = scalar_lea.hbm %s7490_s9, 16  ;;  %s854_s7 = int_to_ptr.vmem [resolvable:$true] %s7506_s7 }
  0x56   : > { %s7503_s24 = scalar_lea.hbm %s9004_s29, %s7484_s5  ;;  %p6633_p0 = scmp.ne.s32.totalorder %s7490_s9, %s6632_s4 }
  0x57   : > { %s9005_s6 = scalar_select %p7514_p2, 1, 0 }
  0x58   : > { %p6635_p5 = pnand %p7514_p2, %p6633_p0  ;;  %s6637_s28 = scalar_lea.hbm %s9002_s3, 32 }
  0x59   : > { %p6638_p3 = scmp.lt.u32.totalorder %s7490_s9, %s9002_s3  ;;  %p6639_p4 = scmp.lt.u32.totalorder %s6637_s28, %s6632_s4 }
  0x5a   : > { %p6636_p1 = pneg %p6635_p5  ;;  %p6641_p9 = scmp.lt.u32.totalorder %s6632_s4, %s7490_s9 }
  0x5b   : > { %p6640_p7 = por %p6639_p4, %p6638_p3 }
  0x5d   : > { %p6642_p10 = por %p6641_p9, %p6640_p7 }
  0x5f   : > { %p6643_p12 = pnand %p6642_p10, %p6636_p1 }
  0x61   : > { %6646 = shalt.err (!%p6643_p12)
}
  0x62   : > { %s6647_s0 = scalar_lea.vmem %s7493_s23, 16  ;;  %s7221_s8 = smov [#allocation10]  }
  0x63   : > { %p6648_p0 = scmp.ne.s32.totalorder %s7493_s23, %s6647_s0  ;;  %s6652_s1 = sshll.u32 %s7221_s8, 4  ;;  %s6653_s1 = int_to_ptr.vmem [resolvable:$false] %s6652_s1 }
  0x64   : > { %s6654_s26 = scalar_lea.vmem %s6653_s1, 32  ;;  %p6655_p6 = scmp.lt.s32.totalorder %s7493_s23, %s6653_s1 }
  0x65   : > { %p6650_p5 = pnand %p6648_p0, %p7514_p2  ;;  %p6656_p8 = scmp.lt.s32.totalorder %s6654_s26, %s6647_s0 }
  0x67   : > { %p6651_p11 = pneg %p6650_p5  ;;  %p6657_p3 = por %p6656_p8, %p6655_p6 }
  0x69   : > { %p6658_p4 = pnand %p6657_p3, %p6651_p11 }
  0x6b   : > { %6661 = shalt.err (!%p6658_p4)
}
  0x6c   : > { %6177 = dma.hbm_to_vmem [thread:$0]  (!%p7495_p13), %s7490_s9, 16, %s7493_s23, %s7508_s22  }
  0x6d   : > { %s6091_s4 = smul.u32 3, %s7481_s19  ;;  %s6662_s28 = scalar_lea.hbm %s7503_s24, 16 }
  0x6e   : > { %p6663_p1 = scmp.ne.s32.totalorder %s7503_s24, %s6662_s28  ;;  %s6667_s8 = scalar_lea.hbm %s9004_s29, 32 }
  0x6f   : > { %p6668_p11 = scmp.lt.u32.totalorder %s7503_s24, %s9004_s29  ;;  %p6669_p7 = scmp.lt.u32.totalorder %s6667_s8, %s6662_s28 }
  0x70   : > { %p6665_p6 = pnand %p6663_p1, %p7514_p2  ;;  %p6671_p10 = scmp.lt.u32.totalorder %s6662_s28, %s7503_s24 }
  0x71   : > { %p6670_p9 = por %p6669_p7, %p6668_p11 }
  0x72   : > { %p6666_p8 = pneg %p6665_p6 }
  0x73   : > { %p6672_p12 = por %p6671_p10, %p6670_p9 }
  0x75   : > { %p6673_p0 = pnand %p6672_p12, %p6666_p8 }
  0x77   : > { %6676 = shalt.err (!%p6673_p0)
}
  0x78   : > { %s6677_s23 = scalar_lea.vmem %s854_s7, 16  ;;  %s7222_s9 = smov [#allocation11]  }
  0x79   : > { %p6678_p5 = scmp.ne.s32.totalorder %s854_s7, %s6677_s23  ;;  %s6682_s3 = sshll.u32 %s7222_s9, 4  ;;  %s6683_s3 = int_to_ptr.vmem [resolvable:$false] %s6682_s3 }
  0x7a   : > { %s6684_s2 = scalar_lea.vmem %s6683_s3, 32  ;;  %p6685_p1 = scmp.lt.s32.totalorder %s854_s7, %s6683_s3 }
  0x7b   : > { %p6680_p3 = pnand %p6678_p5, %p7514_p2  ;;  %p6686_p6 = scmp.lt.s32.totalorder %s6684_s2, %s6677_s23 }
  0x7d   : > { %p6681_p4 = pneg %p6680_p3  ;;  %p6687_p13 = por %p6686_p6, %p6685_p1 }
  0x7f   : > { %p6688_p7 = pnand %p6687_p13, %p6681_p4 }
  0x81   : > { %6691 = shalt.err (!%p6688_p7)
}
  0x82   : > { %p9006_p11 = scmp.ne.s32.totalorder %s9003_s11, 0  ;;  %s6092_s28 = smul.u32 48, %s7216_s30 }
  0x83   : > { %s872_s0 = scalar_lea.vmem [#allocation12], %s6091_s4  ;;  %s5292_s1 = sshll.u32 %s7481_s19, 6 }
  0x84   : > { %6180 = dma.hbm_to_vmem [thread:$0]  (!%p9006_p11), %s7503_s24, 16, %s854_s7, %s7508_s22  }
  0x85   : > { %s880_s8 = sshll.u32 %s872_s0, 4  ;;  %s9007_s29 = sld [smem:[#allocation51_spill]]  ;;  %s881_s8 = int_to_ptr.vmem [resolvable:$true] %s880_s8 }
  0x8b   : > { %s878_s3 = scalar_lea.hbm %s9007_s29, %s6092_s28  ;;  %s6697_s20 = scalar_lea.hbm %s9007_s29, 96 }
  0x8c   : > { %s6692_s23 = scalar_lea.hbm %s878_s3, 48  ;;  %p6698_p10 = scmp.lt.u32.totalorder %s878_s3, %s9007_s29 }
  0x8d   : > { %p6693_p13 = scmp.ne.s32.totalorder %s878_s3, %s6692_s23  ;;  %p6699_p12 = scmp.lt.u32.totalorder %s6697_s20, %s6692_s23 }
  0x8e   : > { %p6701_p5 = scmp.lt.u32.totalorder %s6692_s23, %s878_s3 }
  0x8f   : > { %p6695_p8 = pnand %p6693_p13, %p7514_p2  ;;  %p6700_p0 = por %p6699_p12, %p6698_p10 }
  0x91   : > { %p6696_p9 = pneg %p6695_p8  ;;  %p6702_p3 = por %p6701_p5, %p6700_p0 }
  0x93   : > { %p6703_p4 = pnand %p6702_p3, %p6696_p9 }
  0x95   : > { %6706 = shalt.err (!%p6703_p4)
}
  0x96   : > { %s6707_s7 = scalar_lea.vmem %s881_s8, 48  ;;  %s7223_s4 = smov [#allocation12]  }
  0x97   : > { %p6708_p1 = scmp.ne.s32.totalorder %s881_s8, %s6707_s7  ;;  %s6712_s28 = sshll.u32 %s7223_s4, 4  ;;  %s6713_s28 = int_to_ptr.vmem [resolvable:$false] %s6712_s28 }
  0x98   : > { %s6714_s21 = scalar_lea.vmem %s6713_s28, 96  ;;  %p6715_p13 = scmp.lt.s32.totalorder %s881_s8, %s6713_s28 }
  0x99   : > { %p6710_p6 = pnand %p6708_p1, %p7514_p2  ;;  %p6716_p8 = scmp.lt.s32.totalorder %s6714_s21, %s6707_s7 }
  0x9b   : > { %p6711_p7 = pneg %p6710_p6  ;;  %p6717_p11 = por %p6716_p8, %p6715_p13 }
  0x9d   : > { %p6718_p10 = pnand %p6717_p11, %p6711_p7 }
  0x9f   : > { %6721 = shalt.err (!%p6718_p10)
}
  0xa0   : > { %p9008_p12 = scmp.ne.s32.totalorder %s9003_s11, 0  ;;  %s5536_s20 = sshll.u32 %s7216_s30, 10 }
  0xa1   : > { %s9009_s12 = sld [smem:[#allocation52_spill]]  ;;  %s891_s9 = scalar_lea.vmem [#allocation13], %s5292_s1 }
  0xa2   : > { %6183 = dma.hbm_to_vmem [thread:$0]  (!%p9008_p12), %s878_s3, 48, %s881_s8, %s7508_s22  }
  0xa3   : > { %s898_s23 = sshll.u32 %s891_s9, 4  ;;  %s7584_s23 = int_to_ptr.vmem [resolvable:$true] %s898_s23 }
  0xa7   : > { %s7580_s26 = scalar_lea.hbm %s9009_s12, %s5536_s20  ;;  %s6727_s24 = scalar_lea.hbm %s9009_s12, 2048 }
  0xa8   : > { %s6722_s2 = scalar_lea.hbm %s7580_s26, 1024  ;;  %p6728_p5 = scmp.lt.u32.totalorder %s7580_s26, %s9009_s12 }
  0xa9   : > { %p6723_p11 = scmp.ne.s32.totalorder %s7580_s26, %s6722_s2  ;;  %p6729_p3 = scmp.lt.u32.totalorder %s6727_s24, %s6722_s2 }
  0xaa   : > { %p6731_p1 = scmp.lt.u32.totalorder %s6722_s2, %s7580_s26 }
  0xab   : > { %p6725_p9 = pnand %p6723_p11, %p7514_p2  ;;  %p6730_p4 = por %p6729_p3, %p6728_p5 }
  0xad   : > { %p6726_p0 = pneg %p6725_p9  ;;  %p6732_p6 = por %p6731_p1, %p6730_p4 }
  0xaf   : > { %p6733_p7 = pnand %p6732_p6, %p6726_p0 }
  0xb1   : > { %6736 = shalt.err (!%p6733_p7)
}
  0xb2   : > { %s6737_s1 = scalar_lea.vmem %s7584_s23, 1024  ;;  %s7224_s28 = smov [#allocation13]  }
  0xb3   : > { %p6738_p13 = scmp.ne.s32.totalorder %s7584_s23, %s6737_s1  ;;  %s6742_s21 = sshll.u32 %s7224_s28, 4  ;;  %s6743_s21 = int_to_ptr.vmem [resolvable:$false] %s6742_s21 }
  0xb4   : > { %s6744_s20 = scalar_lea.vmem %s6743_s21, 2048  ;;  %p6745_p11 = scmp.lt.s32.totalorder %s7584_s23, %s6743_s21 }
  0xb5   : > { %p6740_p8 = pnand %p6738_p13, %p7514_p2  ;;  %p6746_p9 = scmp.lt.s32.totalorder %s6744_s20, %s6737_s1 }
  0xb7   : > { %p6741_p10 = pneg %p6740_p8  ;;  %p6747_p5 = por %p6746_p9, %p6745_p11 }
  0xb9   : > { %p6748_p3 = pnand %p6747_p5, %p6741_p10 }
  0xbb   : > { %6751 = shalt.err (!%p6748_p3)
}
  0xbc   : > { %s9010_s25 = smov 4   ;;  %s9011_s0 = smov 64  }
  0xbd   : > { %6186 = dma.hbm_to_vmem [thread:$0]  (!%p9008_p12), %s7580_s26, 1024, %s7584_s23, %s7508_s22, %s9011_s0, %s9011_s0, %s9010_s25  }
  0xbe   : > { %s9012_s13 = sld [smem:[#allocation53_spill]]  ;;  %s911_s3 = scalar_lea.vmem [#allocation14], %s7481_s19 }
  0xbf   : > { %s918_s24 = sshll.u32 %s911_s3, 4  ;;  %s919_s24 = int_to_ptr.vmem [resolvable:$true] %s918_s24 }
  0xc4   : > { %s7615_s8 = scalar_lea.hbm %s9012_s13, %s7484_s5  ;;  %s6757_s26 = scalar_lea.hbm %s9012_s13, 32 }
  0xc5   : > { %s6752_s7 = scalar_lea.hbm %s7615_s8, 16  ;;  %p6758_p6 = scmp.lt.u32.totalorder %s7615_s8, %s9012_s13 }
  0xc6   : > { %p6753_p0 = scmp.ne.s32.totalorder %s7615_s8, %s6752_s7  ;;  %p6759_p7 = scmp.lt.u32.totalorder %s6757_s26, %s6752_s7 }
  0xc7   : > { %p6761_p8 = scmp.lt.u32.totalorder %s6752_s7, %s7615_s8 }
  0xc8   : > { %p6755_p4 = pnand %p6753_p0, %p7514_p2  ;;  %p6760_p13 = por %p6759_p7, %p6758_p6 }
  0xca   : > { %p6756_p1 = pneg %p6755_p4  ;;  %p6762_p10 = por %p6761_p8, %p6760_p13 }
  0xcc   : > { %p6763_p11 = pnand %p6762_p10, %p6756_p1 }
  0xce   : > { %6766 = shalt.err (!%p6763_p11)
}
  0xcf   : > { %s6767_s21 = scalar_lea.vmem %s919_s24, 16  ;;  %s7225_s20 = smov [#allocation14]  }
  0xd0   : > { %p6768_p9 = scmp.ne.s32.totalorder %s919_s24, %s6767_s21  ;;  %s6772_s9 = sshll.u32 %s7225_s20, 4  ;;  %s6773_s9 = int_to_ptr.vmem [resolvable:$false] %s6772_s9 }
  0xd1   : > { %s6774_s2 = scalar_lea.vmem %s6773_s9, 32  ;;  %p6775_p0 = scmp.lt.s32.totalorder %s919_s24, %s6773_s9 }
  0xd2   : > { %p6770_p5 = pnand %p6768_p9, %p7514_p2  ;;  %p6776_p4 = scmp.lt.s32.totalorder %s6774_s2, %s6767_s21 }
  0xd4   : > { %p6771_p3 = pneg %p6770_p5  ;;  %p6777_p12 = por %p6776_p4, %p6775_p0 }
  0xd6   : > { %p6778_p6 = pnand %p6777_p12, %p6771_p3 }
  0xd8   : > { %6781 = shalt.err (!%p6778_p6)
}
  0xd9   : > { %p9013_p7 = scmp.ne.s32.totalorder %s9003_s11, 0  ;;  %s9014_s14 = sld [smem:[#allocation54_spill]] }
  0xda   : > { %s928_s1 = scalar_lea.vmem [#allocation15], %s7481_s19 }
  0xdb   : > { %6189 = dma.hbm_to_vmem [thread:$0]  (!%p9013_p7), %s7615_s8, 16, %s919_s24, %s7508_s22  }
  0xdc   : > { %s935_s26 = sshll.u32 %s928_s1, 4  ;;  %s936_s26 = int_to_ptr.vmem [resolvable:$true] %s935_s26 }
  0xdf   : > { %s7640_s4 = scalar_lea.hbm %s9014_s14, %s7484_s5  ;;  %s6787_s8 = scalar_lea.hbm %s9014_s14, 32 }
  0xe0   : > { %s6782_s23 = scalar_lea.hbm %s7640_s4, 16  ;;  %p6788_p8 = scmp.lt.u32.totalorder %s7640_s4, %s9014_s14 }
  0xe1   : > { %p6783_p12 = scmp.ne.s32.totalorder %s7640_s4, %s6782_s23  ;;  %p6789_p10 = scmp.lt.u32.totalorder %s6787_s8, %s6782_s23 }
  0xe2   : > { %p6791_p9 = scmp.lt.u32.totalorder %s6782_s23, %s7640_s4 }
  0xe3   : > { %p6785_p1 = pnand %p6783_p12, %p7514_p2  ;;  %p6790_p11 = por %p6789_p10, %p6788_p8 }
  0xe5   : > { %p6786_p13 = pneg %p6785_p1  ;;  %p6792_p5 = por %p6791_p9, %p6790_p11 }
  0xe7   : > { %p6793_p3 = pnand %p6792_p5, %p6786_p13 }
  0xe9   : > { %6796 = shalt.err (!%p6793_p3)
}
  0xea   : > { %s6797_s9 = scalar_lea.vmem %s936_s26, 16  ;;  %s7226_s2 = smov [#allocation15]  }
  0xeb   : > { %p6798_p0 = scmp.ne.s32.totalorder %s936_s26, %s6797_s9  ;;  %s6802_s3 = sshll.u32 %s7226_s2, 4  ;;  %s6803_s3 = int_to_ptr.vmem [resolvable:$false] %s6802_s3 }
  0xec   : > { %s6804_s7 = scalar_lea.vmem %s6803_s3, 32  ;;  %p6805_p12 = scmp.lt.s32.totalorder %s936_s26, %s6803_s3 }
  0xed   : > { %p6800_p4 = pnand %p6798_p0, %p7514_p2  ;;  %p6806_p1 = scmp.lt.s32.totalorder %s6804_s7, %s6797_s9 }
  0xef   : > { %p6801_p6 = pneg %p6800_p4  ;;  %p6807_p7 = por %p6806_p1, %p6805_p12 }
  0xf1   : > { %p6808_p8 = pnand %p6807_p7, %p6801_p6 }
  0xf3   : > { %6811 = shalt.err (!%p6808_p8)
}
  0xf4   : > { %p9015_p10 = scmp.ne.s32.totalorder %s9003_s11, 0  ;;  %s9016_s15 = sld [smem:[#allocation55_spill]] }
  0xf5   : > { %s945_s21 = scalar_lea.vmem [#allocation16], %s7481_s19 }
  0xf6   : > { %6192 = dma.hbm_to_vmem [thread:$0]  (!%p9015_p10), %s7640_s4, 16, %s936_s26, %s7508_s22  }
  0xf7   : > { %s952_s8 = sshll.u32 %s945_s21, 4  ;;  %s953_s8 = int_to_ptr.vmem [resolvable:$true] %s952_s8 }
  0xfa   : > { %s7665_s28 = scalar_lea.hbm %s9016_s15, %s7484_s5  ;;  %s6817_s4 = scalar_lea.hbm %s9016_s15, 32 }
  0xfb   : > { %s6812_s24 = scalar_lea.hbm %s7665_s28, 16  ;;  %p6818_p9 = scmp.lt.u32.totalorder %s7665_s28, %s9016_s15 }
  0xfc   : > { %p6813_p7 = scmp.ne.s32.totalorder %s7665_s28, %s6812_s24  ;;  %p6819_p5 = scmp.lt.u32.totalorder %s6817_s4, %s6812_s24 }
  0xfd   : > { %p6821_p0 = scmp.lt.u32.totalorder %s6812_s24, %s7665_s28 }
  0xfe   : > { %p6815_p13 = pnand %p6813_p7, %p7514_p2  ;;  %p6820_p3 = por %p6819_p5, %p6818_p9 }
 0x100   : > { %p6816_p11 = pneg %p6815_p13  ;;  %p6822_p4 = por %p6821_p0, %p6820_p3 }
 0x102   : > { %p6823_p6 = pnand %p6822_p4, %p6816_p11 }
 0x104   : > { %6826 = shalt.err (!%p6823_p6)
}
 0x105   : > { %s6827_s3 = scalar_lea.vmem %s953_s8, 16  ;;  %s7227_s7 = smov [#allocation16]  }
 0x106   : > { %p6828_p12 = scmp.ne.s32.totalorder %s953_s8, %s6827_s3  ;;  %s6832_s1 = sshll.u32 %s7227_s7, 4  ;;  %s6833_s1 = int_to_ptr.vmem [resolvable:$false] %s6832_s1 }
 0x107   : > { %s6834_s23 = scalar_lea.vmem %s6833_s1, 32  ;;  %p6835_p7 = scmp.lt.s32.totalorder %s953_s8, %s6833_s1 }
 0x108   : > { %p6830_p1 = pnand %p6828_p12, %p7514_p2  ;;  %p6836_p13 = scmp.lt.s32.totalorder %s6834_s23, %s6827_s3 }
 0x10a   : > { %p6831_p8 = pneg %p6830_p1  ;;  %p6837_p10 = por %p6836_p13, %p6835_p7 }
 0x10c   : > { %p6838_p5 = pnand %p6837_p10, %p6831_p8 }
 0x10e   : > { %6841 = shalt.err (!%p6838_p5)
}
 0x10f   : > { %p9017_p9 = scmp.ne.s32.totalorder %s9003_s11, 0  ;;  %s8950_s21 = sshll.u32 %s7481_s19, 8 }
 0x110   : > { %s8951_s24 = sshll.u32 %s7216_s30, 12  ;;  %s9018_s16 = sld [smem:[#allocation56_spill]] }
 0x111   : > { %6195 = dma.hbm_to_vmem [thread:$0]  (!%p9017_p9), %s7665_s28, 16, %s953_s8, %s7508_s22  }
 0x112   : > { %s963_s26 = scalar_lea.vmem [#allocation17], %s8950_s21 }
 0x113   : > { %s970_s2 = sshll.u32 %s963_s26, 4  ;;  %s7697_s2 = int_to_ptr.vmem [resolvable:$true] %s970_s2 }
 0x116   : > { %s7693_s4 = scalar_lea.hbm %s9018_s16, %s8951_s24  ;;  %s6847_s7 = scalar_lea.hbm %s9018_s16, 8192 }
 0x117   : > { %s6842_s3 = scalar_lea.hbm %s7693_s4, 4096  ;;  %p6848_p0 = scmp.lt.u32.totalorder %s7693_s4, %s9018_s16 }
 0x118   : > { %p6843_p10 = scmp.ne.s32.totalorder %s7693_s4, %s6842_s3  ;;  %p6849_p4 = scmp.lt.u32.totalorder %s6847_s7, %s6842_s3 }
 0x119   : > { %p6851_p12 = scmp.lt.u32.totalorder %s6842_s3, %s7693_s4 }
 0x11a   : > { %p6845_p11 = pnand %p6843_p10, %p7514_p2  ;;  %p6850_p6 = por %p6849_p4, %p6848_p0 }
 0x11c   : > { %p6846_p3 = pneg %p6845_p11  ;;  %p6852_p1 = por %p6851_p12, %p6850_p6 }
 0x11e   : > { %p6853_p8 = pnand %p6852_p1, %p6846_p3 }
 0x120   : > { %6856 = shalt.err (!%p6853_p8)
}
 0x121   : > { %s6857_s20 = scalar_lea.vmem %s7697_s2, 4096  ;;  %s7228_s9 = smov [#allocation17]  }
 0x122   : > { %p6858_p7 = scmp.ne.s32.totalorder %s7697_s2, %s6857_s20  ;;  %s6862_s26 = sshll.u32 %s7228_s9, 4  ;;  %s6863_s26 = int_to_ptr.vmem [resolvable:$false] %s6862_s26 }
 0x123   : > { %s6864_s28 = scalar_lea.vmem %s6863_s26, 8192  ;;  %p6865_p10 = scmp.lt.s32.totalorder %s7697_s2, %s6863_s26 }
 0x124   : > { %p6860_p13 = pnand %p6858_p7, %p7514_p2  ;;  %p6866_p11 = scmp.lt.s32.totalorder %s6864_s28, %s6857_s20 }
 0x126   : > { %p6861_p5 = pneg %p6860_p13  ;;  %p6867_p0 = por %p6866_p11, %p6865_p10 }
 0x128   : > { %p6868_p4 = pnand %p6867_p0, %p6861_p5 }
 0x12a   : > { %6871 = shalt.err (!%p6868_p4)
}
 0x12b   : > { %s7229_s3 = smov 256   ;;  %s8954_s8 = smov 16  }
 0x12c   : > { %6198 = dma.hbm_to_vmem [thread:$0]  (!%p9017_p9), %s7693_s4, 4096, %s7697_s2, %s7508_s22, %s7229_s3, %s7229_s3, %s8954_s8  }
 0x12d   : > { %s7231_s7 = smov [#allocation5]   ;;  %s5301_s23 = sshll.u32 %s7481_s19, 2 }
 0x12e   : > { %s722_s1 = sshll.u32 %s7231_s7, 4  ;;  %s9019_s26 = sld [smem:[#allocation42_spill]]  ;;  %s723_s1 = int_to_ptr.vmem [resolvable:$true] %s722_s1 }
 0x12f   : > { %p9020_p6 = scmp.ne.s32.totalorder %s8996_s27, 0 }
 0x134   : > { %s6872_s28 = scalar_lea.hbm %s9019_s26, 48 }
 0x135   : > { %p6873_p3 = scmp.ne.s32.totalorder %s9019_s26, %s6872_s28  ;;  %p6879_p8 = scmp.lt.u32.totalorder %s6872_s28, %s9019_s26 }
 0x137   : > { %p6875_p12 = pnand %p6873_p3, %p9020_p6 }
 0x139   : > { %p6876_p1 = pneg %p6875_p12 }
 0x13b   : > { %p6881_p7 = pnand %p6879_p8, %p6876_p1 }
 0x13d   : > { %6884 = shalt.err (!%p6881_p7)
}
 0x13e   : > { %s6885_s4 = scalar_lea.vmem %s723_s1, 48  ;;  %s6892_s2 = scalar_lea.vmem %s723_s1, 64 }
 0x13f   : > { %p6886_p13 = scmp.ne.s32.totalorder %s723_s1, %s6885_s4  ;;  %p6893_p11 = scmp.lt.s32.totalorder %s723_s1, %s723_s1 }
 0x140   : > { %p6894_p0 = scmp.lt.s32.totalorder %s6892_s2, %s6885_s4 }
 0x141   : > { %p6888_p5 = pnand %p6886_p13, %p9020_p6 }
 0x142   : > { %p6895_p4 = por %p6894_p0, %p6893_p11 }
 0x143   : > { %p6889_p10 = pneg %p6888_p5 }
 0x145   : > { %p6896_p9 = pnand %p6895_p4, %p6889_p10 }
 0x147   : > { %6899 = shalt.err (!%p6896_p9)
}
 0x148   : > { %s8955_s21 = smov 1   ;;  %p9021_p3 = scmp.ne.s32.totalorder %s8993_s10, 0 }
 0x149   : > { %s5538_s24 = sshll.u32 %s7216_s30, 6  ;;  %s9022_s17 = sld [smem:[#allocation57_spill]] }
 0x14a   : > { %6155 = dma.hbm_to_vmem [thread:$0]  (!%p9021_p3), %s9019_s26, 48, %s723_s1, [#allocation6], %s8954_s8, %s8954_s8, %s8955_s21  }
 0x14b   : > { %s984_s20 = scalar_lea.vmem [#allocation18], %s5301_s23 }
 0x14c   : > { %s992_s28 = sshll.u32 %s984_s20, 4  ;;  %s993_s28 = int_to_ptr.vmem [resolvable:$true] %s992_s28 }
 0x14f   : > { %s7748_s9 = scalar_lea.hbm %s9022_s17, %s5538_s24  ;;  %s6905_s12 = scalar_lea.hbm %s9022_s17, 128 }
 0x150   : > { %s6900_s4 = scalar_lea.hbm %s7748_s9, 64  ;;  %p6906_p8 = scmp.lt.u32.totalorder %s7748_s9, %s9022_s17 }
 0x151   : > { %p6901_p9 = scmp.ne.s32.totalorder %s7748_s9, %s6900_s4  ;;  %p6907_p7 = scmp.lt.u32.totalorder %s6905_s12, %s6900_s4 }
 0x152   : > { %p6909_p5 = scmp.lt.u32.totalorder %s6900_s4, %s7748_s9 }
 0x153   : > { %p6903_p12 = pnand %p6901_p9, %p7514_p2  ;;  %p6908_p13 = por %p6907_p7, %p6906_p8 }
 0x155   : > { %p6904_p1 = pneg %p6903_p12  ;;  %p6910_p10 = por %p6909_p5, %p6908_p13 }
 0x157   : > { %p6911_p11 = pnand %p6910_p10, %p6904_p1 }
 0x159   : > { %6914 = shalt.err (!%p6911_p11)
}
 0x15a   : > { %s6915_s23 = scalar_lea.vmem %s993_s28, 64  ;;  %s7233_s24 = smov [#allocation18]  }
 0x15b   : > { %p6916_p0 = scmp.ne.s32.totalorder %s993_s28, %s6915_s23  ;;  %s6920_s7 = sshll.u32 %s7233_s24, 4  ;;  %s6921_s7 = int_to_ptr.vmem [resolvable:$false] %s6920_s7 }
 0x15c   : > { %s6922_s20 = scalar_lea.vmem %s6921_s7, 128  ;;  %p6923_p12 = scmp.lt.s32.totalorder %s993_s28, %s6921_s7 }
 0x15d   : > { %p6918_p4 = pnand %p6916_p0, %p7514_p2  ;;  %p6924_p3 = scmp.lt.s32.totalorder %s6922_s20, %s6915_s23 }
 0x15f   : > { %p6919_p9 = pneg %p6918_p4  ;;  %p6925_p6 = por %p6924_p3, %p6923_p12 }
 0x161   : > { %p6926_p7 = pnand %p6925_p6, %p6919_p9 }
 0x163   : > { %6929 = shalt.err (!%p6926_p7)
}
 0x164   : > { %p9023_p8 = scmp.ne.s32.totalorder %s9003_s11, 0  ;;  %s7234_s4 = smov [#allocation7]  }
 0x165   : > { %s735_s2 = sshll.u32 %s7234_s4, 4  ;;  %s7235_s1 = smov [#allocation8]   ;;  %s736_s2 = int_to_ptr.vmem [resolvable:$true] %s735_s2 }
 0x166   : > { %6201 = dma.hbm_to_vmem [thread:$0]  (!%p9023_p8), %s7748_s9, 64, %s993_s28, %s7508_s22  }
 0x167   : > { %s748_s12 = sshll.u32 %s7235_s1, 4  ;;  %s9024_s24 = sld [smem:[#allocation43_spill]]  ;;  %s749_s12 = int_to_ptr.vmem [resolvable:$true] %s748_s12 }
 0x168   : > { %p9025_p3 = scmp.ne.s32.totalorder %s8996_s27, 0 }
 0x16d   : > { %s6930_s8 = scalar_lea.hbm %s9024_s24, 3072 }
 0x16e   : > { %p6931_p6 = scmp.ne.s32.totalorder %s9024_s24, %s6930_s8  ;;  %p6937_p5 = scmp.lt.u32.totalorder %s6930_s8, %s9024_s24 }
 0x170   : > { %p6933_p1 = pnand %p6931_p6, %p9025_p3 }
 0x172   : > { %p6934_p13 = pneg %p6933_p1 }
 0x174   : > { %p6939_p10 = pnand %p6937_p5, %p6934_p13 }
 0x176   : > { %6942 = shalt.err (!%p6939_p10)
}
 0x177   : > { %s6943_s9 = scalar_lea.vmem %s736_s2, 3072  ;;  %p6951_p9 = scmp.lt.s32.totalorder %s736_s2, %s736_s2 }
 0x178   : > { %p6944_p11 = scmp.ne.s32.totalorder %s736_s2, %s6943_s9  ;;  %p6952_p12 = scmp.lt.s32.totalorder %s6943_s9, %s6943_s9 }
 0x17a   : > { %p6946_p0 = pnand %p6944_p11, %p9025_p3  ;;  %p6953_p7 = por %p6952_p12, %p6951_p9 }
 0x17c   : > { %p6947_p4 = pneg %p6946_p0 }
 0x17e   : > { %p6954_p8 = pnand %p6953_p7, %p6947_p4 }
 0x180   : > { %6957 = shalt.err (!%p6954_p8)
}
 0x181   : > { %p9026_p6 = scmp.ne.s32.totalorder %s8993_s10, 0  ;;  %s9027_s1 = sld [smem:[#allocation44_spill]] }
 0x183   : > { %6158 = dma.hbm_to_vmem [thread:$0]  (!%p9026_p6), %s9024_s24, 3072, %s736_s2, [#allocation6], %s9011_s0, %s9011_s0, %s9010_s25  }
 0x187   : > { %s6958_s13 = scalar_lea.hbm %s9027_s1, 48 }
 0x188   : > { %p6959_p1 = scmp.ne.s32.totalorder %s9027_s1, %s6958_s13  ;;  %p6965_p5 = scmp.lt.u32.totalorder %s6958_s13, %s9027_s1 }
 0x18a   : > { %p6961_p8 = pnand %p6959_p1, %p9025_p3 }
 0x18c   : > { %p6962_p13 = pneg %p6961_p8 }
 0x18e   : > { %p6967_p10 = pnand %p6965_p5, %p6962_p13 }
 0x190   : > { %6970 = shalt.err (!%p6967_p10)
}
 0x191   : > { %s6971_s9 = scalar_lea.vmem %s749_s12, 48  ;;  %s6978_s2 = scalar_lea.vmem %s749_s12, 64 }
 0x192   : > { %p6972_p11 = scmp.ne.s32.totalorder %s749_s12, %s6971_s9  ;;  %p6979_p9 = scmp.lt.s32.totalorder %s749_s12, %s749_s12 }
 0x193   : > { %p6980_p12 = scmp.lt.s32.totalorder %s6978_s2, %s6971_s9 }
 0x194   : > { %p6974_p0 = pnand %p6972_p11, %p9025_p3 }
 0x195   : > { %p6981_p7 = por %p6980_p12, %p6979_p9 }
 0x196   : > { %p6975_p4 = pneg %p6974_p0 }
 0x198   : > { %p6982_p2 = pnand %p6981_p7, %p6975_p4 }
 0x19a   : > { %6985 = shalt.err (!%p6982_p2)
}
 0x19b   : > { %s9028_s21 = smov 1   ;;  %s9029_s8 = smov 16  }
 0x19c   : > { %6161 = dma.hbm_to_vmem [thread:$0]  (!%p9026_p6), %s9027_s1, 48, %s749_s12, [#allocation9], %s9029_s8, %s9029_s8, %s9028_s21  }
 0x19d   : > { %s7236_s13 = smov [#allocation23]   ;;  %s9030_s7 = sshll.u32 %s7216_s30, 12 }
 0x19e   : > { %s801_s3 = sshll.u32 %s7236_s13, 4  ;;  %s7815_s9 = scalar_lea.hbm %s8896_s18, %s9030_s7  ;;  %s802_s3 = int_to_ptr.vmem [resolvable:$true] %s801_s3 }
 0x19f   : > { %s9031_s15 = sld [smem:[#allocation64_spill]] }
 0x1a5   : > { %s6986_s16 = scalar_lea.hbm %s9031_s15, 1024 }
 0x1a6   : > { %p6987_p2 = scmp.ne.s32.totalorder %s9031_s15, %s6986_s16  ;;  %p6993_p13 = scmp.lt.u32.totalorder %s6986_s16, %s9031_s15 }
 0x1a8   : > { %p6989_p1 = pnand %p6987_p2, %p9025_p3 }
 0x1aa   : > { %p6990_p8 = pneg %p6989_p1 }
 0x1ac   : > { %p6995_p5 = pnand %p6993_p13, %p6990_p8 }
 0x1ae   : > { %6998 = shalt.err (!%p6995_p5)
}
 0x1af   : > { %s6999_s30 = scalar_lea.vmem %s802_s3, 1024  ;;  %p7007_p4 = scmp.lt.s32.totalorder %s802_s3, %s802_s3 }
 0x1b0   : > { %p7000_p10 = scmp.ne.s32.totalorder %s802_s3, %s6999_s30  ;;  %p7008_p9 = scmp.lt.s32.totalorder %s6999_s30, %s6999_s30 }
 0x1b2   : > { %p7002_p11 = pnand %p7000_p10, %p9025_p3  ;;  %p7009_p12 = por %p7008_p9, %p7007_p4 }
 0x1b4   : > { %p7003_p0 = pneg %p7002_p11 }
 0x1b6   : > { %p7010_p7 = pnand %p7009_p12, %p7003_p0 }
 0x1b8   : > { %7013 = shalt.err (!%p7010_p7)
}
 0x1b9   : > { %6170 = dma.hbm_to_vmem [thread:$0]  (!%p9026_p6), %s9031_s15, 1024, %s802_s3, [#allocation24], %s9011_s0, %s9011_s0, %s9010_s25  }
 0x1ba   : > { %s9032_s17 = sshll.u32 %s7481_s19, 8  ;;  %s7237_s28 = smov [#allocation21]  }
 0x1bb   : > { %s1003_s24 = scalar_lea.vmem [#allocation19], %s9032_s17  ;;  %s7842_s4 = sshll.u32 %s7237_s28, 4  ;;  %s772_s4 = int_to_ptr.vmem [resolvable:$true] %s7842_s4 }
 0x1bc   : > { %s1010_s8 = sshll.u32 %s1003_s24, 4  ;;  %s7014_s13 = scalar_lea.hbm %s7815_s9, 4096  ;;  %s7840_s8 = int_to_ptr.vmem [resolvable:$true] %s1010_s8 }
 0x1bd   : > { %p7015_p2 = scmp.ne.s32.totalorder %s7815_s9, %s7014_s13  ;;  %p9033_p1 = scmp.ne.s32.totalorder %s9005_s6, 0 }
 0x1be   : > { %s7019_s20 = scalar_lea.hbm %s8896_s18, 8192  ;;  %p7020_p5 = scmp.lt.u32.totalorder %s7815_s9, %s8896_s18 }
 0x1bf   : > { %p7017_p8 = pnand %p7015_p2, %p9033_p1  ;;  %p7021_p10 = scmp.lt.u32.totalorder %s7019_s20, %s7014_s13 }
 0x1c0   : > { %p7023_p0 = scmp.lt.u32.totalorder %s7014_s13, %s7815_s9 }
 0x1c1   : > { %p7018_p13 = pneg %p7017_p8  ;;  %p7022_p11 = por %p7021_p10, %p7020_p5 }
 0x1c3   : > { %p7024_p4 = por %p7023_p0, %p7022_p11 }
 0x1c5   : > { %p7025_p9 = pnand %p7024_p4, %p7018_p13 }
 0x1c7   : > { %7028 = shalt.err (!%p7025_p9)
}
 0x1c8   : > { %s7029_s3 = scalar_lea.vmem %s7840_s8, 4096  ;;  %s7238_s21 = smov [#allocation19]  }
 0x1c9   : > { %p7030_p12 = scmp.ne.s32.totalorder %s7840_s8, %s7029_s3  ;;  %s7034_s30 = sshll.u32 %s7238_s21, 4  ;;  %s7035_s30 = int_to_ptr.vmem [resolvable:$false] %s7034_s30 }
 0x1ca   : > { %s7036_s14 = scalar_lea.vmem %s7035_s30, 8192  ;;  %p7037_p8 = scmp.lt.s32.totalorder %s7840_s8, %s7035_s30 }
 0x1cb   : > { %p7032_p7 = pnand %p7030_p12, %p9033_p1  ;;  %p7038_p6 = scmp.lt.s32.totalorder %s7036_s14, %s7029_s3 }
 0x1cd   : > { %p7033_p2 = pneg %p7032_p7  ;;  %p7039_p5 = por %p7038_p6, %p7037_p8 }
 0x1cf   : > { %p7040_p10 = pnand %p7039_p5, %p7033_p2 }
 0x1d1   : > { %7043 = shalt.err (!%p7040_p10)
}
 0x1d2   : > { %p9034_p13 = scmp.ne.s32.totalorder %s9003_s11, 0  ;;  %s9035_s24 = sld [smem:[#allocation59_spill]] }
 0x1d4   : > { %6204 = dma.hbm_to_vmem [thread:$0]  (!%p9034_p13), %s7815_s9, 4096, %s7840_s8, %s7508_s22, %s9011_s0, %s9011_s0, %s9010_s25  }
 0x1d8   : > { %s7044_s28 = scalar_lea.hbm %s9035_s24, 16 }
 0x1d9   : > { %p7045_p6 = scmp.ne.s32.totalorder %s9035_s24, %s7044_s28  ;;  %p7051_p4 = scmp.lt.u32.totalorder %s7044_s28, %s9035_s24 }
 0x1db   : > { %p7047_p11 = pnand %p7045_p6, %p9025_p3 }
 0x1dd   : > { %p7048_p0 = pneg %p7047_p11 }
 0x1df   : > { %p7053_p9 = pnand %p7051_p4, %p7048_p0 }
 0x1e1   : > { %7056 = shalt.err (!%p7053_p9)
}
 0x1e2   : > { %s7057_s2 = scalar_lea.vmem %s772_s4, 16  ;;  %s7064_s25 = scalar_lea.vmem %s772_s4, 32 }
 0x1e3   : > { %p7058_p12 = scmp.ne.s32.totalorder %s772_s4, %s7057_s2  ;;  %p7065_p8 = scmp.lt.s32.totalorder %s772_s4, %s772_s4 }
 0x1e4   : > { %p7066_p5 = scmp.lt.s32.totalorder %s7064_s25, %s7057_s2 }
 0x1e5   : > { %p7060_p7 = pnand %p7058_p12, %p9025_p3 }
 0x1e6   : > { %p7067_p10 = por %p7066_p5, %p7065_p8 }
 0x1e7   : > { %p7061_p2 = pneg %p7060_p7 }
 0x1e9   : > { %p7068_p13 = pnand %p7067_p10, %p7061_p2 }
 0x1eb   : > { %7071 = shalt.err (!%p7068_p13)
}
 0x1ec   : > { %p9036_p6 = scmp.ne.s32.totalorder %s8993_s10, 0  ;;  %s7239_s8 = smov [#allocation22]  }
 0x1ed   : > { %s782_s12 = sshll.u32 %s7239_s8, 4  ;;  %s7240_s3 = smov [#allocation25]   ;;  %s783_s12 = int_to_ptr.vmem [resolvable:$true] %s782_s12 }
 0x1ee   : > { %6164 = dma.hbm_to_vmem [thread:$0]  (!%p9036_p6), %s9035_s24, 16, %s772_s4, [#allocation6]  }
 0x1ef   : > { %s815_s21 = sshll.u32 %s7240_s3, 4  ;;  %s9037_s16 = sld [smem:[#allocation60_spill]]  ;;  %s816_s21 = int_to_ptr.vmem [resolvable:$true] %s815_s21 }
 0x1f5   : > { %s7072_s17 = scalar_lea.hbm %s9037_s16, 16 }
 0x1f6   : > { %p7073_p13 = scmp.ne.s32.totalorder %s9037_s16, %s7072_s17  ;;  %p7079_p4 = scmp.lt.u32.totalorder %s7072_s17, %s9037_s16 }
 0x1f8   : > { %p7075_p11 = pnand %p7073_p13, %p9025_p3 }
 0x1fa   : > { %p7076_p0 = pneg %p7075_p11 }
 0x1fc   : > { %p7081_p9 = pnand %p7079_p4, %p7076_p0 }
 0x1fe   : > { %7084 = shalt.err (!%p7081_p9)
}
 0x1ff   : > { %s7085_s4 = scalar_lea.vmem %s783_s12, 16  ;;  %s7092_s20 = scalar_lea.vmem %s783_s12, 32 }
 0x200   : > { %p7086_p12 = scmp.ne.s32.totalorder %s783_s12, %s7085_s4  ;;  %p7093_p8 = scmp.lt.s32.totalorder %s783_s12, %s783_s12 }
 0x201   : > { %p7094_p5 = scmp.lt.s32.totalorder %s7092_s20, %s7085_s4 }
 0x202   : > { %p7088_p7 = pnand %p7086_p12, %p9025_p3 }
 0x203   : > { %p7095_p10 = por %p7094_p5, %p7093_p8 }
 0x204   : > { %p7089_p2 = pneg %p7088_p7 }
 0x206   : > { %p7096_p1 = pnand %p7095_p10, %p7089_p2 }
 0x208   : > { %7099 = shalt.err (!%p7096_p1)
}
 0x209   : > { %6167 = dma.hbm_to_vmem [thread:$0]  (!%p9036_p6), %s9037_s16, 16, %s783_s12, [#allocation9]  }
 0x20a   : > { %s9038_s8 = sld [smem:[#allocation65_spill]] }
 0x210   : > { %s9039_s3 = smov %s9038_s8  ;;  %s7100_s30 = scalar_lea.hbm %s9038_s8, 16 }
 0x211   : > { %p7101_p13 = scmp.ne.s32.totalorder %s9039_s3, %s7100_s30  ;;  %p7107_p1 = scmp.lt.u32.totalorder %s7100_s30, %s9039_s3 }
 0x213   : > { %p7103_p11 = pnand %p7101_p13, %p9025_p3 }
 0x215   : > { %p7104_p0 = pneg %p7103_p11 }
 0x217   : > { %p7109_p4 = pnand %p7107_p1, %p7104_p0 }
 0x219   : > { %7112 = shalt.err (!%p7109_p4)
}
 0x21a   : > { %s7113_s7 = scalar_lea.vmem %s816_s21, 16  ;;  %s7120_s12 = scalar_lea.vmem %s816_s21, 32 }
 0x21b   : > { %p7114_p9 = scmp.ne.s32.totalorder %s816_s21, %s7113_s7  ;;  %p7121_p2 = scmp.lt.s32.totalorder %s816_s21, %s816_s21 }
 0x21c   : > { %p7122_p8 = scmp.lt.s32.totalorder %s7120_s12, %s7113_s7 }
 0x21d   : > { %p7116_p12 = pnand %p7114_p9, %p9025_p3 }
 0x21e   : > { %p7123_p5 = por %p7122_p8, %p7121_p2 }
 0x21f   : > { %p7117_p7 = pneg %p7116_p12 }
 0x221   : > { %p7124_p10 = pnand %p7123_p5, %p7117_p7 }
 0x223   : > { %7127 = shalt.err (!%p7124_p10)
}
 0x224   : > { %6173 = dma.hbm_to_vmem [thread:$0]  (!%p9036_p6), %s9039_s3, 16, %s816_s21, [#allocation24]  }
 0x225   : > { %s9040_s27 = sld [smem:[#allocation58_spill]]  ;;  %s1023_s0 = scalar_lea.vmem [#allocation20], %s7481_s19 }
 0x226   : > { %s1030_s9 = sshll.u32 %s1023_s0, 4  ;;  %p9041_p13 = scmp.ne.s32.totalorder %s9005_s6, 0  ;;  %s1031_s9 = int_to_ptr.vmem [resolvable:$true] %s1030_s9 }
 0x22b   : > { %s7928_s25 = scalar_lea.hbm %s9040_s27, %s7484_s5  ;;  %s7133_s21 = scalar_lea.hbm %s9040_s27, 32 }
 0x22c   : > { %s7128_s10 = scalar_lea.hbm %s7928_s25, 16  ;;  %p7134_p6 = scmp.lt.u32.totalorder %s7928_s25, %s9040_s27 }
 0x22d   : > { %p7129_p3 = scmp.ne.s32.totalorder %s7928_s25, %s7128_s10  ;;  %p7135_p1 = scmp.lt.u32.totalorder %s7133_s21, %s7128_s10 }
 0x22e   : > { %p7137_p9 = scmp.lt.u32.totalorder %s7128_s10, %s7928_s25 }
 0x22f   : > { %p7131_p11 = pnand %p7129_p3, %p9041_p13  ;;  %p7136_p4 = por %p7135_p1, %p7134_p6 }
 0x231   : > { %p7132_p0 = pneg %p7131_p11  ;;  %p7138_p12 = por %p7137_p9, %p7136_p4 }
 0x233   : > { %p7139_p7 = pnand %p7138_p12, %p7132_p0 }
 0x235   : > { %7142 = shalt.err (!%p7139_p7)
}
 0x236   : > { %s7143_s19 = scalar_lea.vmem %s1031_s9, 16  ;;  %s7241_s5 = smov [#allocation20]  }
 0x237   : > { %p7144_p2 = scmp.ne.s32.totalorder %s1031_s9, %s7143_s19  ;;  %s7148_s28 = sshll.u32 %s7241_s5, 4  ;;  %s7149_s28 = int_to_ptr.vmem [resolvable:$false] %s7148_s28 }
 0x238   : > { %s7150_s13 = scalar_lea.vmem %s7149_s28, 32  ;;  %p7151_p10 = scmp.lt.s32.totalorder %s1031_s9, %s7149_s28 }
 0x239   : > { %p7146_p8 = pnand %p7144_p2, %p9041_p13  ;;  %p7152_p3 = scmp.lt.s32.totalorder %s7150_s13, %s7143_s19 }
 0x23b   : > { %p7147_p5 = pneg %p7146_p8  ;;  %p7153_p11 = por %p7152_p3, %p7151_p10 }
 0x23d   : > { %p7154_p1 = pnand %p7153_p11, %p7147_p5 }
 0x23f   : > { %7157 = shalt.err (!%p7154_p1)
}
 0x240   : > { %p9042_p6 = scmp.ne.s32.totalorder %s9003_s11, 0  ;;  %s9043_s7 = sld [smem:[#allocation36_spill]] }
 0x242   : > { %6207 = dma.hbm_to_vmem [thread:$0]  (!%p9042_p6), %s7928_s25, 16, %s1031_s9, %s7508_s22  }
 0x246   : > { %p9044_p0 = scmp.ne.s32.totalorder %s9043_s7, 0 }
 0x247   : > { %s9045_s6 = sld [smem:[#allocation35_spill]] (!%p9044_p0) }
 0x248   : > { %1039 = sbr.rel (%p9044_p0) target bundleno = 5900 (0x170c), region = 128 }
 0x24d   : > { %p9046_p13 = scmp.eq.s32.totalorder (!%p9044_p0), %s9045_s6, 0 }
 0x24f   : > { %7175 = dma.done.wait (%p9046_p13), [#allocation4], 3072   ;;  %p9047_p4 = pmov %p9046_p13 }
 0x251   : > { %7177 = vsyncadd (%p9047_p4), [#allocation4], 4294964224  ;;  %p9048_p9 = pmov %p9047_p4 }
 0x252   : > { %p9049_p12 = pmov %p9047_p4 }
 0x253   : > { %7179 = dma.done.wait (%p9048_p9), [#allocation6], 3120  }
 0x254   : > { %7181 = vsyncadd (%p9049_p12), [#allocation6], 4294964176  ;;  %p9050_p7 = pmov %p9047_p4 }
 0x255   : > { %p9051_p2 = pmov %p9047_p4 }
 0x256   : > { %7183 = dma.done.wait (%p9050_p7), [#allocation9], 48  }
 0x257   : > { %7185 = vsyncadd (%p9051_p2), [#allocation9], 4294967248  ;;  %s9052_s22 = sld [smem:[#allocation33_spill]]  ;;  %s9053_s11 = sld [smem:[#allocation39_spill]] }
 0x258   : > { %s1057_s12 = sand.u32 1, %s9045_s6  }
 0x259   : > { %s1058_s4 = scalar_lea.sflag [#allocation4], %s1057_s12 }
 0x25d   : > { %s7965_s23 = sand.u32 1, %s9052_s22   ;;  %p9054_p8 = scmp.ne.s32.totalorder %s9053_s11, 0 }
 0x25e   : > { %s1060_s20 = scalar_lea.vmem [#allocation10], %s7965_s23 }
 0x25f   : > { %7187 = dma.done.wait (%p9054_p8), %s1058_s4, 9424  }
 0x260   : > { %7189 = vsyncadd (%p9054_p8), %s1058_s4, 4294957872  ;;  %s6093_s2 = smul.u32 3, %s7965_s23  ;;  %s5313_s25 = sshll.u32 %s7965_s23, 6 }
 0x261   : > { %s5314_s0 = sshll.u32 %s7965_s23, 8  ;;  %s5315_s9 = sshll.u32 %s7965_s23, 2 }
 0x262   : > { %s1068_s10 = scalar_lea.vmem [#allocation11], %s7965_s23  ;;  %s7977_s8 = scalar_lea.vmem [#allocation12], %s6093_s2 }
 0x263   : > { %s7979_s30 = scalar_lea.vmem [#allocation13], %s5313_s25  ;;  %s1094_s21 = scalar_lea.vmem [#allocation14], %s7965_s23 }
 0x264   : > { %s1102_s14 = scalar_lea.vmem [#allocation15], %s7965_s23  ;;  %s1110_s17 = scalar_lea.vmem [#allocation16], %s7965_s23 }
 0x265   : > { %s7984_s19 = scalar_lea.vmem [#allocation17], %s5314_s0  ;;  %s7986_s5 = scalar_lea.vmem [#allocation18], %s5315_s9 }
 0x266   : > { %s7988_s28 = scalar_lea.vmem [#allocation19], %s5314_s0  ;;  %s1145_s13 = scalar_lea.vmem [#allocation20], %s7965_s23 }
 0x267   : > { %p9055_p5 = pmov %p9051_p2 }
 0x268   : > { %p9056_p10 = pmov %p9051_p2 }
 0x269   : > { %7191 = dma.done.wait (%p9055_p5), [#allocation6], 16  }
 0x26a   : > { %7193 = vsyncadd (%p9056_p10), [#allocation6], 4294967280  ;;  %p9057_p3 = pmov %p9051_p2 }
 0x26b   : > { %p9058_p11 = pmov %p9051_p2 }
 0x26c   : > { %7195 = dma.done.wait (%p9057_p3), [#allocation9], 16  }
 0x26d   : > { %7197 = vsyncadd (%p9058_p11), [#allocation9], 4294967280  ;;  %p9059_p1 = pmov %p9051_p2 }
 0x26f   : > { %7199 = dma.done.wait (%p9059_p1), [#allocation24], 1040   ;;  %p9060_p6 = pmov %p9059_p1 }
 0x270   : > { %p1276_p0 = scmp.lt.s32.totalorder %s9045_s6, 1  ;;  %s9061_s4 = sld [smem:[#allocation50_spill]] }
 0x271   : > { %7201 = vsyncadd (%p9060_p6), [#allocation24], 4294966256  ;;  %p9062_p13 = scmp.ne.s32.totalorder %s9045_s6, 0 }
 0x272   : > { %s1277_s7 = scalar_select %p1276_p0, %s9045_s6, 1 }
 0x273   : > { %1285 = sbr.rel (%p9062_p13) target bundleno = 1165 (0x48d), region = 208  ;;  %v6282_v0 = vld [vmem:[#allocation3] sm:$0xff] (!%p9062_p13)   ;;  %v7242_v1 = vmov (!%p9062_p13), 0.0   ;;  %v6283_v2 = vld [vmem:[#allocation3 + $0x8] sm:$0xff] (!%p9062_p13)   ;;  %vm7243_vm0 = vmmov (!%p9062_p13), 0   ;;  %v6284_v3 = vld [vmem:[#allocation3 + $0x10] sm:$0xff] (!%p9062_p13)  }
 0x274   : > { %s6094_s22 = smul.u32 192, %s1277_s7  ;;  %5755 = vmatprep.subr.bf16.mxu0 (!%p9062_p13), %v7242_v1  ;;  %5775 = vmatprep.subr.bf16.mxu1 (!%p9062_p13), %v7242_v1  ;;  %v6285_v4 = vld [vmem:[#allocation3 + $0x18] sm:$0xff] (!%p9062_p13)   ;;  %v6286_v5 = vld [vmem:[#allocation3 + $0x20] sm:$0xff] (!%p9062_p13)   ;;  %v6287_v6 = vld [vmem:[#allocation3 + $0x28] sm:$0xff] (!%p9062_p13)   ;;  %s9063_s0 = sld [smem:[#allocation40_spill]] (!%p9062_p13)  ;;  %v7244_v43 = vmov (!%p9062_p13), 0  }
 0x275   : > { %5756 = vmatpush3.bf16.msra.mxu0 (!%p9062_p13), %v6282_v0  ;;  %5771 = vmatprep.mubr.msk.bf16.mxu0 (!%p9062_p13), %vm7243_vm0, %v7242_v1  ;;  %v6288_v7 = vld [vmem:[#allocation3 + $0x30] sm:$0xff] (!%p9062_p13)   ;;  %v6289_v8 = vld [vmem:[#allocation3 + $0x38] sm:$0xff] (!%p9062_p13)   ;;  %v6306_v11 = vld [vmem:[#allocation7] sm:$0xff] (!%p9062_p13)   ;;  %s9064_s12 = sld [smem:[#allocation45_spill]] (!%p9062_p13)  ;;  %s9065_s7 = sld [smem:[#allocation46_spill]] (!%p9062_p13) }
 0x276   : > { %s8008_s2 = scalar_lea.vmem %s9061_s4, %s6094_s22  ;;  %5757 = vmatprep.subr.bf16.mxu0 (!%p9062_p13), %v7242_v1  ;;  %5791 = vmatprep.mubr.msk.bf16.mxu1 (!%p9062_p13), %vm7243_vm0, %v7242_v1  ;;  %v6307_v12 = vld [vmem:[#allocation7 + $0x8] sm:$0xff] (!%p9062_p13)   ;;  %v6290_v14 = vld [vmem:[#allocation3 + $0x40] sm:$0xff] (!%p9062_p13)   ;;  %v6308_v16 = vld [vmem:[#allocation7 + $0x10] sm:$0xff] (!%p9062_p13)  }
 0x277   : > { %5776 = vmatpush3.bf16.msra.mxu1 (!%p9062_p13), %v6306_v11  ;;  %v6291_v15 = vld [vmem:[#allocation3 + $0x48] sm:$0xff] (!%p9062_p13)   ;;  %v6309_v17 = vld [vmem:[#allocation7 + $0x18] sm:$0xff] (!%p9062_p13)   ;;  %v6292_v18 = vld [vmem:[#allocation3 + $0x50] sm:$0xff] (!%p9062_p13)   ;;  %6280 = vset.pattern.permute.xlu0 (!%p9062_p13), %v7244_v43 }
 0x278   : > { %5777 = vmatprep.subr.bf16.mxu1 (!%p9062_p13), %v7242_v1  ;;  %v6310_v19 = vld [vmem:[#allocation7 + $0x20] sm:$0xff] (!%p9062_p13)   ;;  %v6293_v20 = vld [vmem:[#allocation3 + $0x58] sm:$0xff] (!%p9062_p13)   ;;  %v6311_v21 = vld [vmem:[#allocation7 + $0x28] sm:$0xff] (!%p9062_p13)   ;;  %6281 = vset.pattern.permute.xlu1 (!%p9062_p13), %v7244_v43 }
 0x279   : > { %5758 = vmatpush3.bf16.msra.mxu0 (!%p9062_p13), %v6283_v2  ;;  %v6294_v22 = vld [vmem:[#allocation3 + $0x60] sm:$0xff] (!%p9062_p13)   ;;  %v6295_v23 = vld [vmem:[#allocation3 + $0x68] sm:$0xff] (!%p9062_p13)   ;;  %v6296_v24 = vld [vmem:[#allocation3 + $0x70] sm:$0xff] (!%p9062_p13)  }
 0x27a   : > { %5759 = vmatprep.subr.bf16.mxu0 %v7242_v1  ;;  %v1292_v9 = vld [vmem:[%s9063_s0] sm:$0xff]  ;;  %v1293_v10 = vld [vmem:[%s9063_s0 + $0x8] sm:$0xff]  ;;  %v5341_v26 = vld [vmem:[%s9063_s0 + $0x10] sm:$0xff] }
 0x27b   : > { %v1294_v13 = vpack.c.bf16 %v1293_v10, %v1292_v9  ;;  %5778 = vmatpush3.bf16.msra.mxu1 %v6307_v12  ;;  %v6297_v25 = vld [vmem:[#allocation3 + $0x78] sm:$0xff]   ;;  %v5342_v27 = vld [vmem:[%s9063_s0 + $0x18] sm:$0xff]  ;;  %v6298_v29 = vld [vmem:[#allocation3 + $0x80] sm:$0xff]   ;;  %s9066_s22 = smov %s9065_s7 }
 0x27c   : > { %5779 = vmatprep.subr.bf16.mxu1 %v7242_v1  ;;  %v1545_v28 = vpack.c.bf16 %v5342_v27, %v5341_v26  ;;  %v6299_v30 = vld [vmem:[#allocation3 + $0x88] sm:$0xff]   ;;  %v6300_v31 = vld [vmem:[#allocation3 + $0x90] sm:$0xff]   ;;  %v6301_v32 = vld [vmem:[#allocation3 + $0x98] sm:$0xff]  }
 0x27d   : > { %5760 = vmatpush3.bf16.msra.mxu0 %v6284_v3  ;;  %v6302_v33 = vld [vmem:[#allocation3 + $0xa0] sm:$0xff]   ;;  %v6303_v34 = vld [vmem:[#allocation3 + $0xa8] sm:$0xff]   ;;  %v6304_v35 = vld [vmem:[#allocation3 + $0xb0] sm:$0xff]  }
 0x27e   : > { %5761 = vmatprep.subr.bf16.mxu0 %v7242_v1  ;;  %v6305_v36 = vld [vmem:[#allocation3 + $0xb8] sm:$0xff]   ;;  %v5363_v37 = vld [vmem:[%s9063_s0 + $0x20] sm:$0xff]  ;;  %v5323_v45 = vld [vmem:[#allocation5] ss:$0 sm:$0xff] }
 0x27f   : > { %5780 = vmatpush3.bf16.msra.mxu1 %v6308_v16  ;;  %v5364_v38 = vld [vmem:[%s9063_s0 + $0x28] sm:$0xff]  ;;  %v1522_v42 = vld [vmem:[%s9064_s12] sm:$0xff]  ;;  %v6314_v54 = vld [vmem:[#allocation7 + $0x40] sm:$0xff]  }
 0x280   : > { %5781 = vmatprep.subr.bf16.mxu1 %v7242_v1  ;;  %v1801_v39 = vpack.c.bf16 %v5364_v38, %v5363_v37  ;;  %v6312_v40 = vld [vmem:[#allocation7 + $0x30] sm:$0xff]   ;;  %v6313_v41 = vld [vmem:[#allocation7 + $0x38] sm:$0xff]   ;;  %1526 = vperm.xlu0 %6280, %v1522_v42   ;;  %v6315_v56 = vld [vmem:[#allocation7 + $0x48] sm:$0xff]  }
 0x281   : > { %5762 = vmatpush3.bf16.msra.mxu0 %v6285_v4  ;;  %1781 = vperm.xlu1 %6281, %v1522_v42   ;;  %v1523_v44 = vld [vmem:[%s9064_s12 + $0x8] sm:$0xff]  ;;  %v6318_v59 = vld [vmem:[#allocation7 + $0x60] sm:$0xff]   ;;  %v6319_v60 = vld [vmem:[#allocation7 + $0x68] sm:$0xff]  }
 0x282   : > { %5763 = vmatprep.subr.bf16.mxu0 %v7242_v1  ;;  %v6316_v57 = vld [vmem:[#allocation7 + $0x50] sm:$0xff]   ;;  %v6317_v58 = vld [vmem:[#allocation7 + $0x58] sm:$0xff]   ;;  %v6322_v9 = vld [vmem:[#allocation7 + $0x80] sm:$0xff]  }
 0x283   : > { %5782 = vmatpush3.bf16.msra.mxu1 %v6309_v17  ;;  %v5343_v61 = vld [vmem:[#allocation5 + $0x1] ss:$0 sm:$0xff]  ;;  %v6320_v62 = vld [vmem:[#allocation7 + $0x70] sm:$0xff]   ;;  %v6323_v11 = vld [vmem:[#allocation7 + $0x88] sm:$0xff]  }
 0x284   : > { %5783 = vmatprep.subr.bf16.mxu1 %v7242_v1  ;;  %1531 = vperm.xlu0 %6280, %v1523_v44   ;;  %v6321_v4 = vld [vmem:[#allocation7 + $0x78] sm:$0xff]   ;;  %v6324_v12 = vld [vmem:[#allocation7 + $0x90] sm:$0xff]   ;;  %v5352_v43 = vld [vmem:[#allocation8 + $0x1] ss:$0 sm:$0xff] }
 0x285   : > { %5764 = vmatpush3.bf16.msra.mxu0 %v6286_v5  ;;  %1786 = vperm.xlu1 %6281, %v1523_v44   ;;  %v5365_v16 = vld [vmem:[#allocation5 + $0x2] ss:$0 sm:$0xff]  ;;  %v6328_v17 = vld [vmem:[#allocation7 + $0xb0] sm:$0xff]  }
 0x286   : > { %5765 = vmatprep.subr.bf16.mxu0 %v7242_v1 }
 0x287   : > { %5784 = vmatpush3.bf16.msra.mxu1 %v6310_v19 }
 0x288   : > { %5785 = vmatprep.subr.bf16.mxu1 %v7242_v1  ;;  %2037 = vperm.xlu0 %6280, %v1522_v42  }
 0x289   : > { %5766 = vmatpush3.bf16.msra.mxu0 %v6287_v6  ;;  %2042 = vperm.xlu1 %6281, %v1523_v44  }
 0x28a   : > { %5767 = vmatprep.subr.bf16.mxu0 %v7242_v1 }
 0x28b   : > { %5786 = vmatpush3.bf16.msra.mxu1 %v6311_v21 }
 0x28c   : > { %5787 = vmatprep.subr.bf16.mxu1 %v7242_v1 }
 0x28d   : > { %5768 = vmatpush3.bf16.msra.mxu0 %v6288_v7 }
 0x28e   : > { %5769 = vmatprep.subr.bf16.mxu0 %v7242_v1 }
 0x28f   : > { %5788 = vmatpush3.bf16.msra.mxu1 %v6312_v40 }
 0x290   : > { %5789 = vmatprep.subr.bf16.mxu1 %v7242_v1 }
 0x291   : > { %5770 = vmatpush3.bf16.msra.mxu0 %v6289_v8 }
 0x292   : > { %5795 = vmatprep.subr.bf16.mxu0 %v7242_v1 }
 0x293   : > { %5790 = vmatpush3.bf16.msra.mxu1 %v6313_v41 }
 0x294   : > { %5772 = vmatmul.mubr.bf16.vlgmr.msra.gmra.mrb[0].mxu0 %v1294_v13  ;;  %5815 = vmatprep.subr.bf16.mxu1 %v7242_v1  ;;  %v6325_v13 = vld [vmem:[#allocation7 + $0x98] sm:$0xff]  }
 0x295   : > { %5796 = vmatpush3.bf16.msra.mxu0 %v6290_v14  ;;  %5811 = vmatprep.mubr.msk.bf16.mxu0 %vm7243_vm0, %v7242_v1  ;;  %v6326_v14 = vld [vmem:[#allocation7 + $0xa0] sm:$0xff]  }
 0x296   : > { %5797 = vmatprep.subr.bf16.mxu0 %v7242_v1 }
 0x299   : > { %5798 = vmatpush3.bf16.msra.mxu0 %v6291_v15  ;;  %v6327_v15 = vld [vmem:[#allocation7 + $0xa8] sm:$0xff]  }
 0x29a   : > { %5799 = vmatprep.subr.bf16.mxu0 %v7242_v1 }
 0x29d   : > { %5800 = vmatpush3.bf16.msra.mxu0 %v6292_v18 }
 0x29e   : > { %5801 = vmatprep.subr.bf16.mxu0 %v7242_v1 }
 0x2a1   : > { %5802 = vmatpush3.bf16.msra.mxu0 %v6293_v20 }
 0x2a2   : > { %5803 = vmatprep.subr.bf16.mxu0 %v7242_v1 }
 0x2a5   : > { %5804 = vmatpush3.bf16.msra.mxu0 %v6294_v22  ;;  %v6329_v22 = vld [vmem:[#allocation7 + $0xb8] sm:$0xff]  }
 0x2a6   : > { %5805 = vmatprep.subr.bf16.mxu0 %v7242_v1 }
 0x2a9   : > { %5806 = vmatpush3.bf16.msra.mxu0 %v6295_v23 }
 0x2aa   : > { %5807 = vmatprep.subr.bf16.mxu0 %v7242_v1 }
 0x2ad   : > { %5808 = vmatpush3.bf16.msra.mxu0 %v6296_v24 }
 0x2ae   : > { %5809 = vmatprep.subr.bf16.mxu0 %v7242_v1 }
 0x2b1   : > { %5810 = vmatpush3.bf16.msra.mxu0 %v6297_v25 }
 0x2b2   : > { %5835 = vmatprep.subr.bf16.mxu0 %v7242_v1 }
 0x2b4   : > { %5812 = vmatmul.mubr.bf16.vlgmr.msra.gmra.mrb[4].mxu0 %v1545_v28 }
 0x2b5   : > { %5836 = vmatpush3.bf16.msra.mxu0 %v6298_v29  ;;  %5851 = vmatprep.mubr.msk.bf16.mxu0 %vm7243_vm0, %v7242_v1  ;;  %v5332_v29 = vld [vmem:[#allocation8] ss:$0 sm:$0xff] }
 0x2b6   : > { %5837 = vmatprep.subr.bf16.mxu0 %v7242_v1 }
 0x2b9   : > { %5838 = vmatpush3.bf16.msra.mxu0 %v6299_v30 }
 0x2ba   : > { %5839 = vmatprep.subr.bf16.mxu0 %v7242_v1 }
 0x2bd   : > { %5840 = vmatpush3.bf16.msra.mxu0 %v6300_v31 }
 0x2be   : > { %5841 = vmatprep.subr.bf16.mxu0 %v7242_v1 }
 0x2c1   : > { %5842 = vmatpush3.bf16.msra.mxu0 %v6301_v32 }
 0x2c2   : > { %5843 = vmatprep.subr.bf16.mxu0 %v7242_v1 }
 0x2c5   : > { %5844 = vmatpush3.bf16.msra.mxu0 %v6302_v33  ;;  %v1536_v33 = vld [vmem:[%s9065_s7] sm:$0xff] }
 0x2c6   : > { %5845 = vmatprep.subr.bf16.mxu0 %v7242_v1 }
 0x2c9   : > { %5846 = vmatpush3.bf16.msra.mxu0 %v6303_v34 }
 0x2ca   : > { %5847 = vmatprep.subr.bf16.mxu0 %v7242_v1 }
 0x2cd   : > { %5848 = vmatpush3.bf16.msra.mxu0 %v6304_v35 }
 0x2ce   : > { %5849 = vmatprep.subr.bf16.mxu0 %v7242_v1 }
 0x2d1   : > { %5850 = vmatpush3.bf16.msra.mxu0 %v6305_v36 }
 0x2d4   : > { %5852 = vmatmul.mubr.bf16.vlgmr.msra.gmra.mrb[8].mxu0 %v1801_v39 }
 0x2ff   : > { %v1527_v28 = vpop.permute.xlu0 %1526 }
 0x300   : > { %v1782_v42 = vpop.permute.xlu1 %1781 }
 0x303   : > { %v1532_v35 = vpop.permute.xlu0 %1531 }
 0x367   : > { %v1400_v46 = vpop.f32.mrb[0].mxu0 }
 0x368   : > { %v1401_v47 = vadd.f32 %v5323_v45, %v1400_v46  ;;  %v5773_v48 = vpop.f32.mrb[1].mxu0 }
 0x369   : > { %v1403_v49 = vpop.f32.mrb[2].mxu0 }
 0x36a   : > { %v1407_v50 = vmax.f32 %v1401_v47, 0.0  ;;  %v1404_v51 = vadd.f32 %v5323_v45, %v1403_v49  ;;  %v5774_v52 = vpop.f32.mrb[3].mxu0  ;;  %v5361_v47 = vld [vmem:[%s9066_s22 + $0x10] sm:$0xff]  ;;  %v1787_v49 = vpop.permute.xlu1 %1786 }
 0x36c   : > { %v1408_v53 = vmax.f32 %v1404_v51, 0.0 }
 0x36e   : > { %v1409_v55 = vpack.c.bf16 %v1408_v53, %v1407_v50  ;;  %v5362_v53 = vld [vmem:[%s9066_s22 + $0x18] sm:$0xff] }
 0x370   : > { %5792 = vmatmul.mubr.bf16.vlgmr.msra.gmra.mrb[0].mxu1 %v1409_v55 }
 0x371   : > { %5816 = vmatpush3.bf16.msra.mxu1 %v6314_v54  ;;  %5831 = vmatprep.mubr.msk.bf16.mxu1 %vm7243_vm0, %v7242_v1 }
 0x372   : > { %5817 = vmatprep.subr.bf16.mxu1 %v7242_v1 }
 0x375   : > { %5818 = vmatpush3.bf16.msra.mxu1 %v6315_v56 }
 0x376   : > { %5819 = vmatprep.subr.bf16.mxu1 %v7242_v1 }
 0x379   : > { %5820 = vmatpush3.bf16.msra.mxu1 %v6316_v57  ;;  %v5374_v57 = vld [vmem:[#allocation8 + $0x2] ss:$0 sm:$0xff] }
 0x37a   : > { %5821 = vmatprep.subr.bf16.mxu1 %v7242_v1 }
 0x37d   : > { %5822 = vmatpush3.bf16.msra.mxu1 %v6317_v58 }
 0x37e   : > { %5823 = vmatprep.subr.bf16.mxu1 %v7242_v1 }
 0x381   : > { %5824 = vmatpush3.bf16.msra.mxu1 %v6318_v59 }
 0x382   : > { %5825 = vmatprep.subr.bf16.mxu1 %v7242_v1 }
 0x385   : > { %5826 = vmatpush3.bf16.msra.mxu1 %v6319_v60 }
 0x386   : > { %5827 = vmatprep.subr.bf16.mxu1 %v7242_v1 }
 0x387   : > { %v1653_v63 = vpop.f32.mrb[4].mxu0 }
 0x388   : > { %v1654_v0 = vadd.f32 %v5343_v61, %v1653_v63  ;;  %v5813_v2 = vpop.f32.mrb[5].mxu0 }
 0x389   : > { %v1656_v3 = vpop.f32.mrb[6].mxu0  ;;  %5828 = vmatpush3.bf16.msra.mxu1 %v6320_v62  ;;  %v5383_v62 = vld [vmem:[%s9066_s22 + $0x20] sm:$0xff] }
 0x38a   : > { %v1660_v5 = vmax.f32 %v1654_v0, 0.0  ;;  %v1657_v6 = vadd.f32 %v5343_v61, %v1656_v3  ;;  %v5814_v7 = vpop.f32.mrb[7].mxu0  ;;  %5829 = vmatprep.subr.bf16.mxu1 %v7242_v1  ;;  %v2038_v61 = vpop.permute.xlu0 %2037 }
 0x38c   : > { %v1661_v8 = vmax.f32 %v1657_v6, 0.0 }
 0x38d   : > { %5830 = vmatpush3.bf16.msra.mxu1 %v6321_v4  ;;  %v2043_v4 = vpop.permute.xlu1 %2042 }
 0x38e   : > { %v1662_v10 = vpack.c.bf16 %v1661_v8, %v1660_v5  ;;  %5855 = vmatprep.subr.bf16.mxu1 %v7242_v1  ;;  %v5384_v5 = vld [vmem:[%s9066_s22 + $0x28] sm:$0xff] }
 0x390   : > { %5832 = vmatmul.mubr.bf16.vlgmr.msra.gmra.mrb[4].mxu1 %v1662_v10 }
 0x391   : > { %5856 = vmatpush3.bf16.msra.mxu1 %v6322_v9  ;;  %5871 = vmatprep.mubr.msk.bf16.mxu1 %vm7243_vm0, %v7242_v1 }
 0x392   : > { %5857 = vmatprep.subr.bf16.mxu1 %v7242_v1 }
 0x395   : > { %5858 = vmatpush3.bf16.msra.mxu1 %v6323_v11 }
 0x396   : > { %5859 = vmatprep.subr.bf16.mxu1 %v7242_v1 }
 0x399   : > { %5860 = vmatpush3.bf16.msra.mxu1 %v6324_v12 }
 0x39a   : > { %5861 = vmatprep.subr.bf16.mxu1 %v7242_v1 }
 0x39d   : > { %5862 = vmatpush3.bf16.msra.mxu1 %v6325_v13 }
 0x39e   : > { %5863 = vmatprep.subr.bf16.mxu1 %v7242_v1 }
 0x3a1   : > { %5864 = vmatpush3.bf16.msra.mxu1 %v6326_v14 }
 0x3a2   : > { %5865 = vmatprep.subr.bf16.mxu1 %v7242_v1 }
 0x3a5   : > { %5866 = vmatpush3.bf16.msra.mxu1 %v6327_v15 }
 0x3a6   : > { %5867 = vmatprep.subr.bf16.mxu1 %v7242_v1 }
 0x3a7   : > { %v1909_v18 = vpop.f32.mrb[8].mxu0 }
 0x3a8   : > { %v1910_v19 = vadd.f32 %v5365_v16, %v1909_v18  ;;  %v5853_v20 = vpop.f32.mrb[9].mxu0 }
 0x3a9   : > { %v1912_v21 = vpop.f32.mrb[10].mxu0  ;;  %5868 = vmatpush3.bf16.msra.mxu1 %v6328_v17 }
 0x3aa   : > { %v1913_v23 = vadd.f32 %v5365_v16, %v1912_v21  ;;  %v5854_v24 = vpop.f32.mrb[11].mxu0  ;;  %5869 = vmatprep.subr.bf16.mxu1 %v7242_v1  ;;  %v1916_v25 = vmax.f32 %v1910_v19, 0.0  ;;  %v1537_v1 = vld [vmem:[%s9066_s22 + $0x8] sm:$0xff] }
 0x3ac   : > { %v1917_v26 = vmax.f32 %v1913_v23, 0.0 }
 0x3ad   : > { %5870 = vmatpush3.bf16.msra.mxu1 %v6329_v22 }
 0x3ae   : > { %v1918_v27 = vpack.c.bf16 %v1917_v26, %v1916_v25 }
 0x3b0   : > { %5872 = vmatmul.mubr.bf16.vlgmr.msra.gmra.mrb[8].mxu1 %v1918_v27 }
 0x443   : > { %v1515_v30 = vpop.f32.mrb[0].mxu1 }
 0x444   : > { %v1516_v31 = vadd.f32 %v5332_v29, %v1515_v30  ;;  %v5793_v32 = vpop.f32.mrb[1].mxu1 }
 0x445   : > { %v1518_v34 = vpop.f32.mrb[2].mxu1 }
 0x446   : > { %v1534_v36 = vadd.f32 %v1527_v28, %v1516_v31  ;;  %v1519_v37 = vadd.f32 %v5332_v29, %v1518_v34  ;;  %v5794_v38 = vpop.f32.mrb[3].mxu1 }
 0x448   : > { %v1538_v39 = vadd.f32 %v1536_v33, %v1534_v36  ;;  %v1535_v40 = vadd.f32 %v1532_v35, %v1519_v37 }
 0x44a   : > { %1540 = vst [vmem:[#allocation2] sm:$0xff] %v1538_v39  ;;  %v1539_v41 = vadd.f32 %v1537_v1, %v1535_v40 }
 0x44c   : > { %1541 = vst [vmem:[#allocation2 + $0x18] sm:$0xff] %v1539_v41 }
 0x463   : > { %v1770_v44 = vpop.f32.mrb[4].mxu1 }
 0x464   : > { %v1771_v45 = vadd.f32 %v5352_v43, %v1770_v44  ;;  %v5833_v46 = vpop.f32.mrb[5].mxu1 }
 0x465   : > { %v1773_v48 = vpop.f32.mrb[6].mxu1 }
 0x466   : > { %v1789_v50 = vadd.f32 %v1782_v42, %v1771_v45  ;;  %v1774_v51 = vadd.f32 %v5352_v43, %v1773_v48  ;;  %v5834_v52 = vpop.f32.mrb[7].mxu1 }
 0x468   : > { %v1794_v54 = vadd.f32 %v5361_v47, %v1789_v50  ;;  %v1790_v55 = vadd.f32 %v1787_v49, %v1774_v51 }
 0x46a   : > { %1796 = vst [vmem:[#allocation2 + $0x8] sm:$0xff] %v1794_v54  ;;  %v1795_v56 = vadd.f32 %v5362_v53, %v1790_v55 }
 0x46c   : > { %1797 = vst [vmem:[#allocation2 + $0x20] sm:$0xff] %v1795_v56 }
 0x483   : > { %v2026_v58 = vpop.f32.mrb[8].mxu1 }
 0x484   : > { %v2027_v59 = vadd.f32 %v5374_v57, %v2026_v58  ;;  %v5873_v60 = vpop.f32.mrb[9].mxu1 }
 0x485   : > { %v2029_v63 = vpop.f32.mrb[10].mxu1 }
 0x486   : > { %v2045_v0 = vadd.f32 %v2038_v61, %v2027_v59  ;;  %v2030_v2 = vadd.f32 %v5374_v57, %v2029_v63  ;;  %v5874_v3 = vpop.f32.mrb[11].mxu1 }
 0x488   : > { %v2050_v6 = vadd.f32 %v5383_v62, %v2045_v0  ;;  %v2046_v7 = vadd.f32 %v2043_v4, %v2030_v2 }
 0x48a   : > { %2052 = vst [vmem:[#allocation2 + $0x10] sm:$0xff] %v2050_v6  ;;  %v2051_v8 = vadd.f32 %v5384_v5, %v2046_v7 }
 0x48c   : > { %2053 = vst [vmem:[#allocation2 + $0x28] sm:$0xff] %v2051_v8 }
 0x48d PF: > { %v2054_v9 = vld [vmem:[#allocation2] sm:$0xff]  ;;  %v2055_v11 = vld [vmem:[#allocation2 + $0x8] sm:$0xff]  ;;  %v2057_v12 = vld [vmem:[#allocation2 + $0x18] sm:$0xff]  ;;  %v7245_v15 = vmov 0.0   ;;  %v7246_v55 = vmov 0   ;;  %vm7247_vm1 = vmmov 0  }
 0x48e   : > { %2062 = vadd.xlane.f32.xlu0 %v2054_v9  ;;  %v6330_v13 = vld [vmem:[%s8008_s2 + $0x4] ss:$12 sps:$4 sm:$0xff]   ;;  %v6332_v14 = vld [vmem:[%s8008_s2] ss:$12 sps:$4 sm:$0xff]   ;;  %5875 = vmatprep.subr.bf16.mxu1 %v7245_v15  ;;  %v6333_v16 = vld [vmem:[%s8008_s2 + $0x8] ss:$12 sps:$4 sm:$0xff]  }
 0x48f   : > { %v6334_v17 = vld [vmem:[%s8008_s2 + $0x1c] ss:$12 sps:$4 sm:$0xff]   ;;  %2333 = vmatprep.subr.bf16.mxu0 %v6330_v13  ;;  %5876 = vmatpush3.bf16.msra.mxu1 %v6333_v16  ;;  %v8136_v34 = vld [vmem:[#allocation2 + $0x20] sm:$0xff]  ;;  %v6342_v40 = vld [vmem:[%s8008_s2 + $0x4c] ss:$12 sps:$4 sm:$0xff]   ;;  %vm2476_vm2 = vcmask 523264  }
 0x490   : > { %2334 = vmatpush1.bf16.msra.mxu0 %v6332_v14  ;;  %5877 = vmatprep.subr.bf16.mxu1 %v7245_v15  ;;  %v6336_v36 = vld [vmem:[%s8008_s2 + $0x18] ss:$12 sps:$4 sm:$0xff]   ;;  %v6337_v37 = vld [vmem:[%s8008_s2 + $0x20] ss:$12 sps:$4 sm:$0xff]   ;;  %v6340_v1 = vld [vmem:[%s8008_s2 + $0x30] ss:$12 sps:$4 sm:$0xff]  }
 0x491   : > { %v2056_v10 = vld [vmem:[#allocation2 + $0x10] sm:$0xff]  ;;  %2335 = vmatprep.subr.bf16.mxu0 %v6334_v17  ;;  %v6341_v39 = vld [vmem:[%s8008_s2 + $0x38] ss:$12 sps:$4 sm:$0xff]   ;;  %v6348_v44 = vld [vmem:[%s8008_s2 + $0x60] ss:$12 sps:$4 sm:$0xff]   ;;  %2365 = vmatprep.mubr.bf16.mxu0 %v7246_v55  ;;  %vm2587_vm3 = vcmask 1043456  }
 0x492   : > { %2066 = vadd.xlane.f32.xlu1 %v2056_v10  ;;  %2064 = vadd.xlane.f32.xlu0 %v2055_v11  ;;  %v6338_v38 = vld [vmem:[%s8008_s2 + $0x34] ss:$12 sps:$4 sm:$0xff]   ;;  %v6345_v42 = vld [vmem:[%s8008_s2 + $0x50] ss:$12 sps:$4 sm:$0xff]   ;;  %v6352_v47 = vld [vmem:[%s8008_s2 + $0x78] ss:$12 sps:$4 sm:$0xff]  }
 0x493   : > { %v8139_v35 = vld [vmem:[#allocation2 + $0x28] sm:$0xff]  ;;  %5878 = vmatpush3.bf16.msra.mxu1 %v6337_v37  ;;  %v6346_v43 = vld [vmem:[%s8008_s2 + $0x64] ss:$12 sps:$4 sm:$0xff]   ;;  %v6354_v49 = vld [vmem:[%s8008_s2 + $0x94] ss:$12 sps:$4 sm:$0xff]   ;;  %5891 = vmatprep.mubr.msk.bf16.mxu1 %vm7247_vm1, %v7245_v15  ;;  %vm2543_vm4 = vcmask 195584  }
 0x494   : > { %2336 = vmatpush1.bf16.msra.mxu0 %v6336_v36  ;;  %5879 = vmatprep.subr.bf16.mxu1 %v7245_v15  ;;  %v6344_v41 = vld [vmem:[%s8008_s2 + $0x48] ss:$12 sps:$4 sm:$0xff]   ;;  %v6353_v48 = vld [vmem:[%s8008_s2 + $0x80] ss:$12 sps:$4 sm:$0xff]   ;;  %v6356_v50 = vld [vmem:[%s8008_s2 + $0x90] ss:$12 sps:$4 sm:$0xff]  }
 0x495   : > { %2337 = vmatprep.subr.bf16.mxu0 %v6338_v38  ;;  %v6349_v45 = vld [vmem:[%s8008_s2 + $0x68] ss:$12 sps:$4 sm:$0xff]   ;;  %v6357_v51 = vld [vmem:[%s8008_s2 + $0x98] ss:$12 sps:$4 sm:$0xff]   ;;  %v6361_v54 = vld [vmem:[%s8008_s2 + $0xb0] ss:$12 sps:$4 sm:$0xff]  }
 0x496   : > { %2068 = vadd.xlane.f32.xlu1 %v2057_v12  ;;  %v6350_v46 = vld [vmem:[%s8008_s2 + $0x7c] ss:$12 sps:$4 sm:$0xff]   ;;  %v6358_v52 = vld [vmem:[%s8008_s2 + $0xac] ss:$12 sps:$4 sm:$0xff]   ;;  %v5385_v16 = vld [vmem:[%s1060_s20] ss:$0 sm:$0xff] }
 0x497   : > { %5880 = vmatpush3.bf16.msra.mxu1 %v6341_v39  ;;  %v6360_v53 = vld [vmem:[%s8008_s2 + $0xa8] ss:$12 sps:$4 sm:$0xff]   ;;  %s7248_s20 = smov 64   ;;  %s9067_s2 = sld [smem:[#allocation47_spill]] }
 0x498   : > { %2338 = vmatpush1.bf16.msra.mxu0 %v6340_v1  ;;  %5881 = vmatprep.subr.bf16.mxu1 %v7245_v15  ;;  %s9068_s23 = sld [smem:[#allocation35_spill]] }
 0x499   : > { %2339 = vmatprep.subr.bf16.mxu0 %v6342_v40 }
 0x49b   : > { %5882 = vmatpush3.bf16.msra.mxu1 %v6345_v42 }
 0x49c   : > { %2340 = vmatpush1.bf16.msra.mxu0 %v6344_v41  ;;  %5883 = vmatprep.subr.bf16.mxu1 %v7245_v15 }
 0x49d   : > { %2341 = vmatprep.subr.bf16.mxu0 %v6346_v43 }
 0x49e   : > { %p5511_p4 = scmp.ne.s32.totalorder %s9068_s23, 1 }
 0x49f   : > { %5884 = vmatpush3.bf16.msra.mxu1 %v6349_v45  ;;  %vm7250_vm5 = vmmov (!%p5511_p4), 0   ;;  %s9072_s6 = sld [smem:[#allocation66_spill]] (!%p5511_p4) }
 0x4a0   : > { %2342 = vmatpush1.bf16.msra.mxu0 %v6348_v44  ;;  %5885 = vmatprep.subr.bf16.mxu1 %v7245_v15 }
 0x4a1   : > { %2343 = vmatprep.subr.bf16.mxu0 %v6350_v46 }
 0x4a3   : > { %5886 = vmatpush3.bf16.msra.mxu1 %v6353_v48 }
 0x4a4   : > { %2344 = vmatpush1.bf16.msra.mxu0 %v6352_v47  ;;  %5887 = vmatprep.subr.bf16.mxu1 %v7245_v15 }
 0x4a5   : > { %2345 = vmatprep.subr.bf16.mxu0 %v6354_v49 }
 0x4a7   : > { %5888 = vmatpush3.bf16.msra.mxu1 %v6357_v51  ;;  %v2188_v51 = vld [vmem:[%s7977_s8] sm:$0x7] }
 0x4a8   : > { %2346 = vmatpush1.bf16.msra.mxu0 %v6356_v50  ;;  %5889 = vmatprep.subr.bf16.mxu1 %v7245_v15 }
 0x4a9   : > { %2347 = vmatprep.subr.bf16.mxu0 %v6358_v52 }
 0x4ab   : > { %5890 = vmatpush3.bf16.msra.mxu1 %v6361_v54 }
 0x4ac   : > { %2348 = vmatpush1.bf16.msra.mxu0 %v6360_v53 }
 0x51b   : > { %v2063_v18 = vpop.xlane.xlu0 %2062 }
 0x51c   : > { %v2075_v20 = vmul.f32 0.0078125, %v2063_v18 }
 0x51e   : > { %v8120_v22 = vsub.f32 %v2054_v9, %v2075_v20 }
 0x51f   : > { %v2067_v19 = vpop.xlane.xlu1 %2066  ;;  %v2065_v24 = vpop.xlane.xlu0 %2064 }
 0x520   : > { %v2077_v21 = vmul.f32 0.0078125, %v2067_v19  ;;  %v2076_v26 = vmul.f32 0.0078125, %v2065_v24  ;;  %v2087_v27 = vmul.f32 %v8120_v22, %v8120_v22 }
 0x522   : > { %v8122_v23 = vsub.f32 %v2056_v10, %v2077_v21  ;;  %v8126_v29 = vsub.f32 %v2055_v11, %v2076_v26  ;;  %2093 = vadd.xlane.f32.xlu0 %v2087_v27  ;;  %v5386_v21 = vld [vmem:[%s1068_s10] ss:$0 sm:$0xff] }
 0x523   : > { %v2069_v25 = vpop.xlane.xlu1 %2068 }
 0x524   : > { %v2078_v28 = vmul.f32 0.0078125, %v2069_v25  ;;  %v2089_v31 = vmul.f32 %v8122_v23, %v8122_v23  ;;  %v2088_v32 = vmul.f32 %v8126_v29, %v8126_v29 }
 0x526   : > { %v8128_v30 = vsub.f32 %v2057_v12, %v2078_v28  ;;  %2097 = vadd.xlane.f32.xlu0 %v2089_v31  ;;  %2095 = vadd.xlane.f32.xlu1 %v2088_v32 }
 0x528   : > { %v2090_v33 = vmul.f32 %v8128_v30, %v8128_v30 }
 0x52a   : > { %2099 = vadd.xlane.f32.xlu1 %v2090_v33  ;;  %2070 = vadd.xlane.f32.xlu0 %v8136_v34 }
 0x52e   : > { %2072 = vadd.xlane.f32.xlu1 %v8139_v35 }
 0x5af   : > { %v2094_v56 = vpop.xlane.xlu0 %2093 }
 0x5b0   : > { %v2105_v57 = vmul.f32 0.0078125, %v2094_v56 }
 0x5b2   : > { %v2111_v58 = vadd.f32 1e-05, %v2105_v57 }
 0x5b3   : > { %v2096_v59 = vpop.xlane.xlu1 %2095  ;;  %v2098_v60 = vpop.xlane.xlu0 %2097 }
 0x5b4   : > { %6450 = vrsqrt.f32 %v2111_v58  ;;  %v2106_v61 = vmul.f32 0.0078125, %v2096_v59  ;;  %v2107_v62 = vmul.f32 0.0078125, %v2098_v60 }
 0x5b6   : > { %v2112_v63 = vadd.f32 1e-05, %v2106_v61  ;;  %v2113_v0 = vadd.f32 1e-05, %v2107_v62 }
 0x5b7   : > { %v2100_v2 = vpop.xlane.xlu1 %2099  ;;  %v2071_v3 = vpop.xlane.xlu0 %2070 }
 0x5b8   : > { %6452 = vrsqrt.f32 %v2112_v63  ;;  %v2108_v4 = vmul.f32 0.0078125, %v2100_v2  ;;  %v2079_v5 = vmul.f32 0.0078125, %v2071_v3 }
 0x5b9   : > { %6454 = vrsqrt.f32 %v2113_v0 }
 0x5ba   : > { %v2114_v6 = vadd.f32 1e-05, %v2108_v4  ;;  %v2085_v7 = vsub.f32 %v8136_v34, %v2079_v5 }
 0x5bb   : > { %v2073_v8 = vpop.xlane.xlu1 %2072 }
 0x5bc   : > { %6456 = vrsqrt.f32 %v2114_v6  ;;  %v2080_v9 = vmul.f32 0.0078125, %v2073_v8  ;;  %v2091_v10 = vmul.f32 %v2085_v7, %v2085_v7 }
 0x5be   : > { %v6451_v11 = vpop.eup %6450  ;;  %v2086_v12 = vsub.f32 %v8139_v35, %v2080_v9  ;;  %2101 = vadd.xlane.f32.xlu0 %v2091_v10 }
 0x5bf   : > { %v2123_v13 = vmul.f32 %v6451_v11, %v8120_v22 }
 0x5c0   : > { %v2092_v14 = vmul.f32 %v2086_v12, %v2086_v12 }
 0x5c1   : > { %v2135_v19 = vmul.f32 %v5385_v16, %v2123_v13 }
 0x5c2   : > { %v6453_v17 = vpop.eup %6452  ;;  %2103 = vadd.xlane.f32.xlu1 %v2092_v14 }
 0x5c3   : > { %v2124_v18 = vmul.f32 %v6453_v17, %v8126_v29  ;;  %v6455_v20 = vpop.eup %6454  ;;  %v2147_v26 = vadd.f32 %v5386_v21, %v2135_v19 }
 0x5c4   : > { %v2125_v28 = vmul.f32 %v6455_v20, %v8122_v23 }
 0x5c5   : > { %v2136_v24 = vmul.f32 %v5385_v16, %v2124_v18 }
 0x5c6   : > { %v6457_v25 = vpop.eup %6456  ;;  %v2137_v33 = vmul.f32 %v5385_v16, %v2125_v28 }
 0x5c7   : > { %v2148_v27 = vadd.f32 %v5386_v21, %v2136_v24  ;;  %v2126_v31 = vmul.f32 %v6457_v25, %v8128_v30 }
 0x5c8   : > { %v2149_v34 = vadd.f32 %v5386_v21, %v2137_v33 }
 0x5c9   : > { %v2153_v22 = vpack.c.bf16 %v2148_v27, %v2147_v26  ;;  %v2138_v32 = vmul.f32 %v5385_v16, %v2126_v31 }
 0x5cb   : > { %2366 = vmatmul.mubr.bf16.vlgmr.msra.gmra.mrb[0].mxu0 %v2153_v22  ;;  %5892 = vmatmul.mubr.bf16.vlgmr.msra.gmra.mrb[0].mxu1 %v2153_v22  ;;  %v2150_v29 = vadd.f32 %v5386_v21, %v2138_v32 }
 0x5cc   : > { %2375 = vmatprep.mubr.bf16.mxu0 %v7246_v55  ;;  %5895 = vmatprep.mubr.msk.bf16.mxu1 %vm7247_vm1, %v7245_v15 }
 0x5cd   : > { %v2154_v35 = vpack.c.bf16 %v2150_v29, %v2149_v34  ;;  %v8238_v34 = vld [vmem:[%s7979_s30] sm:$0xff]  }
 0x5d3   : > { %2376 = vmatmul.mubr.bf16.gmra.mrb[4].mxu0 %v2154_v35  ;;  %5896 = vmatmul.mubr.bf16.gmra.mrb[4].mxu1 %v2154_v35 }
 0x5d4   : > { %2385 = vmatprep.mubr.bf16.mxu0 %v7246_v55  ;;  %5899 = vmatprep.mubr.msk.bf16.mxu1 %vm7247_vm1, %v7245_v15  ;;  %v2190_v15 = vlaneseq }
 0x5d6   : > { %v8187_v48 = vshrl.u32 %v2190_v15, 7 }
 0x5d8   : > { %v2192_v49 = vsub.s32 0, %v8187_v48  ;;  %v2200_v50 = vsub.s32 2, %v8187_v48  ;;  %v2196_v52 = vsub.s32 1, %v8187_v48 }
 0x5da   : > { %v8195_v53 = vrot.slane %v2188_v51, %v2192_v49  ;;  %v8199_v54 = vrot.slane %v2188_v51, %v2200_v50  ;;  %v8203_v58 = vrot.slane %v2188_v51, %v2196_v52 }
 0x64b   : > { %v2102_v23 = vpop.xlane.xlu0 %2101 }
 0x64c   : > { %v2109_v30 = vmul.f32 0.0078125, %v2102_v23 }
 0x64e   : > { %v2115_v36 = vadd.f32 1e-05, %v2109_v30  ;;  %v8244_v30 = vld [vmem:[%s7979_s30 + $0x8] sm:$0xff]  }
 0x64f   : > { %v2104_v37 = vpop.xlane.xlu1 %2103 }
 0x650   : > { %v2110_v38 = vmul.f32 0.0078125, %v2104_v37  ;;  %6458 = vrsqrt.f32 %v2115_v36  ;;  %v8250_v37 = vld [vmem:[%s7979_s30 + $0x10] sm:$0xff]  }
 0x652   : > { %v2116_v1 = vadd.f32 1e-05, %v2110_v38  ;;  %v8255_v38 = vld [vmem:[%s7979_s30 + $0x18] sm:$0xff]  }
 0x654   : > { %6460 = vrsqrt.f32 %v2116_v1 }
 0x65a   : > { %v6459_v39 = vpop.eup %6458 }
 0x65b   : > { %v2127_v40 = vmul.f32 %v6459_v39, %v2085_v7 }
 0x65d   : > { %v2139_v41 = vmul.f32 %v5385_v16, %v2127_v40 }
 0x65e   : > { %v6461_v42 = vpop.eup %6460 }
 0x65f   : > { %v2128_v43 = vmul.f32 %v6461_v42, %v2086_v12  ;;  %v2151_v45 = vadd.f32 %v5386_v21, %v2139_v41 }
 0x661   : > { %v2140_v44 = vmul.f32 %v5385_v16, %v2128_v43 }
 0x663   : > { %v2152_v46 = vadd.f32 %v5386_v21, %v2140_v44 }
 0x665   : > { %v2155_v47 = vpack.c.bf16 %v2152_v46, %v2151_v45 }
 0x667   : > { %2386 = vmatmul.mubr.bf16.gmra.mrb[8].mxu0 %v2155_v47  ;;  %5900 = vmatmul.mubr.bf16.gmra.mrb[8].mxu1 %v2155_v47 }
 0x69e   : > { %v2367_v56 = vpop.f32.mrb[0].mxu0  ;;  %v2430_v57 = vpop.f32.mrb[0].mxu1 }
 0x69f   : > { %v2369_v59 = vpop.f32.mrb[1].mxu0  ;;  %v5893_v60 = vpop.f32.mrb[1].mxu1  ;;  %v2368_v63 = vadd.f32 %v2367_v56, %v8195_v53  ;;  %v2431_v0 = vadd.f32 %v2430_v57, %v8199_v54 }
 0x6a0   : > { %v2371_v61 = vpop.f32.mrb[2].mxu0  ;;  %v2433_v62 = vpop.f32.mrb[2].mxu1  ;;  %v2370_v6 = vadd.f32 %v2369_v59, %v8203_v58 }
 0x6a1   : > { %v2372_v2 = vadd.f32 %v2371_v61, %v8195_v53  ;;  %v2434_v3 = vadd.f32 %v2433_v62, %v8199_v54  ;;  %v2373_v4 = vpop.f32.mrb[3].mxu0  ;;  %v5894_v5 = vpop.f32.mrb[3].mxu1 }
 0x6a2   : > { %v2374_v7 = vadd.f32 %v2373_v4, %v8203_v58 }
 0x6a3   : > { %v2472_v8 = vpack.c.bf16 %v2372_v2, %v2368_v63  ;;  %v8211_v9 = vpack.c.bf16 %v2434_v3, %v2431_v0  ;;  %v8282_v0 = vld [vmem:[%s9067_s2] sm:$0xff] }
 0x6a4   : > { %v2474_v10 = vpack.c.bf16 %v2374_v7, %v2370_v6  ;;  %v8287_v6 = vld [vmem:[%s9067_s2 + $0x8] sm:$0xff]  ;;  %v8292_v7 = vld [vmem:[%s9067_s2 + $0x10] sm:$0xff] }
 0x6a5   : > { %5907 = vmatprep.mubr.msk.bf16.mxu0 %vm2476_vm2, %v2472_v8  ;;  %5911 = vmatprep.subr.bf16.mxu1 %v8211_v9 }
 0x6a6   : > { %v2377_v11 = vpop.f32.mrb[4].mxu0  ;;  %v2438_v12 = vpop.f32.mrb[4].mxu1  ;;  %6079 = vmatprep.subr.msk.bf16.mxu0 %vm2476_vm2, %v2474_v10  ;;  %5912 = vmatpush3.bf16.msra.mxu1 %v8211_v9  ;;  %v2484_v13 = vsel %vm2476_vm2, %v2474_v10, 0 }
 0x6a7   : > { %v2439_v14 = vadd.f32 %v2438_v12, %v8199_v54  ;;  %2649 = vrot.lane.b32.xlu0 %v2474_v10, %s7248_s20  ;;  %v2379_v16 = vpop.f32.mrb[5].mxu0  ;;  %v5897_v17 = vpop.f32.mrb[5].mxu1  ;;  %5904 = vmatpush3.bf16.xpose.msra.mxu0 %v2484_v13  ;;  %v2378_v28 = vadd.f32 %v2377_v11, %v8195_v53 }
 0x6a8   : > { %v2380_v18 = vadd.f32 %v2379_v16, %v8203_v58  ;;  %v2381_v19 = vpop.f32.mrb[6].mxu0  ;;  %v2441_v20 = vpop.f32.mrb[6].mxu1 }
 0x6a9   : > { %v8221_v21 = vpack.c.bf16 %v2439_v14, %v2439_v14  ;;  %v2383_v24 = vpop.f32.mrb[7].mxu0  ;;  %v5898_v25 = vpop.f32.mrb[7].mxu1  ;;  %v2473_v22 = vpack.c.bf16 %v2378_v28, %v2378_v28  ;;  %v2382_v40 = vadd.f32 %v2381_v19, %v8195_v53  ;;  %v2442_v41 = vadd.f32 %v2441_v20, %v8199_v54 }
 0x6aa   : > { %v2475_v26 = vpack.c.bf16 %v2380_v18, %v2380_v18  ;;  %v2384_v46 = vadd.f32 %v2383_v24, %v8203_v58 }
 0x6ab   : > { %6081 = vmatprep.subr.msk.bf16.mxu1 %vm2587_vm3, %v8221_v21  ;;  %v2589_v27 = vsel %vm2587_vm3, %v8221_v21, 0 }
 0x6ac   : > { %5914 = vmatpush3.bf16.msra.mxu1 %v2589_v27  ;;  %2651 = vrot.lane.b32.xlu1 %v2475_v26, %s7248_s20  ;;  %v2487_v31 = vsel %vm2476_vm2, %v2475_v26, 0 }
 0x6ad   : > { %6080 = vmatprep.subr.msk.bf16.mxu0 %vm2476_vm2, %v2475_v26 }
 0x6af   : > { %5906 = vmatpush3.bf16.xpose.msra.mxu0 %v2487_v31 }
 0x6b0   : > { %2643 = vrot.lane.b32.xlu1 %v2472_v8, %s7248_s20 }
 0x6b4   : > { %2645 = vrot.lane.b32.xlu1 %v2473_v22, %s7248_s20 }
 0x6b6   : > { %5908 = vmatmul.mubr.msk.bf16.vlgmr.msra.gmra.mrb[12].mxu0 %vm2476_vm2, %v2473_v22 }
 0x719   : > { %v2650_v32 = vpop.permute.xlu0 %2649 }
 0x71a   : > { %v2660_v33 = vsel %vm2476_vm2, %v2650_v32, 0  ;;  %6082 = vmatprep.subr.msk.bf16.mxu0 %vm2476_vm2, %v2650_v32 }
 0x71b   : > { %5920 = vmatpush3.bf16.xpose.msra.mxu0 %v2660_v33 }
 0x71e   : > { %v2652_v29 = vpop.permute.xlu1 %2651 }
 0x71f   : > { %6083 = vmatprep.subr.msk.bf16.mxu0 %vm2476_vm2, %v2652_v29  ;;  %v2663_v35 = vsel %vm2476_vm2, %v2652_v29, 0 }
 0x722   : > { %v2644_v23 = vpop.permute.xlu1 %2643 }
 0x723   : > { %5922 = vmatpush3.bf16.xpose.msra.mxu0 %v2663_v35  ;;  %5923 = vmatprep.mubr.msk.bf16.mxu0 %vm2476_vm2, %v2644_v23 }
 0x724   : > { %5947 = vmatprep.subr.bf16.mxu0 %v8238_v34 }
 0x726   : > { %v2646_v36 = vpop.permute.xlu1 %2645 }
 0x72a   : > { %5924 = vmatmul.mubr.msk.bf16.vlgmr.msra.gmra.mrb[16].mxu0 %vm2476_vm2, %v2646_v36 }
 0x72b   : > { %5948 = vmatpush3.bf16.msra.mxu0 %v8238_v34 }
 0x72c   : > { %5949 = vmatprep.subr.bf16.mxu0 %v8244_v30 }
 0x72f   : > { %5950 = vmatpush3.bf16.msra.mxu0 %v8244_v30 }
 0x730   : > { %5951 = vmatprep.subr.bf16.mxu0 %v8250_v37 }
 0x733   : > { %5952 = vmatpush3.bf16.msra.mxu0 %v8250_v37 }
 0x734   : > { %5953 = vmatprep.subr.bf16.mxu0 %v8255_v38 }
 0x737   : > { %5954 = vmatpush3.bf16.msra.mxu0 %v8255_v38 }
 0x73a   : > { %v2387_v1 = vpop.f32.mrb[8].mxu0  ;;  %v2446_v39 = vpop.f32.mrb[8].mxu1 }
 0x73b   : > { %v2388_v42 = vadd.f32 %v2387_v1, %v8195_v53  ;;  %v2447_v43 = vadd.f32 %v2446_v39, %v8199_v54  ;;  %v2389_v44 = vpop.f32.mrb[9].mxu0  ;;  %v5901_v45 = vpop.f32.mrb[9].mxu1 }
 0x73c   : > { %v2390_v47 = vadd.f32 %v2389_v44, %v8203_v58  ;;  %v8266_v15 = vpop.f32.mrb[10].mxu0  ;;  %v8268_v51 = vpop.f32.mrb[10].mxu1 }
 0x73d   : > { %v8270_v56 = vpack.c.bf16 %v2388_v42, %v2382_v40  ;;  %v8272_v57 = vpack.c.bf16 %v2447_v43, %v2442_v41  ;;  %v8274_v59 = vpop.f32.mrb[11].mxu0  ;;  %v5902_v60 = vpop.f32.mrb[11].mxu1 }
 0x73e   : > { %v8276_v61 = vpack.c.bf16 %v2390_v47, %v2384_v46 }
 0x73f   : > { %5967 = vmatprep.subr.bf16.mxu0 %v8272_v57 }
 0x789   : > { %v5909_v62 = vpop.f32.mrb[12].mxu0 }
 0x78a   : > { %v2523_v63 = vpop.f32.mrb[13].mxu0  ;;  %v2539_v2 = vmul.f32 0.125, %v5909_v62 }
 0x78b   : > { %v2537_v3 = vmul.f32 0.125, %v2523_v63  ;;  %v5910_v4 = vpop.f32.mrb[14].mxu0 }
 0x78c   : > { %v2526_v5 = vpop.f32.mrb[15].mxu0  ;;  %v2542_v13 = vadd.f32 %v2539_v2, %v8292_v7 }
 0x78d   : > { %v2538_v8 = vmul.f32 0.125, %v2526_v5  ;;  %v2540_v10 = vadd.f32 %v2537_v3, %v8282_v0 }
 0x78e   : > { %v2550_v16 = vsel %vm2543_vm4, %v2542_v13, -inf }
 0x78f   : > { %v2544_v11 = vsel %vm2543_vm4, %v2540_v10, -inf  ;;  %v2541_v12 = vadd.f32 %v2538_v8, %v8287_v6 }
 0x790   : > { %2545 = vmax.xlane.f32.xlu0 %v2544_v11 }
 0x791   : > { %v2547_v14 = vsel %vm2543_vm4, %v2541_v12, -inf }
 0x792   : > { %2548 = vmax.xlane.f32.xlu1 %v2547_v14 }
 0x794   : > { %2551 = vmax.xlane.f32.xlu0 %v2550_v16 }
 0x7fd   : > { %v5925_v17 = vpop.f32.mrb[16].mxu0 }
 0x7fe   : > { %v2715_v18 = vmul.f32 0.125, %v5925_v17  ;;  %v2699_v19 = vpop.f32.mrb[17].mxu0 }
 0x7ff   : > { %v2713_v20 = vmul.f32 0.125, %v2699_v19  ;;  %v5926_v24 = vpop.f32.mrb[18].mxu0 }
 0x800   : > { %v2702_v25 = vpop.f32.mrb[19].mxu0  ;;  %v2718_v26 = vadd.f32 %v2715_v18, %v8292_v7 }
 0x801   : > { %v2714_v27 = vmul.f32 0.125, %v2702_v25  ;;  %v2716_v28 = vadd.f32 %v2713_v20, %v8282_v0 }
 0x802   : > { %v2725_v31 = vsel %vm2543_vm4, %v2718_v26, -inf }
 0x803   : > { %2726 = vmax.xlane.f32.xlu1 %v2725_v31  ;;  %v2719_v22 = vsel %vm2543_vm4, %v2716_v28, -inf  ;;  %v2717_v32 = vadd.f32 %v2714_v27, %v8287_v6 }
 0x804   : > { %2720 = vmax.xlane.f32.xlu0 %v2719_v22 }
 0x805   : > { %v2722_v33 = vsel %vm2543_vm4, %v2717_v32, -inf }
 0x808   : > { %2723 = vmax.xlane.f32.xlu0 %v2722_v33 }
 0x81d   : > { %v2546_v29 = vpop.xlane.xlu0 %2545 }
 0x81e   : > { %v2553_v23 = vsub.f32 %v2540_v10, %v2546_v29 }
 0x81f   : > { %v2549_v35 = vpop.xlane.xlu1 %2548 }
 0x820   : > { %v2554_v36 = vsub.f32 %v2541_v12, %v2549_v35  ;;  %v2556_v41 = vmul.f32 1.442695, %v2553_v23 }
 0x821   : > { %v2552_v1 = vpop.xlane.xlu0 %2551 }
 0x822   : > { %v2558_v39 = vmul.f32 1.442695, %v2554_v36  ;;  %v2555_v40 = vsub.f32 %v2542_v13, %v2552_v1  ;;  %v8320_v36 = vld [vmem:[%s7979_s30 + $0x20] sm:$0xff]  }
 0x824   : > { %6462 = vpow2.f32 %v2558_v39  ;;  %v2560_v42 = vmul.f32 1.442695, %v2555_v40 }
 0x826   : > { %6464 = vpow2.f32 %v2560_v42 }
 0x827   : > { %6466 = vpow2.f32 %v2556_v41 }
 0x82e   : > { %v6463_v43 = vpop.eup %6462 }
 0x82f   : > { %v2565_v44 = vsel %vm2543_vm4, %v6463_v43, 0.0 }
 0x830   : > { %v6465_v45 = vpop.eup %6464  ;;  %2566 = vadd.xlane.f32.xlu1 %v2565_v44 }
 0x831   : > { %v2568_v46 = vsel %vm2543_vm4, %v6465_v45, 0.0  ;;  %v6467_v47 = vpop.eup %6466 }
 0x832   : > { %2569 = vadd.xlane.f32.xlu0 %v2568_v46  ;;  %v2562_v60 = vsel %vm2543_vm4, %v6467_v47, 0.0 }
 0x836   : > { %2563 = vadd.xlane.f32.xlu0 %v2562_v60  ;;  %v8332_v60 = vld [vmem:[%s7979_s30 + $0x30] sm:$0xff]  }
 0x890   : > { %v2727_v62 = vpop.xlane.xlu1 %2726 }
 0x891   : > { %v2730_v63 = vsub.f32 %v2718_v26, %v2727_v62  ;;  %v2721_v2 = vpop.xlane.xlu0 %2720  ;;  %v8337_v62 = vld [vmem:[%s7979_s30 + $0x38] sm:$0xff]  }
 0x892   : > { %v2728_v3 = vsub.f32 %v2716_v28, %v2721_v2 }
 0x893   : > { %v2735_v4 = vmul.f32 1.442695, %v2730_v63 }
 0x894   : > { %v2731_v5 = vmul.f32 1.442695, %v2728_v3 }
 0x895   : > { %6468 = vpow2.f32 %v2735_v4  ;;  %v2724_v8 = vpop.xlane.xlu0 %2723  ;;  %v2450_v4 = vadd.f32 %v8268_v51, %v8199_v54 }
 0x896   : > { %v2729_v10 = vsub.f32 %v2717_v32, %v2724_v8  ;;  %6470 = vpow2.f32 %v2731_v5 }
 0x898   : > { %v2733_v11 = vmul.f32 1.442695, %v2729_v10 }
 0x89a   : > { %6472 = vpow2.f32 %v2733_v11  ;;  %v8347_v11 = vpack.c.bf16 %v2450_v4, %v2450_v4 }
 0x89f   : > { %v6469_v12 = vpop.eup %6468 }
 0x8a0   : > { %v2743_v13 = vsel %vm2543_vm4, %v6469_v12, 0.0  ;;  %v6471_v14 = vpop.eup %6470 }
 0x8a1   : > { %2744 = vadd.xlane.f32.xlu1 %v2743_v13  ;;  %v2737_v17 = vsel %vm2543_vm4, %v6471_v14, 0.0 }
 0x8a4   : > { %v6473_v16 = vpop.eup %6472 }
 0x8a5   : > { %2738 = vadd.xlane.f32.xlu1 %v2737_v17  ;;  %v2740_v18 = vsel %vm2543_vm4, %v6473_v16, 0.0 }
 0x8a6   : > { %2741 = vadd.xlane.f32.xlu0 %v2740_v18 }
 0x8b6   : > { %2758 = vrot.lane.b32.xlu1 %v8221_v21, %s7248_s20 }
 0x8bc   : > { %2756 = vrot.lane.b32.xlu0 %v8211_v9, %s7248_s20 }
 0x8bd   : > { %v2567_v19 = vpop.xlane.xlu1 %2566 }
 0x8bf   : > { %v2570_v20 = vpop.xlane.xlu0 %2569 }
 0x8c0   : > { %6474 = vrcp.f32 %v2570_v20  ;;  %v2987_v20 = vsel %vm2476_vm2, %v8276_v61, 0 }
 0x8c1   : > { %6476 = vrcp.f32 %v2567_v19 }
 0x8c3   : > { %v2564_v24 = vpop.xlane.xlu0 %2563 }
 0x8c4   : > { %6478 = vrcp.f32 %v2564_v24 }
 0x8ca   : > { %v6475_v25 = vpop.eup %6474 }
 0x8cb   : > { %v6477_v26 = vpop.eup %6476  ;;  %v2576_v28 = vmul.f32 %v6475_v25, %v6465_v45 }
 0x8cc   : > { %v2575_v22 = vmul.f32 %v6477_v26, %v6463_v43 }
 0x8cd   : > { %v2578_v33 = vpack.c.bf16 %v2576_v28, %v2576_v28 }
 0x8ce   : > { %v6479_v27 = vpop.eup %6478 }
 0x8cf   : > { %v2574_v31 = vmul.f32 %v6479_v27, %v6467_v47  ;;  %v8325_v47 = vld [vmem:[%s7979_s30 + $0x28] sm:$0xff]  }
 0x8d1   : > { %v2577_v32 = vpack.c.bf16 %v2575_v22, %v2574_v31 }
 0x8d3   : > { %5915 = vmatprep.mubr.msk.bf16.mxu1 %vm2543_vm4, %v2577_v32 }
 0x8d4   : > { %5916 = vmatmul.mubr.msk.bf16.vlgmr.msra.gmra.mrb[12].mxu1 %vm2543_vm4, %v2578_v33 }
 0x92e   : > { %v2745_v9 = vpop.xlane.xlu1 %2744 }
 0x92f   : > { %6480 = vrcp.f32 %v2745_v9 }
 0x932   : > { %v2739_v21 = vpop.xlane.xlu1 %2738 }
 0x933   : > { %6482 = vrcp.f32 %v2739_v21  ;;  %v2742_v29 = vpop.xlane.xlu0 %2741 }
 0x934   : > { %6484 = vrcp.f32 %v2742_v29 }
 0x936   : > { %v2759_v23 = vpop.permute.xlu1 %2758 }
 0x937   : > { %v2757_v35 = vpop.permute.xlu0 %2756  ;;  %v2768_v39 = vsel %vm2587_vm3, %v2759_v23, 0 }
 0x938   : > { %5927 = vmatprep.subr.bf16.mxu1 %v2757_v35 }
 0x939   : > { %5928 = vmatpush3.bf16.msra.mxu1 %v2757_v35  ;;  %v6481_v1 = vpop.eup %6480 }
 0x93a   : > { %6084 = vmatprep.subr.msk.bf16.mxu1 %vm2587_vm3, %v2759_v23  ;;  %v2751_v42 = vmul.f32 %v6481_v1, %v6469_v12  ;;  %v3090_v12 = vsel %vm2587_vm3, %v8347_v11, 0 }
 0x93c   : > { %v2753_v46 = vpack.c.bf16 %v2751_v42, %v2751_v42 }
 0x93d   : > { %v6483_v40 = vpop.eup %6482  ;;  %5930 = vmatpush3.bf16.msra.mxu1 %v2768_v39 }
 0x93e   : > { %v6485_v41 = vpop.eup %6484  ;;  %v2749_v43 = vmul.f32 %v6483_v40, %v6471_v14  ;;  %5935 = vmatprep.subr.bf16.mxu1 %v8320_v36  ;;  %v2394_v14 = vadd.f32 %v8274_v59, %v8203_v58  ;;  %v2392_v58 = vadd.f32 %v8266_v15, %v8195_v53 }
 0x93f   : > { %v2750_v44 = vmul.f32 %v6485_v41, %v6473_v16 }
 0x940   : > { %v2979_v19 = vpack.c.bf16 %v2394_v14, %v2394_v14  ;;  %v2977_v59 = vpack.c.bf16 %v2392_v58, %v2392_v58 }
 0x941   : > { %v2752_v45 = vpack.c.bf16 %v2750_v44, %v2749_v43 }
 0x942   : > { %v2990_v24 = vsel %vm2476_vm2, %v2979_v19, 0 }
 0x943   : > { %5931 = vmatprep.mubr.msk.bf16.mxu1 %vm2543_vm4, %v2752_v45 }
 0x944   : > { %5932 = vmatmul.mubr.msk.bf16.vlgmr.msra.gmra.mrb[16].mxu1 %vm2543_vm4, %v2753_v46 }
 0x945   : > { %5936 = vmatpush3.bf16.msra.mxu1 %v8320_v36 }
 0x946   : > { %5937 = vmatprep.subr.bf16.mxu1 %v8325_v47 }
 0x949   : > { %5938 = vmatpush3.bf16.msra.mxu1 %v8325_v47 }
 0x94a   : > { %5939 = vmatprep.subr.bf16.mxu1 %v8332_v60 }
 0x94d   : > { %5940 = vmatpush3.bf16.msra.mxu1 %v8332_v60 }
 0x94e   : > { %5941 = vmatprep.subr.bf16.mxu1 %v8337_v62 }
 0x951   : > { %5942 = vmatpush3.bf16.msra.mxu1 %v8337_v62 }
 0x952   : > { %6085 = vmatprep.subr.msk.bf16.mxu1 %vm2476_vm2, %v8276_v61 }
 0x9a7   : > { %v5917_v63 = vpop.f32.mrb[12].mxu1 }
 0x9a8   : > { %v2625_v2 = vpop.f32.mrb[13].mxu1  ;;  %v2640_v10 = vpack.c.bf16 %v5917_v63, %v5917_v63 }
 0x9a9   : > { %v5918_v3 = vpop.f32.mrb[14].mxu1 }
 0x9aa   : > { %v2628_v5 = vpop.f32.mrb[15].mxu1 }
 0x9ab   : > { %v2639_v8 = vpack.c.bf16 %v2628_v5, %v2625_v2 }
 0x9ad   : > { %5955 = vmatprep.mubr.msk.bf16.mxu0 %vm2476_vm2, %v2639_v8 }
 0x9ae   : > { %5956 = vmatmul.mubr.msk.bf16.vlgmr.msra.gmra.mrb[20].mxu0 %vm2476_vm2, %v2640_v10 }
 0x9af   : > { %5968 = vmatpush3.bf16.msra.mxu0 %v8272_v57 }
 0x9b0   : > { %6087 = vmatprep.subr.msk.bf16.mxu0 %vm2587_vm3, %v8347_v11 }
 0x9b3   : > { %5970 = vmatpush3.bf16.msra.mxu0 %v3090_v12 }
 0xa17   : > { %v5933_v13 = vpop.f32.mrb[16].mxu1 }
 0xa18   : > { %v2804_v54 = vpop.f32.mrb[17].mxu1  ;;  %v2819_v18 = vpack.c.bf16 %v5933_v13, %v5933_v13 }
 0xa19   : > { %v5934_v51 = vpop.f32.mrb[18].mxu1 }
 0xa1a   : > { %v2807_v16 = vpop.f32.mrb[19].mxu1 }
 0xa1b   : > { %v2818_v17 = vpack.c.bf16 %v2807_v16, %v2804_v54 }
 0xa1d   : > { %5943 = vmatprep.mubr.msk.bf16.mxu1 %vm2476_vm2, %v2818_v17 }
 0xa1e   : > { %5944 = vmatmul.mubr.msk.bf16.vlgmr.msra.gmra.mrb[20].mxu1 %vm2476_vm2, %v2819_v18 }
 0xa1f   : > { %5960 = vmatpush3.bf16.xpose.msra.mxu1 %v2987_v20  ;;  %5963 = vmatprep.mubr.msk.bf16.mxu1 %vm2476_vm2, %v8270_v56 }
 0xa20   : > { %6086 = vmatprep.subr.msk.bf16.mxu1 %vm2476_vm2, %v2979_v19 }
 0xa27   : > { %5962 = vmatpush3.bf16.xpose.msra.mxu1 %v2990_v24 }
 0xa2e   : > { %5964 = vmatmul.mubr.msk.bf16.vlgmr.msra.gmra.mrb[24].mxu1 %vm2476_vm2, %v2977_v59 }
 0xa81   : > { %v5957_v25 = vpop.f32.mrb[20].mxu0 }
 0xa82   : > { %v2962_v26 = vpop.f32.mrb[21].mxu0 }
 0xa83   : > { %v5958_v27 = vpop.f32.mrb[22].mxu0 }
 0xa84   : > { %v2965_v28 = vpop.f32.mrb[23].mxu0 }
 0xaf1   : > { %v5945_v31 = vpop.f32.mrb[20].mxu1 }
 0xaf2   : > { %v8368_v22 = vadd.f32 %v5957_v25, %v5945_v31  ;;  %v2884_v32 = vpop.f32.mrb[21].mxu1 }
 0xaf3   : > { %v8370_v33 = vadd.f32 %v2962_v26, %v2884_v32  ;;  %v5946_v9 = vpop.f32.mrb[22].mxu1 }
 0xaf4   : > { %v2887_v21 = vpop.f32.mrb[23].mxu1 }
 0xaf5   : > { %v8372_v29 = vadd.f32 %v2965_v28, %v2887_v21 }
 0xb01   : > { %v5965_v35 = vpop.f32.mrb[24].mxu1 }
 0xb02   : > { %v3026_v23 = vpop.f32.mrb[25].mxu1  ;;  %v3042_v39 = vmul.f32 0.125, %v5965_v35 }
 0xb03   : > { %v3040_v53 = vmul.f32 0.125, %v3026_v23  ;;  %v5966_v15 = vpop.f32.mrb[26].mxu1 }
 0xb04   : > { %v3029_v1 = vpop.f32.mrb[27].mxu1  ;;  %v3045_v45 = vadd.f32 %v3042_v39, %v8292_v7 }
 0xb05   : > { %v3041_v40 = vmul.f32 0.125, %v3029_v1  ;;  %v3043_v41 = vadd.f32 %v3040_v53, %v8282_v0 }
 0xb06   : > { %v3052_v46 = vsel %vm2543_vm4, %v3045_v45, -inf }
 0xb07   : > { %v3046_v42 = vsel %vm2543_vm4, %v3043_v41, -inf  ;;  %v3044_v43 = vadd.f32 %v3041_v40, %v8287_v6 }
 0xb08   : > { %3047 = vmax.xlane.f32.xlu1 %v3046_v42 }
 0xb09   : > { %v3049_v44 = vsel %vm2543_vm4, %v3044_v43, -inf }
 0xb0a   : > { %3050 = vmax.xlane.f32.xlu0 %v3049_v44 }
 0xb0e   : > { %3053 = vmax.xlane.f32.xlu0 %v3052_v46 }
 0xb95   : > { %v3048_v63 = vpop.xlane.xlu1 %3047 }
 0xb96   : > { %v3055_v2 = vsub.f32 %v3043_v41, %v3048_v63 }
 0xb97   : > { %v3051_v3 = vpop.xlane.xlu0 %3050 }
 0xb98   : > { %v3058_v4 = vmul.f32 1.442695, %v3055_v2  ;;  %v3056_v5 = vsub.f32 %v3044_v43, %v3051_v3 }
 0xb9a   : > { %6486 = vpow2.f32 %v3058_v4  ;;  %v3060_v8 = vmul.f32 1.442695, %v3056_v5 }
 0xb9b   : > { %v3054_v10 = vpop.xlane.xlu0 %3053 }
 0xb9c   : > { %6488 = vpow2.f32 %v3060_v8  ;;  %v3057_v12 = vsub.f32 %v3045_v45, %v3054_v10 }
 0xb9e   : > { %v3062_v13 = vmul.f32 1.442695, %v3057_v12 }
 0xba0   : > { %6490 = vpow2.f32 %v3062_v13 }
 0xba4   : > { %v6487_v54 = vpop.eup %6486 }
 0xba5   : > { %v3064_v51 = vsel %vm2543_vm4, %v6487_v54, 0.0 }
 0xba6   : > { %v6489_v14 = vpop.eup %6488  ;;  %3065 = vadd.xlane.f32.xlu1 %v3064_v51 }
 0xba7   : > { %v3067_v16 = vsel %vm2543_vm4, %v6489_v14, 0.0 }
 0xba8   : > { %3068 = vadd.xlane.f32.xlu0 %v3067_v16 }
 0xbaa   : > { %v6491_v17 = vpop.eup %6490 }
 0xbab   : > { %v3070_v18 = vsel %vm2543_vm4, %v6491_v17, 0.0 }
 0xbac   : > { %3071 = vadd.xlane.f32.xlu1 %v3070_v18 }
 0xbbd   : > { %3152 = vrot.lane.b32.xlu1 %v2979_v19, %s7248_s20 }
 0xbbe   : > { %3150 = vrot.lane.b32.xlu0 %v8276_v61, %s7248_s20 }
 0xbc1   : > { %3144 = vrot.lane.b32.xlu1 %v8270_v56, %s7248_s20 }
 0xbc5   : > { %3146 = vrot.lane.b32.xlu1 %v2977_v59, %s7248_s20 }
 0xc33   : > { %v3066_v20 = vpop.xlane.xlu1 %3065 }
 0xc34   : > { %6492 = vrcp.f32 %v3066_v20 }
 0xc35   : > { %v3069_v24 = vpop.xlane.xlu0 %3068 }
 0xc36   : > { %6494 = vrcp.f32 %v3069_v24 }
 0xc39   : > { %v3072_v58 = vpop.xlane.xlu1 %3071  ;;  %v3151_v25 = vpop.permute.xlu0 %3150 }
 0xc3a   : > { %6496 = vrcp.f32 %v3072_v58  ;;  %6088 = vmatprep.subr.msk.bf16.mxu0 %vm2476_vm2, %v3151_v25  ;;  %v3161_v59 = vsel %vm2476_vm2, %v3151_v25, 0 }
 0xc3d   : > { %v3153_v31 = vpop.permute.xlu1 %3152 }
 0xc3e   : > { %v6493_v26 = vpop.eup %6492  ;;  %v3164_v35 = vsel %vm2476_vm2, %v3153_v31, 0 }
 0xc3f   : > { %v3076_v19 = vmul.f32 %v6493_v26, %v6487_v54 }
 0xc40   : > { %v6495_v27 = vpop.eup %6494 }
 0xc41   : > { %v3077_v28 = vmul.f32 %v6495_v27, %v6489_v14  ;;  %v3145_v21 = vpop.permute.xlu1 %3144  ;;  %v8429_v27 = vld [vmem:[%s1094_s21] ss:$0 sm:$0xff] }
 0xc43   : > { %v3079_v61 = vpack.c.bf16 %v3077_v28, %v3076_v19  ;;  %v3436_v19 = vadd.f32 %v8429_v27, %v8370_v33  ;;  %v3437_v28 = vadd.f32 %v8429_v27, %v8372_v29 }
 0xc44   : > { %v6497_v32 = vpop.eup %6496 }
 0xc45   : > { %v3078_v9 = vmul.f32 %v6497_v32, %v6491_v17  ;;  %5971 = vmatprep.mubr.msk.bf16.mxu0 %vm2543_vm4, %v3079_v61  ;;  %v3147_v23 = vpop.permute.xlu1 %3146  ;;  %v6571_v61 = vld [vmem:[#allocation2 + $0x8] sm:$0xff] }
 0xc46   : > { %v8439_v32 = vadd.f32 %v6571_v61, %v3437_v28  ;;  %v6376_v61 = vld [vmem:[%s7984_s19 + $0x20] ss:$16 sps:$4 sm:$0xff]  }
 0xc47   : > { %v3080_v56 = vpack.c.bf16 %v3078_v9, %v3078_v9  ;;  %v6572_v9 = vld [vmem:[#allocation2 + $0x10] sm:$0xff] }
 0xc49   : > { %5972 = vmatmul.mubr.msk.bf16.vlgmr.msra.gmra.mrb[24].mxu0 %vm2543_vm4, %v3080_v56 }
 0xc4a   : > { %5976 = vmatpush3.bf16.xpose.msra.mxu0 %v3161_v59  ;;  %5979 = vmatprep.mubr.msk.bf16.mxu0 %vm2476_vm2, %v3145_v21 }
 0xc4b   : > { %6089 = vmatprep.subr.msk.bf16.mxu0 %vm2476_vm2, %v3153_v31 }
 0xc52   : > { %5978 = vmatpush3.bf16.xpose.msra.mxu0 %v3164_v35 }
 0xc53   : > { %6003 = vmatprep.subr.bf16.mxu0 %v8238_v34 }
 0xc59   : > { %5980 = vmatmul.mubr.msk.bf16.vlgmr.msra.gmra.mrb[28].mxu0 %vm2476_vm2, %v3147_v23 }
 0xc5a   : > { %6004 = vmatpush3.bf16.msra.mxu0 %v8238_v34 }
 0xc5b   : > { %6005 = vmatprep.subr.bf16.mxu0 %v8244_v30 }
 0xc5e   : > { %6006 = vmatpush3.bf16.msra.mxu0 %v8244_v30 }
 0xc5f   : > { %6007 = vmatprep.subr.bf16.mxu0 %v8250_v37 }
 0xc62   : > { %6008 = vmatpush3.bf16.msra.mxu0 %v8250_v37 }
 0xc63   : > { %6009 = vmatprep.subr.bf16.mxu0 %v8255_v38 }
 0xc66   : > { %6010 = vmatpush3.bf16.msra.mxu0 %v8255_v38 }
 0xd1c   : > { %v5973_v53 = vpop.f32.mrb[24].mxu0 }
 0xd1d   : > { %v3126_v15 = vpop.f32.mrb[25].mxu0  ;;  %v3141_v41 = vpack.c.bf16 %v5973_v53, %v5973_v53 }
 0xd1e   : > { %v5974_v1 = vpop.f32.mrb[26].mxu0 }
 0xd1f   : > { %v3129_v39 = vpop.f32.mrb[27].mxu0 }
 0xd20   : > { %v3140_v40 = vpack.c.bf16 %v3129_v39, %v3126_v15 }
 0xd22   : > { %6011 = vmatprep.mubr.msk.bf16.mxu0 %vm2476_vm2, %v3140_v40 }
 0xd23   : > { %6012 = vmatmul.mubr.msk.bf16.vlgmr.msra.gmra.mrb[32].mxu0 %vm2476_vm2, %v3141_v41 }
 0xd24   : > { %3852 = vmatprep.mubr.bf16.mxu0 %v7246_v55 }
 0xd2c   : > { %v5981_v34 = vpop.f32.mrb[28].mxu0 }
 0xd2d   : > { %v3200_v30 = vpop.f32.mrb[29].mxu0  ;;  %v3216_v42 = vmul.f32 0.125, %v5981_v34 }
 0xd2e   : > { %v3214_v37 = vmul.f32 0.125, %v3200_v30  ;;  %v5982_v43 = vpop.f32.mrb[30].mxu0 }
 0xd2f   : > { %v3203_v44 = vpop.f32.mrb[31].mxu0  ;;  %v3219_v2 = vadd.f32 %v3216_v42, %v8292_v7 }
 0xd30   : > { %v3215_v45 = vmul.f32 0.125, %v3203_v44  ;;  %v3217_v38 = vadd.f32 %v3214_v37, %v8282_v0 }
 0xd31   : > { %v3226_v4 = vsel %vm2543_vm4, %v3219_v2, -inf }
 0xd32   : > { %v3220_v46 = vsel %vm2543_vm4, %v3217_v38, -inf  ;;  %v3218_v63 = vadd.f32 %v3215_v45, %v8287_v6  ;;  %v6372_v45 = vld [vmem:[%s7984_s19 + $0x4] ss:$16 sps:$4 sm:$0xff]  }
 0xd33   : > { %3221 = vmax.xlane.f32.xlu0 %v3220_v46 }
 0xd34   : > { %v3223_v3 = vsel %vm2543_vm4, %v3218_v63, -inf }
 0xd35   : > { %3224 = vmax.xlane.f32.xlu1 %v3223_v3 }
 0xd37   : > { %3227 = vmax.xlane.f32.xlu0 %v3226_v4 }
 0xdc0   : > { %v3222_v5 = vpop.xlane.xlu0 %3221 }
 0xdc1   : > { %v3229_v8 = vsub.f32 %v3217_v38, %v3222_v5  ;;  %v6373_v38 = vld [vmem:[%s7984_s19 + $0x8] ss:$16 sps:$4 sm:$0xff]  }
 0xdc2   : > { %v3225_v10 = vpop.xlane.xlu1 %3224 }
 0xdc3   : > { %v3232_v12 = vmul.f32 1.442695, %v3229_v8  ;;  %v3230_v13 = vsub.f32 %v3218_v63, %v3225_v10 }
 0xdc4   : > { %v3228_v54 = vpop.xlane.xlu0 %3227 }
 0xdc5   : > { %6498 = vpow2.f32 %v3232_v12  ;;  %v3234_v0 = vmul.f32 1.442695, %v3230_v13  ;;  %v3231_v51 = vsub.f32 %v3219_v2, %v3228_v54 }
 0xdc7   : > { %6500 = vpow2.f32 %v3234_v0  ;;  %v3236_v6 = vmul.f32 1.442695, %v3231_v51 }
 0xdc9   : > { %6502 = vpow2.f32 %v3236_v6 }
 0xdcf   : > { %v6499_v7 = vpop.eup %6498 }
 0xdd0   : > { %v3238_v14 = vsel %vm2543_vm4, %v6499_v7, 0.0 }
 0xdd1   : > { %v6501_v16 = vpop.eup %6500  ;;  %3239 = vadd.xlane.f32.xlu0 %v3238_v14 }
 0xdd2   : > { %v3241_v20 = vsel %vm2543_vm4, %v6501_v16, 0.0 }
 0xdd3   : > { %v6503_v17 = vpop.eup %6502 }
 0xdd4   : > { %v3244_v18 = vsel %vm2543_vm4, %v6503_v17, 0.0 }
 0xdd5   : > { %3245 = vadd.xlane.f32.xlu1 %v3244_v18  ;;  %3242 = vadd.xlane.f32.xlu0 %v3241_v20  ;;  %v6574_v18 = vld [vmem:[#allocation2 + $0x20] sm:$0xff] }
 0xde6   : > { %3259 = vrot.lane.b32.xlu1 %v8347_v11, %s7248_s20  ;;  %v3438_v11 = vadd.f32 %v8429_v27, %v8368_v22 }
 0xde8   : > { %v8443_v56 = vadd.f32 %v6572_v9, %v3438_v11  ;;  %v6378_v11 = vld [vmem:[%s7984_s19 + $0x24] ss:$16 sps:$4 sm:$0xff]   ;;  %v6379_v9 = vld [vmem:[%s7984_s19 + $0x28] ss:$16 sps:$4 sm:$0xff]  }
 0xdeb   : > { %3257 = vrot.lane.b32.xlu0 %v8272_v57, %s7248_s20  ;;  %v6570_v57 = vld [vmem:[#allocation2] sm:$0xff] }
 0xdec   : > { %v8437_v31 = vadd.f32 %v6570_v57, %v3436_v19  ;;  %v6381_v57 = vld [vmem:[%s7984_s19 + $0x2c] ss:$16 sps:$4 sm:$0xff]  }
 0xdf6   : > { %v8421_v24 = vpop.f32.mrb[32].mxu0 }
 0xdf7   : > { %v8423_v58 = vpop.f32.mrb[33].mxu0 }
 0xdf8   : > { %v6014_v25 = vpop.f32.mrb[34].mxu0 }
 0xdf9   : > { %v8425_v26 = vpop.f32.mrb[35].mxu0 }
 0xe0a   : > { %3450 = vadd.xlane.f32.xlu1 %v8437_v31  ;;  %3452 = vadd.xlane.f32.xlu0 %v8439_v32 }
 0xe0e   : > { %3454 = vadd.xlane.f32.xlu0 %v8443_v56 }
 0xe5e   : > { %v3240_v33 = vpop.xlane.xlu0 %3239 }
 0xe5f   : > { %6504 = vrcp.f32 %v3240_v33  ;;  %v6384_v33 = vld [vmem:[%s7984_s19 + $0x44] ss:$16 sps:$4 sm:$0xff]  }
 0xe62   : > { %v3243_v29 = vpop.xlane.xlu0 %3242  ;;  %v3246_v59 = vpop.xlane.xlu1 %3245 }
 0xe63   : > { %6506 = vrcp.f32 %v3243_v29  ;;  %v6387_v29 = vld [vmem:[%s7984_s19 + $0x4c] ss:$16 sps:$4 sm:$0xff]  }
 0xe64   : > { %6508 = vrcp.f32 %v3246_v59  ;;  %v6382_v59 = vld [vmem:[%s7984_s19 + $0x40] ss:$16 sps:$4 sm:$0xff]  }
 0xe66   : > { %v3258_v22 = vpop.permute.xlu0 %3257  ;;  %v3260_v21 = vpop.permute.xlu1 %3259 }
 0xe67   : > { %5983 = vmatprep.subr.bf16.mxu1 %v3258_v22  ;;  %v3269_v23 = vsel %vm2587_vm3, %v3260_v21, 0 }
 0xe68   : > { %5984 = vmatpush3.bf16.msra.mxu1 %v3258_v22  ;;  %v6385_v22 = vld [vmem:[%s7984_s19 + $0x48] ss:$16 sps:$4 sm:$0xff]  }
 0xe69   : > { %6090 = vmatprep.subr.msk.bf16.mxu1 %vm2587_vm3, %v3260_v21  ;;  %v6505_v35 = vpop.eup %6504  ;;  %v6390_v21 = vld [vmem:[%s7984_s19 + $0x64] ss:$16 sps:$4 sm:$0xff]  }
 0xe6a   : > { %v3250_v1 = vmul.f32 %v6505_v35, %v6499_v7  ;;  %v6573_v7 = vld [vmem:[#allocation2 + $0x18] sm:$0xff]  ;;  %v6393_v35 = vld [vmem:[%s7984_s19 + $0x6c] ss:$16 sps:$4 sm:$0xff]  }
 0xe6c   : > { %5986 = vmatpush3.bf16.msra.mxu1 %v3269_v23  ;;  %v6388_v23 = vld [vmem:[%s7984_s19 + $0x60] ss:$16 sps:$4 sm:$0xff]  }
 0xe6d   : > { %v6507_v53 = vpop.eup %6506  ;;  %5991 = vmatprep.subr.bf16.mxu1 %v8320_v36 }
 0xe6e   : > { %v6509_v15 = vpop.eup %6508  ;;  %v3251_v39 = vmul.f32 %v6507_v53, %v6501_v16  ;;  %v6391_v53 = vld [vmem:[%s7984_s19 + $0x68] ss:$16 sps:$4 sm:$0xff]  }
 0xe6f   : > { %v3252_v40 = vmul.f32 %v6509_v15, %v6503_v17  ;;  %v6396_v15 = vld [vmem:[%s7984_s19 + $0x84] ss:$16 sps:$4 sm:$0xff]  }
 0xe70   : > { %v3253_v41 = vpack.c.bf16 %v3251_v39, %v3250_v1  ;;  %v6399_v1 = vld [vmem:[%s7984_s19 + $0x8c] ss:$16 sps:$4 sm:$0xff]   ;;  %v6394_v39 = vld [vmem:[%s7984_s19 + $0x80] ss:$16 sps:$4 sm:$0xff]  }
 0xe71   : > { %v3254_v34 = vpack.c.bf16 %v3252_v40, %v3252_v40  ;;  %v6397_v40 = vld [vmem:[%s7984_s19 + $0x88] ss:$16 sps:$4 sm:$0xff]  }
 0xe72   : > { %5987 = vmatprep.mubr.msk.bf16.mxu1 %vm2543_vm4, %v3253_v41  ;;  %v6402_v41 = vld [vmem:[%s7984_s19 + $0xa4] ss:$16 sps:$4 sm:$0xff]  }
 0xe73   : > { %5988 = vmatmul.mubr.msk.bf16.vlgmr.msra.gmra.mrb[28].mxu1 %vm2543_vm4, %v3254_v34  ;;  %v6405_v34 = vld [vmem:[%s7984_s19 + $0xac] ss:$16 sps:$4 sm:$0xff]  }
 0xe74   : > { %5992 = vmatpush3.bf16.msra.mxu1 %v8320_v36 }
 0xe75   : > { %5993 = vmatprep.subr.bf16.mxu1 %v8325_v47 }
 0xe78   : > { %5994 = vmatpush3.bf16.msra.mxu1 %v8325_v47  ;;  %v6370_v47 = vld [vmem:[%s7984_s19] ss:$16 sps:$4 sm:$0xff]  }
 0xe79   : > { %5995 = vmatprep.subr.bf16.mxu1 %v8332_v60 }
 0xe7c   : > { %5996 = vmatpush3.bf16.msra.mxu1 %v8332_v60  ;;  %v6375_v60 = vld [vmem:[%s7984_s19 + $0xc] ss:$16 sps:$4 sm:$0xff]  }
 0xe7d   : > { %5997 = vmatprep.subr.bf16.mxu1 %v8337_v62  ;;  %3820 = vmatprep.subr.bf16.mxu0 %v6375_v60  ;;  %v6415_v60 = vld [vmem:[%s7984_s19 + $0xe8] ss:$16 sps:$4 sm:$0xff]  }
 0xe7e   : > { %3821 = vmatpush1.bf16.msra.mxu0 %v6373_v38  ;;  %v6412_v38 = vld [vmem:[%s7984_s19 + $0xe0] ss:$16 sps:$4 sm:$0xff]  }
 0xe7f   : > { %3822 = vmatprep.subr.bf16.mxu0 %v6381_v57 }
 0xe80   : > { %5998 = vmatpush3.bf16.msra.mxu1 %v8337_v62 }
 0xe81   : > { %3757 = vmatprep.subr.bf16.mxu1 %v6372_v45  ;;  %v6417_v45 = vld [vmem:[%s7984_s19 + $0xec] ss:$16 sps:$4 sm:$0xff]  }
 0xe82   : > { %3823 = vmatpush1.bf16.msra.mxu0 %v6379_v9 }
 0xe83   : > { %3824 = vmatprep.subr.bf16.mxu0 %v6387_v29 }
 0xe86   : > { %3825 = vmatpush1.bf16.msra.mxu0 %v6385_v22  ;;  %v6420_v22 = vld [vmem:[%s7988_s28] sm:$0xff]  }
 0xe87   : > { %3826 = vmatprep.subr.bf16.mxu0 %v6393_v35  ;;  %v6422_v35 = vld [vmem:[%s7988_s28 + $0x48] sm:$0xff]  }
 0xe8a   : > { %3827 = vmatpush1.bf16.msra.mxu0 %v6391_v53  ;;  %v6424_v53 = vld [vmem:[%s7988_s28 + $0x8] sm:$0xff]  }
 0xe8b   : > { %3828 = vmatprep.subr.bf16.mxu0 %v6399_v1  ;;  %v6426_v1 = vld [vmem:[%s7988_s28 + $0x50] sm:$0xff]  }
 0xe8e   : > { %3829 = vmatpush1.bf16.msra.mxu0 %v6397_v40  ;;  %v6428_v40 = vld [vmem:[%s7988_s28 + $0x10] sm:$0xff]  }
 0xe8f   : > { %3830 = vmatprep.subr.bf16.mxu0 %v6405_v34  ;;  %v6430_v34 = vld [vmem:[%s7988_s28 + $0x58] sm:$0xff]  }
 0xe97   : > { %v3453_v62 = vpop.xlane.xlu0 %3452  ;;  %v3451_v63 = vpop.xlane.xlu1 %3450 }
 0xe98   : > { %v3462_v10 = vmul.f32 0.0078125, %v3451_v63  ;;  %v3463_v0 = vmul.f32 0.0078125, %v3453_v62 }
 0xe9a   : > { %v8474_v16 = vsub.f32 %v8437_v31, %v3462_v10 }
 0xe9b   : > { %v3455_v54 = vpop.xlane.xlu0 %3454 }
 0xe9c   : > { %v3464_v17 = vmul.f32 0.0078125, %v3455_v54 }
 0xf46   : > { %v5989_v30 = vpop.f32.mrb[28].mxu1 }
 0xf47   : > { %v3305_v42 = vpop.f32.mrb[29].mxu1  ;;  %v3320_v44 = vpack.c.bf16 %v5989_v30, %v5989_v30  ;;  %v6400_v30 = vld [vmem:[%s7984_s19 + $0xa0] ss:$16 sps:$4 sm:$0xff]  }
 0xf48   : > { %v5990_v37 = vpop.f32.mrb[30].mxu1 }
 0xf49   : > { %v3308_v36 = vpop.f32.mrb[31].mxu1  ;;  %v6408_v37 = vld [vmem:[%s7984_s19 + $0xc4] ss:$16 sps:$4 sm:$0xff]  }
 0xf4a   : > { %v3319_v43 = vpack.c.bf16 %v3308_v36, %v3305_v42  ;;  %v6403_v42 = vld [vmem:[%s7984_s19 + $0xa8] ss:$16 sps:$4 sm:$0xff]   ;;  %v6411_v36 = vld [vmem:[%s7984_s19 + $0xcc] ss:$16 sps:$4 sm:$0xff]  }
 0xf4b   : > { %3831 = vmatpush1.bf16.msra.mxu0 %v6403_v42  ;;  %v6432_v42 = vld [vmem:[%s7988_s28 + $0x18] sm:$0xff]  }
 0xf4c   : > { %5999 = vmatprep.mubr.msk.bf16.mxu1 %vm2476_vm2, %v3319_v43  ;;  %v6406_v43 = vld [vmem:[%s7984_s19 + $0xc0] ss:$16 sps:$4 sm:$0xff]   ;;  %3832 = vmatprep.subr.bf16.mxu0 %v6411_v36  ;;  %v6434_v36 = vld [vmem:[%s7988_s28 + $0x60] sm:$0xff]  }
 0xf4d   : > { %6000 = vmatmul.mubr.msk.bf16.vlgmr.msra.gmra.mrb[32].mxu1 %vm2476_vm2, %v3320_v44  ;;  %v6409_v44 = vld [vmem:[%s7984_s19 + $0xc8] ss:$16 sps:$4 sm:$0xff]  }
 0xf4e   : > { %3789 = vmatprep.mubr.bf16.mxu1 %v7246_v55  ;;  %3758 = vmatpush1.bf16.msra.mxu1 %v6370_v47  ;;  %v6414_v47 = vld [vmem:[%s7984_s19 + $0xe4] ss:$16 sps:$4 sm:$0xff]   ;;  %s9071_s19 = sld [smem:[#allocation63_spill]] (!%p5511_p4) }
 0xf4f   : > { %3759 = vmatprep.subr.bf16.mxu1 %v6378_v11  ;;  %3833 = vmatpush1.bf16.msra.mxu0 %v6409_v44  ;;  %v6436_v44 = vld [vmem:[%s7988_s28 + $0x20] sm:$0xff]  }
 0xf50   : > { %3834 = vmatprep.subr.bf16.mxu0 %v6417_v45  ;;  %v6438_v45 = vld [vmem:[%s7988_s28 + $0x68] sm:$0xff]  }
 0xf52   : > { %3760 = vmatpush1.bf16.msra.mxu1 %v6376_v61  ;;  %v8547_v61 = vld [vmem:[%s1110_s17] ss:$0 sm:$0xff] }
 0xf53   : > { %3761 = vmatprep.subr.bf16.mxu1 %v6384_v33  ;;  %3835 = vmatpush1.bf16.msra.mxu0 %v6415_v60 }
 0xf56   : > { %3762 = vmatpush1.bf16.msra.mxu1 %v6382_v59  ;;  %v6419_v59 = vld [vmem:[%s7988_s28 + $0xc0] sm:$0xff]  }
 0xf57   : > { %3763 = vmatprep.subr.bf16.mxu1 %v6390_v21  ;;  %5695 = vmatprep.subr.bf16.mxu0 %v6419_v59  ;;  %v6421_v21 = vld [vmem:[%s7988_s28 + $0x80] sm:$0xff]  }
 0xf5a   : > { %3764 = vmatpush1.bf16.msra.mxu1 %v6388_v23  ;;  %v6423_v23 = vld [vmem:[%s7988_s28 + $0xc8] sm:$0xff]  }
 0xf5b   : > { %3765 = vmatprep.subr.bf16.mxu1 %v6396_v15  ;;  %v6425_v15 = vld [vmem:[%s7988_s28 + $0x88] sm:$0xff]  }
 0xf5e   : > { %3766 = vmatpush1.bf16.msra.mxu1 %v6394_v39  ;;  %v6427_v39 = vld [vmem:[%s7988_s28 + $0xd0] sm:$0xff]  }
 0xf5f   : > { %3767 = vmatprep.subr.bf16.mxu1 %v6402_v41  ;;  %v6429_v41 = vld [vmem:[%s7988_s28 + $0x90] sm:$0xff]  }
 0xf62   : > { %3768 = vmatpush1.bf16.msra.mxu1 %v6400_v30  ;;  %v6431_v30 = vld [vmem:[%s7988_s28 + $0xd8] sm:$0xff]  }
 0xf63   : > { %3769 = vmatprep.subr.bf16.mxu1 %v6408_v37  ;;  %v6433_v37 = vld [vmem:[%s7988_s28 + $0x98] sm:$0xff]  }
 0xf66   : > { %3770 = vmatpush1.bf16.msra.mxu1 %v6406_v43  ;;  %v6435_v43 = vld [vmem:[%s7988_s28 + $0xe0] sm:$0xff]  }
 0xf67   : > { %3771 = vmatprep.subr.bf16.mxu1 %v6414_v47  ;;  %v6437_v47 = vld [vmem:[%s7988_s28 + $0xa0] sm:$0xff]  }
 0xf6a   : > { %3772 = vmatpush1.bf16.msra.mxu1 %v6412_v38  ;;  %v6439_v38 = vld [vmem:[%s7988_s28 + $0xe8] sm:$0xff]  }
0x1020   : > { %v6001_v46 = vpop.f32.mrb[32].mxu1 }
0x1021   : > { %v3424_v2 = vadd.f32 %v8421_v24, %v6001_v46  ;;  %v3361_v3 = vpop.f32.mrb[33].mxu1  ;;  %v8480_v24 = vsub.f32 %v8439_v32, %v3463_v0 }
0x1022   : > { %v3416_v4 = vadd.f32 %v8423_v58, %v3361_v3  ;;  %v6002_v5 = vpop.f32.mrb[34].mxu1  ;;  %v6575_v58 = vld [vmem:[#allocation2 + $0x28] sm:$0xff] }
0x1023   : > { %v3364_v8 = vpop.f32.mrb[35].mxu1  ;;  %v3441_v51 = vadd.f32 %v8429_v27, %v3424_v2  ;;  %v3475_v19 = vmul.f32 %v8480_v24, %v8480_v24 }
0x1024   : > { %v3439_v12 = vadd.f32 %v8429_v27, %v3416_v4  ;;  %v3419_v13 = vadd.f32 %v8425_v26, %v3364_v8  ;;  %v8486_v26 = vsub.f32 %v8443_v56, %v3464_v17 }
0x1025   : > { %v8483_v25 = vadd.f32 %v6575_v58, %v3441_v51 }
0x1026   : > { %v3440_v6 = vadd.f32 %v8429_v27, %v3419_v13  ;;  %v8471_v14 = vadd.f32 %v6573_v7, %v3439_v12  ;;  %v3474_v27 = vmul.f32 %v8474_v16, %v8474_v16  ;;  %v3476_v28 = vmul.f32 %v8486_v26, %v8486_v26 }
0x1028   : > { %3456 = vadd.xlane.f32.xlu1 %v8471_v14  ;;  %v8477_v20 = vadd.f32 %v6574_v18, %v3440_v6 }
0x102a   : > { %3458 = vadd.xlane.f32.xlu0 %v8477_v20 }
0x102c   : > { %3460 = vadd.xlane.f32.xlu1 %v8483_v25 }
0x102e   : > { %3480 = vadd.xlane.f32.xlu0 %v3474_v27  ;;  %v8540_v27 = vld [vmem:[%s1102_s14] ss:$0 sm:$0xff]  ;;  %s9069_s14 = sld [smem:[#allocation61_spill]] (!%p5511_p4) }
0x1030   : > { %3482 = vadd.xlane.f32.xlu1 %v3475_v19 }
0x1032   : > { %3484 = vadd.xlane.f32.xlu0 %v3476_v28 }
0x10b5   : > { %v3457_v62 = vpop.xlane.xlu1 %3456 }
0x10b6   : > { %v3465_v46 = vmul.f32 0.0078125, %v3457_v62  ;;  %v6440_v62 = vld [vmem:[%s7988_s28 + $0x28] sm:$0xff]  }
0x10b7   : > { %v3459_v63 = vpop.xlane.xlu0 %3458 }
0x10b8   : > { %v8524_v2 = vsub.f32 %v8471_v14, %v3465_v46  ;;  %v3466_v3 = vmul.f32 0.0078125, %v3459_v63  ;;  %v6441_v46 = vld [vmem:[%s7988_s28 + $0xa8] sm:$0xff]   ;;  %v6442_v63 = vld [vmem:[%s7988_s28 + $0x70] sm:$0xff]  }
0x10b9   : > { %v3461_v4 = vpop.xlane.xlu1 %3460 }
0x10ba   : > { %v8527_v5 = vsub.f32 %v8477_v20, %v3466_v3  ;;  %v3467_v8 = vmul.f32 0.0078125, %v3461_v4  ;;  %v3477_v10 = vmul.f32 %v8524_v2, %v8524_v2  ;;  %v6443_v3 = vld [vmem:[%s7988_s28 + $0xf0] sm:$0xff]  }
0x10bb   : > { %v3481_v12 = vpop.xlane.xlu0 %3480 }
0x10bc   : > { %v8532_v13 = vsub.f32 %v8483_v25, %v3467_v8  ;;  %v3492_v54 = vmul.f32 0.0078125, %v3481_v12  ;;  %3486 = vadd.xlane.f32.xlu1 %v3477_v10  ;;  %v3478_v0 = vmul.f32 %v8527_v5, %v8527_v5  ;;  %v6444_v8 = vld [vmem:[%s7988_s28 + $0x30] sm:$0xff]   ;;  %v6446_v12 = vld [vmem:[%s7988_s28 + $0x78] sm:$0xff]  }
0x10bd   : > { %v3483_v51 = vpop.xlane.xlu1 %3482  ;;  %v6445_v10 = vld [vmem:[%s7988_s28 + $0xb0] sm:$0xff]  }
0x10be   : > { %v3498_v6 = vadd.f32 1e-05, %v3492_v54  ;;  %v3493_v7 = vmul.f32 0.0078125, %v3483_v51  ;;  %3488 = vadd.xlane.f32.xlu0 %v3478_v0  ;;  %v3479_v17 = vmul.f32 %v8532_v13, %v8532_v13  ;;  %v6447_v54 = vld [vmem:[%s7988_s28 + $0xf8] sm:$0xff]  }
0x10bf   : > { %v3485_v60 = vpop.xlane.xlu0 %3484  ;;  %v6448_v51 = vld [vmem:[%s7988_s28 + $0x38] sm:$0xff]  }
0x10c0   : > { %6510 = vrsqrt.f32 %v3498_v6  ;;  %v3499_v18 = vadd.f32 1e-05, %v3493_v7  ;;  %3490 = vadd.xlane.f32.xlu1 %v3479_v17  ;;  %v3494_v4 = vmul.f32 0.0078125, %v3485_v60  ;;  %v6449_v6 = vld [vmem:[%s7988_s28 + $0xb8] sm:$0xff]  }
0x10c2   : > { %6512 = vrsqrt.f32 %v3499_v18  ;;  %v3500_v0 = vadd.f32 1e-05, %v3494_v4 }
0x10c4   : > { %6514 = vrsqrt.f32 %v3500_v0 }
0x10ca   : > { %v6511_v58 = vpop.eup %6510 }
0x10cb   : > { %v3510_v19 = vmul.f32 %v6511_v58, %v8474_v16 }
0x10cc   : > { %v6513_v28 = vpop.eup %6512 }
0x10cd   : > { %v3511_v11 = vmul.f32 %v6513_v28, %v8480_v24  ;;  %v3522_v57 = vmul.f32 %v8540_v27, %v3510_v19  ;;  %v6418_v24 = vld [vmem:[%s7988_s28 + $0x40] sm:$0xff]  }
0x10ce   : > { %5661 = vmatprep.subr.bf16.mxu1 %v6418_v24 }
0x10cf   : > { %v3523_v9 = vmul.f32 %v8540_v27, %v3511_v11  ;;  %v3534_v33 = vadd.f32 %v8547_v61, %v3522_v57 }
0x10d1   : > { %v3535_v29 = vadd.f32 %v8547_v61, %v3523_v9 }
0x10d3   : > { %v3540_v16 = vpack.c.bf16 %v3535_v29, %v3534_v33  ;;  %v6515_v33 = vpop.eup %6514 }
0x10d4   : > { %v3512_v29 = vmul.f32 %v6515_v33, %v8486_v26 }
0x10d5   : > { %3790 = vmatmul.mubr.bf16.vlgmr.msra.gmra.mrb[36].mxu1 %v3540_v16  ;;  %3853 = vmatmul.mubr.bf16.vlgmr.msra.gmra.mrb[36].mxu0 %v3540_v16 }
0x10d6   : > { %3799 = vmatprep.mubr.bf16.mxu1 %v7246_v55  ;;  %3862 = vmatprep.mubr.bf16.mxu0 %v7246_v55  ;;  %v3524_v59 = vmul.f32 %v8540_v27, %v3512_v29 }
0x10d7   : > { %5662 = vmatpush3.bf16.msra.mxu1 %v6420_v22  ;;  %5696 = vmatpush3.bf16.msra.mxu0 %v6421_v21 }
0x10d8   : > { %5663 = vmatprep.subr.bf16.mxu1 %v6422_v35  ;;  %5697 = vmatprep.subr.bf16.mxu0 %v6423_v23  ;;  %v3536_v23 = vadd.f32 %v8547_v61, %v3524_v59 }
0x10db   : > { %5664 = vmatpush3.bf16.msra.mxu1 %v6424_v53  ;;  %5698 = vmatpush3.bf16.msra.mxu0 %v6425_v15 }
0x10dc   : > { %5665 = vmatprep.subr.bf16.mxu1 %v6426_v1  ;;  %5699 = vmatprep.subr.bf16.mxu0 %v6427_v39 }
0x10df   : > { %5666 = vmatpush3.bf16.msra.mxu1 %v6428_v40  ;;  %5700 = vmatpush3.bf16.msra.mxu0 %v6429_v41 }
0x10e0   : > { %5667 = vmatprep.subr.bf16.mxu1 %v6430_v34  ;;  %5701 = vmatprep.subr.bf16.mxu0 %v6431_v30 }
0x10e3   : > { %5668 = vmatpush3.bf16.msra.mxu1 %v6432_v42  ;;  %5702 = vmatpush3.bf16.msra.mxu0 %v6433_v37 }
0x10e4   : > { %5669 = vmatprep.subr.bf16.mxu1 %v6434_v36  ;;  %5703 = vmatprep.subr.bf16.mxu0 %v6435_v43 }
0x10e7   : > { %5670 = vmatpush3.bf16.msra.mxu1 %v6436_v44  ;;  %5704 = vmatpush3.bf16.msra.mxu0 %v6437_v47 }
0x10e8   : > { %5671 = vmatprep.subr.bf16.mxu1 %v6438_v45  ;;  %5705 = vmatprep.subr.bf16.mxu0 %v6439_v38 }
0x10eb   : > { %5672 = vmatpush3.bf16.msra.mxu1 %v6440_v62  ;;  %5706 = vmatpush3.bf16.msra.mxu0 %v6441_v46 }
0x10ec   : > { %5673 = vmatprep.subr.bf16.mxu1 %v6442_v63  ;;  %5707 = vmatprep.subr.bf16.mxu0 %v6443_v3 }
0x10ef   : > { %5674 = vmatpush3.bf16.msra.mxu1 %v6444_v8  ;;  %5708 = vmatpush3.bf16.msra.mxu0 %v6445_v10 }
0x10f0   : > { %5675 = vmatprep.subr.bf16.mxu1 %v6446_v12  ;;  %5709 = vmatprep.subr.bf16.mxu0 %v6447_v54 }
0x10f3   : > { %5676 = vmatpush3.bf16.msra.mxu1 %v6448_v51  ;;  %5710 = vmatpush3.bf16.msra.mxu0 %v6449_v6 }
0x1149   : > { %v3487_v7 = vpop.xlane.xlu1 %3486 }
0x114a   : > { %v3495_v17 = vmul.f32 0.0078125, %v3487_v7 }
0x114b   : > { %v3489_v18 = vpop.xlane.xlu0 %3488 }
0x114c   : > { %v3501_v58 = vadd.f32 1e-05, %v3495_v17  ;;  %v3496_v19 = vmul.f32 0.0078125, %v3489_v18 }
0x114d   : > { %v3491_v28 = vpop.xlane.xlu1 %3490 }
0x114e   : > { %6516 = vrsqrt.f32 %v3501_v58  ;;  %v3502_v11 = vadd.f32 1e-05, %v3496_v19  ;;  %v3497_v57 = vmul.f32 0.0078125, %v3491_v28 }
0x1150   : > { %6518 = vrsqrt.f32 %v3502_v11  ;;  %v3503_v9 = vadd.f32 1e-05, %v3497_v57 }
0x1152   : > { %6520 = vrsqrt.f32 %v3503_v9 }
0x1158   : > { %v6517_v16 = vpop.eup %6516 }
0x1159   : > { %v3513_v24 = vmul.f32 %v6517_v16, %v8524_v2 }
0x115a   : > { %v6519_v22 = vpop.eup %6518 }
0x115b   : > { %v3525_v21 = vmul.f32 %v8540_v27, %v3513_v24  ;;  %v3514_v15 = vmul.f32 %v6519_v22, %v8527_v5  ;;  %v3575_v5 = vld [vmem:[%s7986_s5] sm:$0xf]  ;;  %s9070_s5 = sld [smem:[#allocation62_spill]] (!%p5511_p4) }
0x115c   : > { %v6521_v35 = vpop.eup %6520  ;;  %v8604_v30 = vrot.slane %v3575_v5, %v2192_v49 }
0x115d   : > { %v3537_v53 = vadd.f32 %v8547_v61, %v3525_v21  ;;  %v3515_v1 = vmul.f32 %v6521_v35, %v8532_v13  ;;  %v3526_v2 = vmul.f32 %v8540_v27, %v3514_v15  ;;  %v3591_v13 = vsub.s32 3, %v8187_v48 }
0x115f   : > { %v3541_v39 = vpack.c.bf16 %v3537_v53, %v3536_v23  ;;  %v3527_v26 = vmul.f32 %v8540_v27, %v3515_v1  ;;  %v3538_v41 = vadd.f32 %v8547_v61, %v3526_v2  ;;  %v8608_v27 = vrot.slane %v3575_v5, %v2200_v50 }
0x1160   : > { %v8614_v42 = vrot.slane %v3575_v5, %v3591_v13 }
0x1161   : > { %3800 = vmatmul.mubr.bf16.gmra.mrb[40].mxu1 %v3541_v39  ;;  %3863 = vmatmul.mubr.bf16.gmra.mrb[40].mxu0 %v3541_v39  ;;  %v3539_v40 = vadd.f32 %v8547_v61, %v3527_v26 }
0x1162   : > { %3809 = vmatprep.mubr.bf16.mxu1 %v7246_v55  ;;  %3872 = vmatprep.mubr.bf16.mxu0 %v7246_v55  ;;  %v8612_v55 = vrot.slane %v3575_v5, %v2196_v52 }
0x1163   : > { %v3542_v34 = vpack.c.bf16 %v3539_v40, %v3538_v41 }
0x1169   : > { %3810 = vmatmul.mubr.bf16.gmra.mrb[44].mxu1 %v3542_v34  ;;  %3873 = vmatmul.mubr.bf16.gmra.mrb[44].mxu0 %v3542_v34 }
0x11a8   : > { %v3791_v61 = vpop.f32.mrb[36].mxu1  ;;  %v3854_v37 = vpop.f32.mrb[36].mxu0 }
0x11a9   : > { %v8617_v36 = vadd.f32 %v3791_v61, %v8604_v30  ;;  %v8620_v43 = vadd.f32 %v3854_v37, %v8608_v27  ;;  %v3793_v49 = vpop.f32.mrb[37].mxu1  ;;  %v3856_v44 = vpop.f32.mrb[37].mxu0 }
0x11aa   : > { %v8623_v47 = vadd.f32 %v3793_v49, %v8612_v55  ;;  %v8626_v50 = vadd.f32 %v3856_v44, %v8614_v42  ;;  %v3795_v48 = vpop.f32.mrb[38].mxu1  ;;  %v3858_v52 = vpop.f32.mrb[38].mxu0 }
0x11ab   : > { %v3907_v45 = vmul.f32 0.044715, %v8617_v36  ;;  %v3909_v38 = vmul.f32 0.044715, %v8620_v43  ;;  %v3796_v46 = vadd.f32 %v3795_v48, %v8604_v30  ;;  %v3859_v63 = vadd.f32 %v3858_v52, %v8608_v27  ;;  %v3797_v3 = vpop.f32.mrb[39].mxu1  ;;  %v3860_v4 = vpop.f32.mrb[39].mxu0 }
0x11ac   : > { %v3908_v60 = vmul.f32 0.044715, %v8623_v47  ;;  %v3910_v62 = vmul.f32 0.044715, %v8626_v50  ;;  %v3798_v12 = vadd.f32 %v3797_v3, %v8612_v55  ;;  %v8638_v54 = vadd.f32 %v3860_v4, %v8614_v42 }
0x11ad   : > { %v3931_v8 = vmul.f32 %v3907_v45, %v8617_v36  ;;  %v3933_v10 = vmul.f32 %v3909_v38, %v8620_v43  ;;  %v3911_v6 = vmul.f32 0.044715, %v3796_v46  ;;  %v3913_v18 = vmul.f32 0.044715, %v3859_v63 }
0x11ae   : > { %v3932_v0 = vmul.f32 %v3908_v60, %v8623_v47  ;;  %v3934_v51 = vmul.f32 %v3910_v62, %v8626_v50  ;;  %v3912_v28 = vmul.f32 0.044715, %v3798_v12  ;;  %v3914_v33 = vmul.f32 0.044715, %v8638_v54 }
0x11af   : > { %v3955_v7 = vmul.f32 %v3931_v8, %v8617_v36  ;;  %v3957_v17 = vmul.f32 %v3933_v10, %v8620_v43  ;;  %v3935_v19 = vmul.f32 %v3911_v6, %v3796_v46  ;;  %v3937_v9 = vmul.f32 %v3913_v18, %v3859_v63 }
0x11b0   : > { %v3956_v58 = vmul.f32 %v3932_v0, %v8623_v47  ;;  %v3958_v29 = vmul.f32 %v3934_v51, %v8626_v50  ;;  %v3936_v24 = vmul.f32 %v3912_v28, %v3798_v12  ;;  %v3938_v35 = vmul.f32 %v3914_v33, %v8638_v54 }
0x11b1   : > { %v3979_v11 = vadd.f32 %v3955_v7, %v8617_v36  ;;  %v3981_v57 = vadd.f32 %v3957_v17, %v8620_v43  ;;  %v3959_v16 = vmul.f32 %v3935_v19, %v3796_v46  ;;  %v3961_v21 = vmul.f32 %v3937_v9, %v3859_v63 }
0x11b2   : > { %v3960_v53 = vmul.f32 %v3936_v24, %v3798_v12  ;;  %v3980_v15 = vadd.f32 %v3956_v58, %v8623_v47  ;;  %v3962_v39 = vmul.f32 %v3938_v35, %v8638_v54  ;;  %v3982_v34 = vadd.f32 %v3958_v29, %v8626_v50 }
0x11b3   : > { %v4003_v59 = vmul.f32 0.7978846, %v3979_v11  ;;  %v4005_v22 = vmul.f32 0.7978846, %v3981_v57  ;;  %v3983_v23 = vadd.f32 %v3959_v16, %v3796_v46  ;;  %v3985_v1 = vadd.f32 %v3961_v21, %v3859_v63 }
0x11b4   : > { %v3984_v2 = vadd.f32 %v3960_v53, %v3798_v12  ;;  %v4004_v40 = vmul.f32 0.7978846, %v3980_v15  ;;  %v3986_v5 = vadd.f32 %v3962_v39, %v8638_v54  ;;  %v4006_v61 = vmul.f32 0.7978846, %v3982_v34 }
0x11b5   : > { %6522 = vtanh.f32 %v4003_v59  ;;  %v4007_v26 = vmul.f32 0.7978846, %v3983_v23  ;;  %v4009_v41 = vmul.f32 0.7978846, %v3985_v1  ;;  %v3883_v60 = vmul.f32 0.5, %v8617_v36 }
0x11b6   : > { %6524 = vtanh.f32 %v4005_v22  ;;  %v4008_v13 = vmul.f32 0.7978846, %v3984_v2  ;;  %v4010_v37 = vmul.f32 0.7978846, %v3986_v5  ;;  %v3887_v62 = vmul.f32 0.5, %v3796_v46 }
0x11b7   : > { %6526 = vtanh.f32 %v4007_v26  ;;  %v3885_v8 = vmul.f32 0.5, %v8620_v43  ;;  %v3889_v10 = vmul.f32 0.5, %v3859_v63  ;;  %v3884_v6 = vmul.f32 0.5, %v8623_v47 }
0x11b8   : > { %6528 = vtanh.f32 %v4009_v41  ;;  %v3888_v19 = vmul.f32 0.5, %v3798_v12  ;;  %v3886_v36 = vmul.f32 0.5, %v8626_v50  ;;  %v3890_v46 = vmul.f32 0.5, %v8638_v54 }
0x11b9   : > { %6530 = vtanh.f32 %v4004_v40 }
0x11ba   : > { %6532 = vtanh.f32 %v4008_v13 }
0x11bb   : > { %6534 = vtanh.f32 %v4006_v61 }
0x11bc   : > { %6536 = vtanh.f32 %v4010_v37 }
0x11bf   : > { %v6523_v49 = vpop.eup %6522 }
0x11c0   : > { %v6525_v44 = vpop.eup %6524  ;;  %v4051_v48 = vadd.f32 1.0, %v6523_v49 }
0x11c1   : > { %v6527_v52 = vpop.eup %6526  ;;  %v4053_v45 = vadd.f32 1.0, %v6525_v44 }
0x11c2   : > { %v6529_v38 = vpop.eup %6528  ;;  %v4055_v3 = vadd.f32 1.0, %v6527_v52  ;;  %v4075_v17 = vmul.f32 %v4051_v48, %v3883_v60 }
0x11c3   : > { %v6531_v4 = vpop.eup %6530  ;;  %v4057_v0 = vadd.f32 1.0, %v6529_v38  ;;  %v4077_v11 = vmul.f32 %v4053_v45, %v3885_v8 }
0x11c4   : > { %v6533_v51 = vpop.eup %6532  ;;  %v4052_v7 = vadd.f32 1.0, %v6531_v4  ;;  %v4079_v18 = vmul.f32 %v4055_v3, %v3887_v62 }
0x11c5   : > { %v6535_v58 = vpop.eup %6534  ;;  %v4056_v28 = vadd.f32 1.0, %v6533_v51  ;;  %v4081_v57 = vmul.f32 %v4057_v0, %v3889_v10 }
0x11c6   : > { %v6537_v9 = vpop.eup %6536  ;;  %v4054_v33 = vadd.f32 1.0, %v6535_v58  ;;  %v4099_v43 = vpack.c.bf16 %v4079_v18, %v4075_v17  ;;  %v4076_v63 = vmul.f32 %v4052_v7, %v3884_v6 }
0x11c7   : > { %v4080_v29 = vmul.f32 %v4056_v28, %v3888_v19  ;;  %v4058_v16 = vadd.f32 1.0, %v6537_v9  ;;  %v4101_v24 = vpack.c.bf16 %v4081_v57, %v4077_v11 }
0x11c8   : > { %v4078_v59 = vmul.f32 %v4054_v33, %v3886_v36 }
0x11c9   : > { %v4100_v47 = vpack.c.bf16 %v4080_v29, %v4076_v63  ;;  %v4082_v22 = vmul.f32 %v4058_v16, %v3890_v46 }
0x11cb   : > { %4406 = vmatprep.mubr.bf16.mxu1 %v4100_v47  ;;  %v4102_v21 = vpack.c.bf16 %v4082_v22, %v4078_v59 }
0x11cc   : > { %4407 = vmatmul.mubr.bf16.vlgmr.msra.gmra.mrb[48].mxu1 %v4099_v43 }
0x11cd   : > { %4463 = vmatprep.mubr.bf16.mxu0 %v4102_v21 }
0x11ce   : > { %4464 = vmatmul.mubr.bf16.vlgmr.msra.gmra.mrb[48].mxu0 %v4101_v24 }
0x1234   : > { %v3801_v12 = vpop.f32.mrb[40].mxu1  ;;  %v3864_v35 = vpop.f32.mrb[40].mxu0 }
0x1235   : > { %v8660_v50 = vadd.f32 %v3801_v12, %v8604_v30  ;;  %v3803_v54 = vpop.f32.mrb[41].mxu1  ;;  %v3866_v23 = vpop.f32.mrb[41].mxu0  ;;  %v8663_v53 = vadd.f32 %v3864_v35, %v8608_v27 }
0x1236   : > { %v8666_v15 = vadd.f32 %v3803_v54, %v8612_v55  ;;  %v3805_v1 = vpop.f32.mrb[42].mxu1  ;;  %v3868_v39 = vpop.f32.mrb[42].mxu0  ;;  %v8669_v26 = vadd.f32 %v3866_v23, %v8614_v42 }
0x1237   : > { %v3807_v2 = vpop.f32.mrb[43].mxu1  ;;  %v3870_v40 = vpop.f32.mrb[43].mxu0  ;;  %v3915_v41 = vmul.f32 0.044715, %v8660_v50  ;;  %v8673_v34 = vadd.f32 %v3805_v1, %v8604_v30  ;;  %v8683_v37 = vadd.f32 %v3868_v39, %v8608_v27  ;;  %v3917_v49 = vmul.f32 0.044715, %v8663_v53 }
0x1238   : > { %v8676_v5 = vadd.f32 %v3807_v2, %v8612_v55  ;;  %v8679_v13 = vadd.f32 %v3870_v40, %v8614_v42  ;;  %v3916_v61 = vmul.f32 0.044715, %v8666_v15  ;;  %v3918_v48 = vmul.f32 0.044715, %v8669_v26 }
0x1239   : > { %v3939_v45 = vmul.f32 %v3915_v41, %v8660_v50  ;;  %v3919_v38 = vmul.f32 0.044715, %v8673_v34  ;;  %v3921_v4 = vmul.f32 0.044715, %v8683_v37  ;;  %v3941_v6 = vmul.f32 %v3917_v49, %v8663_v53 }
0x123a   : > { %v3920_v44 = vmul.f32 0.044715, %v8676_v5  ;;  %v3922_v52 = vmul.f32 0.044715, %v8679_v13  ;;  %v3940_v3 = vmul.f32 %v3916_v61, %v8666_v15  ;;  %v3942_v28 = vmul.f32 %v3918_v48, %v8669_v26 }
0x123b   : > { %v3943_v33 = vmul.f32 %v3919_v38, %v8673_v34  ;;  %v3963_v54 = vmul.f32 %v3939_v45, %v8660_v50  ;;  %v3965_v23 = vmul.f32 %v3941_v6, %v8663_v53 }
0x123c   : > { %v3811_v60 = vpop.f32.mrb[44].mxu1  ;;  %v3874_v62 = vpop.f32.mrb[44].mxu0  ;;  %v3944_v7 = vmul.f32 %v3920_v44, %v8676_v5  ;;  %v3946_v11 = vmul.f32 %v3922_v52, %v8679_v13  ;;  %v3964_v16 = vmul.f32 %v3940_v3, %v8666_v15  ;;  %v3966_v21 = vmul.f32 %v3942_v28, %v8669_v26 }
0x123d   : > { %v8694_v8 = vadd.f32 %v3811_v60, %v8604_v30  ;;  %v8697_v10 = vadd.f32 %v3874_v62, %v8608_v27  ;;  %v3813_v0 = vpop.f32.mrb[45].mxu1  ;;  %v3876_v51 = vpop.f32.mrb[45].mxu0  ;;  %v3967_v2 = vmul.f32 %v3943_v33, %v8673_v34 }
0x123e   : > { %v8702_v17 = vadd.f32 %v3813_v0, %v8612_v55  ;;  %v8705_v18 = vadd.f32 %v3876_v51, %v8614_v42  ;;  %v3815_v58 = vpop.f32.mrb[46].mxu1  ;;  %v3878_v19 = vpop.f32.mrb[46].mxu0  ;;  %v3968_v47 = vmul.f32 %v3944_v7, %v8676_v5  ;;  %v3988_v48 = vadd.f32 %v3964_v16, %v8666_v15 }
0x123f   : > { %v8710_v57 = vadd.f32 %v3815_v58, %v8604_v30  ;;  %v8713_v9 = vadd.f32 %v3878_v19, %v8608_v27  ;;  %v3817_v36 = vpop.f32.mrb[47].mxu1  ;;  %v3880_v46 = vpop.f32.mrb[47].mxu0  ;;  %v3945_v30 = vmul.f32 %v3921_v4, %v8683_v37  ;;  %v3923_v24 = vmul.f32 0.044715, %v8694_v8 }
0x1240   : > { %v3924_v43 = vmul.f32 0.044715, %v8702_v17  ;;  %v8718_v63 = vadd.f32 %v3817_v36, %v8612_v55  ;;  %v8721_v29 = vadd.f32 %v3880_v46, %v8614_v42  ;;  %v3925_v27 = vmul.f32 0.044715, %v8697_v10 }
0x1241   : > { %v3926_v59 = vmul.f32 0.044715, %v8705_v18  ;;  %v3970_v42 = vmul.f32 %v3946_v11, %v8679_v13  ;;  %v3927_v12 = vmul.f32 0.044715, %v8710_v57  ;;  %v3929_v35 = vmul.f32 0.044715, %v8713_v9 }
0x1242   : > { %v3928_v22 = vmul.f32 0.044715, %v8718_v63  ;;  %v3930_v55 = vmul.f32 0.044715, %v8721_v29  ;;  %v3948_v1 = vmul.f32 %v3924_v43, %v8702_v17  ;;  %v3969_v40 = vmul.f32 %v3945_v30, %v8683_v37 }
0x1243   : > { %v3947_v41 = vmul.f32 %v3923_v24, %v8694_v8  ;;  %v3949_v61 = vmul.f32 %v3925_v27, %v8697_v10  ;;  %v3950_v49 = vmul.f32 %v3926_v59, %v8705_v18  ;;  %v3992_v52 = vadd.f32 %v3968_v47, %v8676_v5 }
0x1244   : > { %v3952_v39 = vmul.f32 %v3928_v22, %v8718_v63  ;;  %v3954_v44 = vmul.f32 %v3930_v55, %v8721_v29  ;;  %v3951_v45 = vmul.f32 %v3927_v12, %v8710_v57  ;;  %v3953_v38 = vmul.f32 %v3929_v35, %v8713_v9 }
0x1245   : > { %v3990_v60 = vadd.f32 %v3966_v21, %v8669_v26  ;;  %v3994_v62 = vadd.f32 %v3970_v42, %v8679_v13  ;;  %v3972_v3 = vmul.f32 %v3948_v1, %v8702_v17  ;;  %v4012_v0 = vmul.f32 0.7978846, %v3988_v48 }
0x1246   : > { %v3976_v4 = vmul.f32 %v3952_v39, %v8718_v63  ;;  %v4016_v51 = vmul.f32 0.7978846, %v3992_v52  ;;  %v3987_v58 = vadd.f32 %v3963_v54, %v8660_v50  ;;  %v3991_v19 = vadd.f32 %v3967_v2, %v8673_v34 }
0x1247   : > { %v4014_v6 = vmul.f32 0.7978846, %v3990_v60  ;;  %v4018_v7 = vmul.f32 0.7978846, %v3994_v62  ;;  %v3974_v28 = vmul.f32 %v3950_v49, %v8705_v18  ;;  %v3978_v11 = vmul.f32 %v3954_v44, %v8721_v29 }
0x1248   : > { %6538 = vtanh.f32 %v4012_v0  ;;  %v3989_v36 = vadd.f32 %v3965_v23, %v8663_v53  ;;  %v4011_v46 = vmul.f32 0.7978846, %v3987_v58  ;;  %v4015_v33 = vmul.f32 0.7978846, %v3991_v19 }
0x1249   : > { %6540 = vtanh.f32 %v4016_v51  ;;  %v3993_v43 = vadd.f32 %v3969_v40, %v8683_v37  ;;  %v3971_v16 = vmul.f32 %v3947_v41, %v8694_v8  ;;  %v3975_v30 = vmul.f32 %v3951_v45, %v8710_v57 }
0x124a   : > { %6542 = vtanh.f32 %v4014_v6  ;;  %v4013_v24 = vmul.f32 0.7978846, %v3989_v36  ;;  %v3996_v47 = vadd.f32 %v3972_v3, %v8702_v17  ;;  %v4000_v59 = vadd.f32 %v3976_v4, %v8718_v63 }
0x124b   : > { %6544 = vtanh.f32 %v4018_v7  ;;  %v4017_v27 = vmul.f32 0.7978846, %v3993_v43  ;;  %v3973_v22 = vmul.f32 %v3949_v61, %v8697_v10  ;;  %v3977_v55 = vmul.f32 %v3953_v38, %v8713_v9 }
0x124c   : > { %6546 = vtanh.f32 %v4011_v46  ;;  %v3998_v21 = vadd.f32 %v3974_v28, %v8705_v18  ;;  %v4020_v42 = vmul.f32 0.7978846, %v3996_v47  ;;  %v4024_v12 = vmul.f32 0.7978846, %v4000_v59 }
0x124d   : > { %6548 = vtanh.f32 %v4015_v33  ;;  %v4002_v35 = vadd.f32 %v3978_v11, %v8721_v29  ;;  %v3995_v1 = vadd.f32 %v3971_v16, %v8694_v8  ;;  %v3999_v39 = vadd.f32 %v3975_v30, %v8710_v57 }
0x124e   : > { %6550 = vtanh.f32 %v4013_v24  ;;  %v4022_v54 = vmul.f32 0.7978846, %v3998_v21  ;;  %v3997_v2 = vadd.f32 %v3973_v22, %v8697_v10  ;;  %v4001_v61 = vadd.f32 %v3977_v55, %v8713_v9 }
0x124f   : > { %6552 = vtanh.f32 %v4017_v27  ;;  %v4026_v23 = vmul.f32 0.7978846, %v4002_v35  ;;  %v4019_v40 = vmul.f32 0.7978846, %v3995_v1  ;;  %v4023_v41 = vmul.f32 0.7978846, %v3999_v39 }
0x1250   : > { %6554 = vtanh.f32 %v4020_v42  ;;  %v4021_v44 = vmul.f32 0.7978846, %v3997_v2  ;;  %v4025_v45 = vmul.f32 0.7978846, %v4001_v61  ;;  %v3892_v60 = vmul.f32 0.5, %v8666_v15 }
0x1251   : > { %6556 = vtanh.f32 %v4024_v12  ;;  %v3896_v62 = vmul.f32 0.5, %v8676_v5  ;;  %v3894_v0 = vmul.f32 0.5, %v8669_v26  ;;  %v3898_v51 = vmul.f32 0.5, %v8679_v13 }
0x1252   : > { %v6539_v49 = vpop.eup %6538  ;;  %6558 = vtanh.f32 %v4022_v54  ;;  %v3891_v36 = vmul.f32 0.5, %v8660_v50  ;;  %v3895_v15 = vmul.f32 0.5, %v8673_v34  ;;  %v3893_v30 = vmul.f32 0.5, %v8663_v53 }
0x1253   : > { %v6541_v48 = vpop.eup %6540  ;;  %v4060_v52 = vadd.f32 1.0, %v6539_v49  ;;  %6560 = vtanh.f32 %v4026_v23  ;;  %v3897_v24 = vmul.f32 0.5, %v8683_v37  ;;  %v3900_v21 = vmul.f32 0.5, %v8702_v17 }
0x1254   : > { %v6543_v38 = vpop.eup %6542  ;;  %v4064_v3 = vadd.f32 1.0, %v6541_v48  ;;  %6562 = vtanh.f32 %v4019_v40  ;;  %v3904_v42 = vmul.f32 0.5, %v8718_v63  ;;  %v3902_v39 = vmul.f32 0.5, %v8705_v18 }
0x1255   : > { %v6545_v4 = vpop.eup %6544  ;;  %v4062_v6 = vadd.f32 1.0, %v6543_v38  ;;  %6564 = vtanh.f32 %v4023_v41  ;;  %v4084_v58 = vmul.f32 %v4060_v52, %v3892_v60  ;;  %v3906_v2 = vmul.f32 0.5, %v8721_v29 }
0x1256   : > { %v6547_v7 = vpop.eup %6546  ;;  %v4088_v19 = vmul.f32 %v4064_v3, %v3896_v62  ;;  %v4066_v28 = vadd.f32 1.0, %v6545_v4  ;;  %6566 = vtanh.f32 %v4021_v44  ;;  %v3899_v48 = vmul.f32 0.5, %v8694_v8 }
0x1257   : > { %v6549_v11 = vpop.eup %6548  ;;  %v4059_v5 = vadd.f32 1.0, %v6547_v7  ;;  %6568 = vtanh.f32 %v4025_v45  ;;  %v4086_v43 = vmul.f32 %v4062_v6, %v3894_v0  ;;  %v3903_v52 = vmul.f32 0.5, %v8710_v57 }
0x1258   : > { %v6551_v46 = vpop.eup %6550  ;;  %v4104_v33 = vpack.c.bf16 %v4088_v19, %v4084_v58  ;;  %v4090_v26 = vmul.f32 %v4066_v28, %v3898_v51  ;;  %v4063_v16 = vadd.f32 1.0, %v6549_v11  ;;  %v3901_v4 = vmul.f32 0.5, %v8697_v10 }
0x1259   : > { %v6553_v13 = vpop.eup %6552  ;;  %v4061_v27 = vadd.f32 1.0, %v6551_v46  ;;  %v4083_v22 = vmul.f32 %v4059_v5, %v3891_v36  ;;  %v3905_v0 = vmul.f32 0.5, %v8713_v9 }
0x125a   : > { %v6555_v47 = vpop.eup %6554  ;;  %4414 = vmatprep.mubr.bf16.mxu1 %v4104_v33  ;;  %v4106_v59 = vpack.c.bf16 %v4090_v26, %v4086_v43  ;;  %v4087_v50 = vmul.f32 %v4063_v16, %v3895_v15  ;;  %v4065_v55 = vadd.f32 1.0, %v6553_v13  ;;  %v5478_v15 = vld [vmem:[%s1145_s13] ss:$0 sm:$0xff] }
0x125b   : > { %v6557_v34 = vpop.eup %6556  ;;  %v4068_v12 = vadd.f32 1.0, %v6555_v47  ;;  %v4085_v23 = vmul.f32 %v4061_v27, %v3893_v30 }
0x125c   : > { %v6559_v35 = vpop.eup %6558  ;;  %4471 = vmatprep.mubr.bf16.mxu0 %v4106_v59  ;;  %v4103_v54 = vpack.c.bf16 %v4087_v50, %v4083_v22  ;;  %v4089_v53 = vmul.f32 %v4065_v55, %v3897_v24  ;;  %v4072_v1 = vadd.f32 1.0, %v6557_v34 }
0x125d   : > { %v6561_v37 = vpop.eup %6560  ;;  %v4070_v40 = vadd.f32 1.0, %v6559_v35  ;;  %v4092_v49 = vmul.f32 %v4068_v12, %v3900_v21 }
0x125e   : > { %v6563_v41 = vpop.eup %6562  ;;  %4415 = vmatmul.mubr.bf16.gmra.mrb[52].mxu1 %v4103_v54  ;;  %v4105_v61 = vpack.c.bf16 %v4089_v53, %v4085_v23  ;;  %v4096_v17 = vmul.f32 %v4072_v1, %v3904_v42  ;;  %v4074_v44 = vadd.f32 1.0, %v6561_v37 }
0x125f   : > { %v6565_v63 = vpop.eup %6564  ;;  %v4067_v45 = vadd.f32 1.0, %v6563_v41  ;;  %v4094_v62 = vmul.f32 %v4070_v40, %v3902_v39 }
0x1260   : > { %v6567_v38 = vpop.eup %6566  ;;  %4472 = vmatmul.mubr.bf16.gmra.mrb[52].mxu0 %v4105_v61  ;;  %v4108_v60 = vpack.c.bf16 %v4096_v17, %v4092_v49  ;;  %v4098_v18 = vmul.f32 %v4074_v44, %v3906_v2  ;;  %v4071_v3 = vadd.f32 1.0, %v6565_v63 }
0x1261   : > { %v6569_v29 = vpop.eup %6568  ;;  %v4069_v51 = vadd.f32 1.0, %v6567_v38  ;;  %v4091_v7 = vmul.f32 %v4067_v45, %v3899_v48 }
0x1262   : > { %4422 = vmatprep.mubr.bf16.mxu1 %v4108_v60  ;;  %v4110_v6 = vpack.c.bf16 %v4098_v18, %v4094_v62  ;;  %v4095_v8 = vmul.f32 %v4071_v3, %v3903_v52  ;;  %v4073_v58 = vadd.f32 1.0, %v6569_v29 }
0x1263   : > { %v4093_v19 = vmul.f32 %v4069_v51, %v3901_v4 }
0x1264   : > { %4479 = vmatprep.mubr.bf16.mxu0 %v4110_v6  ;;  %v4107_v57 = vpack.c.bf16 %v4095_v8, %v4091_v7  ;;  %v4097_v28 = vmul.f32 %v4073_v58, %v3905_v0 }
0x1266   : > { %4423 = vmatmul.mubr.bf16.gmra.mrb[56].mxu1 %v4107_v57  ;;  %v4109_v11 = vpack.c.bf16 %v4097_v28, %v4093_v19 }
0x1268   : > { %4480 = vmatmul.mubr.bf16.gmra.mrb[56].mxu0 %v4109_v11 }
0x129f   : > { %v5677_v36 = vpop.f32.mrb[48].mxu1 }
0x12a0   : > { %v5678_v10 = vpop.f32.mrb[49].mxu1 }
0x12a1   : > { %v5711_v5 = vpop.f32.mrb[48].mxu0  ;;  %v5679_v46 = vadd.f32 %v5678_v10, %v5677_v36  ;;  %v5680_v9 = vpop.f32.mrb[50].mxu1 }
0x12a2   : > { %v5712_v33 = vpop.f32.mrb[49].mxu0  ;;  %v5681_v43 = vpop.f32.mrb[51].mxu1 }
0x12a3   : > { %v4409_v26 = vadd.f32 %v5679_v46, %v5478_v15  ;;  %v5713_v16 = vadd.f32 %v5712_v33, %v5711_v5  ;;  %v5714_v13 = vpop.f32.mrb[50].mxu0  ;;  %v5682_v30 = vadd.f32 %v5681_v43, %v5680_v9 }
0x12a4   : > { %v5715_v24 = vpop.f32.mrb[51].mxu0 }
0x12a5   : > { %v4466_v27 = vadd.f32 %v5713_v16, %v4409_v26  ;;  %v4412_v47 = vadd.f32 %v5682_v30, %v5478_v15  ;;  %v5716_v59 = vadd.f32 %v5715_v24, %v5714_v13 }
0x12a7   : > { %v4488_v22 = vadd.f32 %v4466_v27, %v8437_v31  ;;  %v4469_v50 = vadd.f32 %v5716_v59, %v4412_v47  ;;  %v7249_v59 = vmov (!%p5511_p4), 0.0|0.0  }
0x12a8   : > { %6073 = vmatprep.subr.bf16.mxu0 (!%p5511_p4), %v7249_v59  ;;  %6076 = vmatprep.subr.bf16.mxu1 (!%p5511_p4), %v7249_v59 }
0x12a9   : > { %4494 = vst [vmem:[#allocation2] sm:$0xff] %v4488_v22  ;;  %v4489_v55 = vadd.f32 %v4469_v50, %v8439_v32  ;;  %4506 = vadd.xlane.f32.xlu0 (!%p5511_p4), %v4488_v22 }
0x12ab   : > { %4495 = vst [vmem:[#allocation2 + $0x8] sm:$0xff] %v4489_v55 }
0x12ad   : > { %4508 = vadd.xlane.f32.xlu0 (!%p5511_p4), %v4489_v55 }
0x1331   : > { %v5683_v34 = vpop.f32.mrb[52].mxu1 }
0x1332   : > { %v5684_v21 = vpop.f32.mrb[53].mxu1 }
0x1333   : > { %v5717_v42 = vpop.f32.mrb[52].mxu0  ;;  %v5685_v12 = vadd.f32 %v5684_v21, %v5683_v34  ;;  %v5686_v35 = vpop.f32.mrb[54].mxu1 }
0x1334   : > { %v5718_v54 = vpop.f32.mrb[53].mxu0  ;;  %v5687_v23 = vpop.f32.mrb[55].mxu1 }
0x1335   : > { %v4417_v53 = vadd.f32 %v5685_v12, %v5478_v15  ;;  %v5719_v1 = vadd.f32 %v5718_v54, %v5717_v42  ;;  %v5720_v37 = vpop.f32.mrb[54].mxu0  ;;  %v5688_v39 = vadd.f32 %v5687_v23, %v5686_v35 }
0x1336   : > { %v5721_v2 = vpop.f32.mrb[55].mxu0  ;;  %v4507_v7 = vpop.xlane.xlu0 (!%p5511_p4), %4506 }
0x1337   : > { %v4474_v40 = vadd.f32 %v5719_v1, %v4417_v53  ;;  %v4420_v41 = vadd.f32 %v5688_v39, %v5478_v15  ;;  %v5722_v31 = vadd.f32 %v5721_v2, %v5720_v37  ;;  %v4518_v58 = vmul.f32 (!%p5511_p4), 0.0078125, %v4507_v7 }
0x1339   : > { %v4490_v61 = vadd.f32 %v4474_v40, %v8443_v56  ;;  %v4477_v49 = vadd.f32 %v5722_v31, %v4420_v41  ;;  %v5689_v32 = vpop.f32.mrb[56].mxu1  ;;  %v4524_v19 = vsub.f32 (!%p5511_p4), %v4488_v22, %v4518_v58  ;;  %v7251_v22 = vmov (!%p5511_p4), 0.0  }
0x133a   : > { %v5690_v17 = vpop.f32.mrb[57].mxu1  ;;  %v4509_v28 = vpop.xlane.xlu0 (!%p5511_p4), %4508  ;;  %6021 = vmatprep.mubr.msk.f32.mxu0 (!%p5511_p4), %vm7250_vm5, %v7251_v22  ;;  %6030 = vmatprep.mubr.msk.f32.mxu1 (!%p5511_p4), %vm7250_vm5, %v7251_v22 }
0x133b   : > { %4496 = vst [vmem:[#allocation2 + $0x10] sm:$0xff] %v4490_v61  ;;  %v4491_v44 = vadd.f32 %v4477_v49, %v8471_v14  ;;  %v5723_v63 = vpop.f32.mrb[56].mxu0  ;;  %v5691_v48 = vadd.f32 %v5690_v17, %v5689_v32  ;;  %v5692_v52 = vpop.f32.mrb[58].mxu1  ;;  %4510 = vadd.xlane.f32.xlu0 (!%p5511_p4), %v4490_v61  ;;  %v4530_v36 = vmul.f32 (!%p5511_p4), %v4524_v19, %v4524_v19  ;;  %v5512_v17 = vld [vmem:[#allocation21] ss:$0 sm:$0xff] (!%p5511_p4) }
0x133c   : > { %v5724_v45 = vpop.f32.mrb[57].mxu0  ;;  %v5693_v38 = vpop.f32.mrb[59].mxu1 }
0x133d   : > { %4497 = vst [vmem:[#allocation2 + $0x18] sm:$0xff] %v4491_v44  ;;  %v4425_v60 = vadd.f32 %v5691_v48, %v5478_v15  ;;  %v5725_v62 = vadd.f32 %v5724_v45, %v5723_v63  ;;  %v5726_v18 = vpop.f32.mrb[58].mxu0  ;;  %v5694_v3 = vadd.f32 %v5693_v38, %v5692_v52  ;;  %4512 = vadd.xlane.f32.xlu1 (!%p5511_p4), %v4491_v44  ;;  %v5513_v45 = vld [vmem:[#allocation22] ss:$0 sm:$0xff] (!%p5511_p4) }
0x133e   : > { %v5727_v29 = vpop.f32.mrb[59].mxu0 }
0x133f   : > { %v4482_v4 = vadd.f32 %v5725_v62, %v4425_v60  ;;  %v4428_v0 = vadd.f32 %v5694_v3, %v5478_v15  ;;  %v5728_v56 = vadd.f32 %v5727_v29, %v5726_v18  ;;  %4503 = sbr.rel (%p5511_p4) target bundleno = 5900 (0x170c), region = 212  ;;  %4536 = vadd.xlane.f32.xlu0 (!%p5511_p4), %v4530_v36 }
0x1341   : > { %v4492_v51 = vadd.f32 %v4482_v4, %v8477_v20  ;;  %v4485_v6 = vadd.f32 %v5728_v56, %v4428_v0 }
0x1343   : > { %4498 = vst [vmem:[#allocation2 + $0x20] sm:$0xff] %v4492_v51  ;;  %v4493_v14 = vadd.f32 %v4485_v6, %v8483_v25  ;;  %4514 = vadd.xlane.f32.xlu1 (!%p5511_p4), %v4492_v51  ;;  %v4519_v25 = vmul.f32 (!%p5511_p4), 0.0078125, %v4509_v28  ;;  %v4596_v28 = vld [vmem:[%s9069_s14] sm:$0xff] (!%p5511_p4) }
0x1345   : > { %4499 = vst [vmem:[#allocation2 + $0x28] sm:$0xff] %v4493_v14  ;;  %v4525_v10 = vsub.f32 (!%p5511_p4), %v4489_v55, %v4519_v25  ;;  %v6576_v25 = vld [vmem:[%s9070_s5] sm:$0xff] (!%p5511_p4)  }
0x1347   : > { %4516 = vadd.xlane.f32.xlu1 %v4493_v14  ;;  %v4531_v26 = vmul.f32 %v4525_v10, %v4525_v10 }
0x134b   : > { %4538 = vadd.xlane.f32.xlu1 %v4531_v26  ;;  %v6584_v26 = vld [vmem:[#allocation23] sm:$0xff]  }
0x13c8   : > { %v4511_v9 = vpop.xlane.xlu0 %4510 }
0x13c9   : > { %v4520_v43 = vmul.f32 0.0078125, %v4511_v9  ;;  %v6581_v9 = vld [vmem:[%s9070_s5 + $0x28] sm:$0xff]  }
0x13ca   : > { %v4513_v8 = vpop.xlane.xlu1 %4512 }
0x13cb   : > { %v4521_v57 = vmul.f32 0.0078125, %v4513_v8  ;;  %v4526_v13 = vsub.f32 %v4490_v61, %v4520_v43  ;;  %v6583_v43 = vld [vmem:[%s9070_s5 + $0x38] sm:$0xff]  }
0x13cc   : > { %v4537_v50 = vpop.xlane.xlu0 %4536 }
0x13cd   : > { %v8796_v20 = vsub.f32 %v4491_v44, %v4521_v57  ;;  %v4532_v27 = vmul.f32 %v4526_v13, %v4526_v13  ;;  %v4548_v55 = vmul.f32 0.0078125, %v4537_v50 }
0x13cf   : > { %v4533_v46 = vmul.f32 %v8796_v20, %v8796_v20  ;;  %v4554_v34 = vadd.f32 1e-05, %v4548_v55 }
0x13d0   : > { %v4515_v11 = vpop.xlane.xlu1 %4514 }
0x13d1   : > { %v4522_v15 = vmul.f32 0.0078125, %v4515_v11  ;;  %4542 = vadd.xlane.f32.xlu0 %v4533_v46  ;;  %6592 = vrsqrt.f32 %v4554_v34  ;;  %v6580_v46 = vld [vmem:[%s9070_s5 + $0x20] sm:$0xff]  }
0x13d3   : > { %v4528_v5 = vsub.f32 %v4492_v51, %v4522_v15  ;;  %v6577_v15 = vld [vmem:[%s9070_s5 + $0x8] sm:$0xff]  }
0x13d4   : > { %v4517_v33 = vpop.xlane.xlu1 %4516 }
0x13d5   : > { %v4523_v16 = vmul.f32 0.0078125, %v4517_v33  ;;  %v4534_v24 = vmul.f32 %v4528_v5, %v4528_v5  ;;  %4540 = vadd.xlane.f32.xlu0 %v4532_v27  ;;  %v6582_v33 = vld [vmem:[%s9070_s5 + $0x30] sm:$0xff]   ;;  %v6589_v27 = vld [vmem:[#allocation23 + $0x28] sm:$0xff]  }
0x13d7   : > { %v4529_v30 = vsub.f32 %v4493_v14, %v4523_v16  ;;  %4544 = vadd.xlane.f32.xlu1 %v4534_v24  ;;  %v6585_v16 = vld [vmem:[#allocation23 + $0x8] sm:$0xff]   ;;  %v6588_v24 = vld [vmem:[#allocation23 + $0x20] sm:$0xff]  }
0x13d8   : > { %v4539_v21 = vpop.xlane.xlu1 %4538 }
0x13d9   : > { %v4535_v47 = vmul.f32 %v4529_v30, %v4529_v30  ;;  %v4549_v12 = vmul.f32 0.0078125, %v4539_v21  ;;  %v6590_v21 = vld [vmem:[#allocation23 + $0x30] sm:$0xff]  }
0x13db   : > { %4546 = vadd.xlane.f32.xlu1 %v4535_v47  ;;  %v4555_v54 = vadd.f32 1e-05, %v4549_v12  ;;  %v6593_v61 = vpop.eup %6592  ;;  %v5516_v12 = vld [vmem:[%s9071_s19] ss:$0 sm:$0xff] }
0x13dc   : > { %v4566_v32 = vmul.f32 %v6593_v61, %v4524_v19 }
0x13dd   : > { %6594 = vrsqrt.f32 %v4555_v54 }
0x13de   : > { %v4578_v52 = vmul.f32 %v5512_v17, %v4566_v32 }
0x13e0   : > { %v4590_v3 = vadd.f32 %v5513_v45, %v4578_v52 }
0x13e7   : > { %v6595_v44 = vpop.eup %6594 }
0x13e8   : > { %v4567_v48 = vmul.f32 %v6595_v44, %v4525_v10  ;;  %v6578_v10 = vld [vmem:[%s9070_s5 + $0x10] sm:$0xff]  }
0x13ea   : > { %v4579_v60 = vmul.f32 %v5512_v17, %v4567_v48 }
0x13ec   : > { %v4591_v29 = vadd.f32 %v5513_v45, %v4579_v60 }
0x13ee   : > { %v6074_v51 = vpack.c.bf16 %v4591_v29, %v4590_v3 }
0x13f0   : > { %6075 = vmatpush3.bf16.msra.mxu0 %v6074_v51 }
0x13f1   : > { %6019 = vmatprep.subr.mxu0 %v7251_v22 }
0x145e   : > { %v4543_v42 = vpop.xlane.xlu0 %4542 }
0x145f   : > { %v4551_v35 = vmul.f32 0.0078125, %v4543_v42  ;;  %v6591_v42 = vld [vmem:[#allocation23 + $0x38] sm:$0xff]  }
0x1461   : > { %v4557_v23 = vadd.f32 1e-05, %v4551_v35 }
0x1462   : > { %v4541_v1 = vpop.xlane.xlu0 %4540 }
0x1463   : > { %v4550_v39 = vmul.f32 0.0078125, %v4541_v1  ;;  %6596 = vrsqrt.f32 %v4557_v23 }
0x1464   : > { %v4545_v53 = vpop.xlane.xlu1 %4544 }
0x1465   : > { %v4552_v37 = vmul.f32 0.0078125, %v4545_v53  ;;  %v4556_v40 = vadd.f32 1e-05, %v4550_v39 }
0x1467   : > { %v4558_v2 = vadd.f32 1e-05, %v4552_v37 }
0x1468   : > { %v4547_v41 = vpop.xlane.xlu1 %4546 }
0x1469   : > { %6598 = vrsqrt.f32 %v4558_v2  ;;  %v4553_v31 = vmul.f32 0.0078125, %v4547_v41  ;;  %v5525_v41 = vld [vmem:[#allocation25] ss:$0 sm:$0xff] }
0x146a   : > { %6600 = vrsqrt.f32 %v4556_v40 }
0x146b   : > { %v4559_v49 = vadd.f32 1e-05, %v4553_v31 }
0x146d   : > { %6602 = vrsqrt.f32 %v4559_v49  ;;  %v6597_v63 = vpop.eup %6596 }
0x146e   : > { %v4569_v38 = vmul.f32 %v6597_v63, %v8796_v20 }
0x1470   : > { %v4581_v0 = vmul.f32 %v5512_v17, %v4569_v38 }
0x1472   : > { %v4593_v8 = vadd.f32 %v5513_v45, %v4581_v0 }
0x1473   : > { %v6599_v62 = vpop.eup %6598 }
0x1474   : > { %v6601_v18 = vpop.eup %6600  ;;  %v4570_v4 = vmul.f32 %v6599_v62, %v4528_v5  ;;  %v6579_v5 = vld [vmem:[%s9070_s5 + $0x18] sm:$0xff]  }
0x1475   : > { %v4568_v56 = vmul.f32 %v6601_v18, %v4526_v13  ;;  %v6586_v13 = vld [vmem:[#allocation23 + $0x10] sm:$0xff]  }
0x1476   : > { %v4582_v6 = vmul.f32 %v5512_v17, %v4570_v4 }
0x1477   : > { %v6603_v14 = vpop.eup %6602  ;;  %v4580_v7 = vmul.f32 %v5512_v17, %v4568_v56 }
0x1478   : > { %v4594_v58 = vadd.f32 %v5513_v45, %v4582_v6  ;;  %v4571_v57 = vmul.f32 %v6603_v14, %v4529_v30  ;;  %v6587_v30 = vld [vmem:[#allocation23 + $0x18] sm:$0xff]  }
0x1479   : > { %v4592_v19 = vadd.f32 %v5513_v45, %v4580_v7 }
0x147a   : > { %v6077_v20 = vpack.c.bf16 %v4594_v58, %v4593_v8  ;;  %v4583_v11 = vmul.f32 %v5512_v17, %v4571_v57 }
0x147b   : > { %6020 = vmatpush3.msra.mxu0 %v4592_v19 }
0x147c   : > { %6078 = vmatpush3.bf16.msra.mxu1 %v6077_v20  ;;  %6022 = vmatmul.mubr.msk.f32.vlgmr.msra.gmra.mrb[0].mxu0 %vm2543_vm4, %v4596_v28  ;;  %v4595_v36 = vadd.f32 %v5513_v45, %v4583_v11 }
0x147d   : > { %6028 = vmatprep.subr.mxu1 %v7251_v22  ;;  %6033 = vmatprep.subr.bf16.mxu0 %v7251_v22 }
0x147e   : > { %6049 = vmatprep.mubr.msk.bf16.mxu0 %vm7250_vm5, %v7251_v22  ;;  %6034 = vmatpush3.bf16.msra.mxu0 %v6576_v25 }
0x147f   : > { %6035 = vmatprep.subr.bf16.mxu0 %v7251_v22 }
0x1480   : > { %6029 = vmatpush3.msra.mxu1 %v4595_v36 }
0x1481   : > { %6031 = vmatmul.mubr.msk.f32.vlgmr.msra.gmra.mrb[0].mxu1 %vm2543_vm4, %v4596_v28  ;;  %6053 = vmatprep.subr.bf16.mxu1 %v7251_v22 }
0x1482   : > { %6069 = vmatprep.mubr.msk.bf16.mxu1 %vm7250_vm5, %v7251_v22  ;;  %6036 = vmatpush3.bf16.msra.mxu0 %v6577_v15 }
0x1483   : > { %6037 = vmatprep.subr.bf16.mxu0 %v7251_v22  ;;  %6054 = vmatpush3.bf16.msra.mxu1 %v6584_v26 }
0x1484   : > { %6055 = vmatprep.subr.bf16.mxu1 %v7251_v22 }
0x1486   : > { %6038 = vmatpush3.bf16.msra.mxu0 %v6578_v10 }
0x1487   : > { %6039 = vmatprep.subr.bf16.mxu0 %v7251_v22  ;;  %6056 = vmatpush3.bf16.msra.mxu1 %v6585_v16 }
0x1488   : > { %6057 = vmatprep.subr.bf16.mxu1 %v7251_v22 }
0x148a   : > { %6040 = vmatpush3.bf16.msra.mxu0 %v6579_v5 }
0x148b   : > { %6041 = vmatprep.subr.bf16.mxu0 %v7251_v22  ;;  %6058 = vmatpush3.bf16.msra.mxu1 %v6586_v13 }
0x148c   : > { %6059 = vmatprep.subr.bf16.mxu1 %v7251_v22 }
0x148e   : > { %6042 = vmatpush3.bf16.msra.mxu0 %v6580_v46 }
0x148f   : > { %6043 = vmatprep.subr.bf16.mxu0 %v7251_v22  ;;  %6060 = vmatpush3.bf16.msra.mxu1 %v6587_v30 }
0x1490   : > { %6061 = vmatprep.subr.bf16.mxu1 %v7251_v22 }
0x1492   : > { %6044 = vmatpush3.bf16.msra.mxu0 %v6581_v9 }
0x1493   : > { %6045 = vmatprep.subr.bf16.mxu0 %v7251_v22  ;;  %6062 = vmatpush3.bf16.msra.mxu1 %v6588_v24 }
0x1494   : > { %6063 = vmatprep.subr.bf16.mxu1 %v7251_v22 }
0x1496   : > { %6046 = vmatpush3.bf16.msra.mxu0 %v6582_v33 }
0x1497   : > { %6047 = vmatprep.subr.bf16.mxu0 %v7251_v22  ;;  %6064 = vmatpush3.bf16.msra.mxu1 %v6589_v27 }
0x1498   : > { %6065 = vmatprep.subr.bf16.mxu1 %v7251_v22 }
0x149a   : > { %6048 = vmatpush3.bf16.msra.mxu0 %v6583_v43 }
0x149b   : > { %6066 = vmatpush3.bf16.msra.mxu1 %v6590_v21 }
0x149c   : > { %6067 = vmatprep.subr.bf16.mxu1 %v7251_v22 }
0x149f   : > { %6068 = vmatpush3.bf16.msra.mxu1 %v6591_v42 }
0x154f   : > { %v4666_v47 = vpop.f32.mrb[0].mxu0 }
0x1550   : > { %v6023_v59 = vpop.f32.mrb[1].mxu0 }
0x1554   : > { %v4736_v50 = vpop.f32.mrb[0].mxu1 }
0x1555   : > { %v4740_v55 = vpack.c.bf16 %v4736_v50, %v4666_v47  ;;  %v6032_v34 = vpop.f32.mrb[1].mxu1 }
0x1557   : > { %6050 = vmatmul.mubr.bf16.vlgmr.msra.gmra.mrb[4].mxu0 %v4740_v55 }
0x162a   : > { %v4846_v35 = vpop.f32.mrb[4].mxu0 }
0x162b   : > { %v4847_v54 = vadd.f32 %v5516_v12, %v4846_v35  ;;  %v6051_v23 = vpop.f32.mrb[5].mxu0 }
0x162c   : > { %v4849_v53 = vpop.f32.mrb[6].mxu0 }
0x162d   : > { %v4850_v1 = vadd.f32 %v5516_v12, %v4849_v53  ;;  %v6052_v37 = vpop.f32.mrb[7].mxu0  ;;  %v4853_v39 = vmax.f32 %v4847_v54, 0.0 }
0x162f   : > { %v4854_v2 = vmax.f32 %v4850_v1, 0.0 }
0x1631   : > { %v4855_v40 = vpack.c.bf16 %v4854_v2, %v4853_v39 }
0x1633   : > { %6070 = vmatmul.mubr.bf16.vlgmr.msra.gmra.mrb[4].mxu1 %v4855_v40 }
0x1706   : > { %v4961_v31 = vpop.f32.mrb[4].mxu1 }
0x1707   : > { %v4962_v61 = vadd.f32 %v5525_v41, %v4961_v31  ;;  %v6071_v22 = vpop.f32.mrb[5].mxu1 }
0x1708   : > { %v4964_v49 = vpop.f32.mrb[6].mxu1 }
0x1709   : > { %4968 = vst [vmem:[%s9072_s6] sm:$0xff] %v4962_v61  ;;  %v4965_v32 = vadd.f32 %v5525_v41, %v4964_v49  ;;  %v6072_v17 = vpop.f32.mrb[7].mxu1 }
0x170b   : > { %4969 = vst [vmem:[%s9072_s6 + $0x8] sm:$0xff] %v4965_v32 }
0x170c PF: > { %s9073_s30 = sld [smem:[#allocation37_spill]]  ;;  %s9074_s7 = sld [smem:[#allocation33_spill]] }
0x170d   : > { %s9075_s4 = sld [smem:[#allocation34_spill]]  ;;  %s9076_s8 = sld [smem:[#allocation38_spill]] }
0x1712   : > { %p38_p9 = scmp.ge.s32.totalorder %s9073_s30, 4  }
0x1714   :  { %40 = sbr.rel (!%p38_p9) target bundleno = 33 (0x21), region = 328 }
0x171b   :  { %4981 = vsyncpa [#allocation4], 1 }
0x171c   :  { %4983 = vsyncpa [#allocation4 + $0x1], 1 }
0x171d   :  { %4984 = vsyncpa [#allocation6], 1 }
0x171e   :  { %4985 = vsyncpa [#allocation9], 1 }
0x171f   :  { %4986 = vsyncpa [#allocation24], 1 }

</bundles_post_ra>
